<compile_context>
chip_gen: v5e
topology: v5e:2x2
jax: 0.10.0
libtpu: 0.0.40
codegen_flags: <defaults>
</compile_context>

<pallas_src>
import jax
import jax.numpy as jnp
from jax.experimental import pallas as pl
from jax.experimental.pallas import tpu as pltpu

IMG_SIZE = 28
IN_DIM = IMG_SIZE * IMG_SIZE      # 784 (kept unpadded; Mosaic pads lanes in VMEM)
H1 = 1024
H2 = 512
OUT_DIM = 10
N_PAD = 128                       # lane-aligned fc3 output width

_STEP_OVERHEAD_ROWS = 64          # ~0.35us/grid-step expressed in batch rows
_MAX_TB = 512                     # keeps VMEM ~<16 MiB (safe on v7x's 64 MiB)


def _round_up(x, m):
    return ((x + m - 1) // m) * m


def _choose_batch_tile(b8):
    """Pick (TB, B_pad): minimize wasted rows + per-grid-step overhead."""
    if b8 <= _MAX_TB:
        return b8, b8
    best = None
    for tb in (512, 256, 128, 64):
        bp = _round_up(b8, tb)
        cost = bp + (bp // tb) * _STEP_OVERHEAD_ROWS
        if best is None or cost < best[0]:
            best = (cost, tb, bp)
    return best[1], best[2]


def mlp_kernel(x_ref, w1_ref, b1_ref, w2_ref, b2_ref, w3_ref, b3_ref, o_ref):
    # fc1 + ReLU  (bf16 MXU inputs, f32 accumulation)
    x = x_ref[...].astype(jnp.bfloat16)
    h1 = jnp.dot(x, w1_ref[...], preferred_element_type=jnp.float32) + b1_ref[...]
    h1 = jnp.maximum(h1, 0.0).astype(jnp.bfloat16)
    # fc2 + ReLU
    h2 = jnp.dot(h1, w2_ref[...], preferred_element_type=jnp.float32) + b2_ref[...]
    h2 = jnp.maximum(h2, 0.0).astype(jnp.bfloat16)
    # fc3 (no activation; output columns 10..127 are zero-padded weights/bias)
    out = jnp.dot(h2, w3_ref[...], preferred_element_type=jnp.float32) + b3_ref[...]
    o_ref[...] = out.astype(o_ref.dtype)


def prepare_params(params):
    """One-time weight prep (outside the per-call path)."""
    w1, b1, w2, b2, w3, b3 = params
    w1_p = w1.astype(jnp.bfloat16)                                   # (784, 1024)
    w2_p = w2.astype(jnp.bfloat16)                                   # (1024, 512)
    w3_p = jnp.pad(w3, ((0, 0), (0, N_PAD - OUT_DIM))).astype(jnp.bfloat16)
    b1_p = b1.reshape(1, H1).astype(jnp.float32)
    b2_p = b2.reshape(1, H2).astype(jnp.float32)
    b3_p = jnp.pad(b3.reshape(1, OUT_DIM),
                   ((0, 0), (0, N_PAD - OUT_DIM))).astype(jnp.float32)
    return (w1_p, b1_p, w2_p, b2_p, w3_p, b3_p)


@jax.jit
def net_forward(x, prepared):
    """x: (B,1,28,28) / (B,28,28) / (B,784) float32. Returns (B, 10) float32."""
    w1_p, b1_p, w2_p, b2_p, w3_p, b3_p = prepared
    x2d = x.reshape(-1, IN_DIM).astype(jnp.float32)      # torch: x.view(-1, 784)
    B = x2d.shape[0]

    # Pad batch only to a sublane multiple (8); tile the batch over a 1-D grid.
    B8 = _round_up(B, 8)
    TB, B_pad = _choose_batch_tile(B8)
    grid = (B_pad // TB,)
    x_p = x2d if B_pad == B else jnp.pad(x2d, ((0, B_pad - B), (0, 0)))

    # Weights/biases: constant block index (DMA'd once, stay resident) and
    # single-buffered -- the block never changes so double buffering is waste.
    def resident(a):
        return pl.BlockSpec(a.shape, lambda i: (0, 0),
                            pipeline_mode=pl.Buffered(buffer_count=1))

    in_specs = [
        pl.BlockSpec((TB, IN_DIM), lambda i: (i, 0)),   # x tile, K=784 full extent
        resident(w1_p), resident(b1_p),
        resident(w2_p), resident(b2_p),
        resident(w3_p), resident(b3_p),
    ]
    out_specs = pl.BlockSpec((TB, N_PAD), lambda i: (i, 0))

    flops = 2 * B_pad * (IN_DIM * H1 + H1 * H2 + H2 * N_PAD)
    bytes_accessed = (
        x_p.size * 4
        + (w1_p.size + w2_p.size + w3_p.size) * 2
        + (b1_p.size + b2_p.size + b3_p.size) * 4
        + B_pad * N_PAD * 4
    )

    out_padded = pl.pallas_call(
        mlp_kernel,
        out_shape=jax.ShapeDtypeStruct((B_pad, N_PAD), jnp.float32),
        grid=grid,
        in_specs=in_specs,
        out_specs=out_specs,
        compiler_params=pltpu.CompilerParams(
            dimension_semantics=("parallel",),
            vmem_limit_bytes=32 << 20,
        ),
        cost_estimate=pl.CostEstimate(
            flops=flops, transcendentals=0, bytes_accessed=bytes_accessed),
    )(x_p, w1_p, b1_p, w2_p, b2_p, w3_p, b3_p)

    return out_padded[:B, :OUT_DIM]


def init_params(key):
    """Deterministic parameter init (uniform, torch-Linear-like fan-in scaling)."""
    ks = jax.random.split(key, 6)

    def linear(kw, kb, fan_in, fan_out):
        bound = 1.0 / jnp.sqrt(float(fan_in))
        w = jax.random.uniform(kw, (fan_in, fan_out), jnp.float32, -bound, bound)
        b = jax.random.uniform(kb, (1, fan_out), jnp.float32, -bound, bound)
        return w, b

    w1, b1 = linear(ks[0], ks[1], IN_DIM, H1)
    w2, b2 = linear(ks[2], ks[3], H1, H2)
    w3, b3 = linear(ks[4], ks[5], H2, OUT_DIM)
    return (w1, b1, w2, b2, w3, b3)


def reference_forward(x, params):
    """Plain-JAX reference mirroring the kernel's bf16-weight / f32-accum math."""
    w1, b1, w2, b2, w3, b3 = params
    x2d = x.reshape(-1, IN_DIM).astype(jnp.float32)

    def mm(a, w):
        return jnp.dot(a.astype(jnp.bfloat16), w.astype(jnp.bfloat16),
                       preferred_element_type=jnp.float32)

    h1 = jnp.maximum(mm(x2d, w1) + b1, 0.0)
    h2 = jnp.maximum(mm(h1, w2) + b2, 0.0)
    return mm(h2, w3) + b3


def reference_forward_f32(x, params):
    """Full-precision reference (sanity check on bf16 error)."""
    w1, b1, w2, b2, w3, b3 = params
    x2d = x.reshape(-1, IN_DIM).astype(jnp.float32)
    h1 = jnp.maximum(x2d @ w1 + b1, 0.0)
    h2 = jnp.maximum(h1 @ w2 + b2, 0.0)
    return h2 @ w3 + b3


if __name__ == "__main__":
    key = jax.random.PRNGKey(0)
    k_params, k_x = jax.random.split(key)

    params = init_params(k_params)
    prepared = prepare_params(params)          # one-time weight prep
    # Small NCHW batch, consistent with img_size = 28 (like the PyTorch model).
    x = jax.random.normal(k_x, (2, 1, IMG_SIZE, IMG_SIZE), dtype=jnp.float32)

    out = jax.block_until_ready(net_forward(x, prepared))

    ref = reference_forward(x, params)
    ref_f32 = reference_forward_f32(x, params)

    assert out.shape == (2, OUT_DIM), out.shape
    assert jnp.allclose(out, ref, atol=2e-3, rtol=2e-3), "mismatch vs bf16 reference"
    assert jnp.allclose(out, ref_f32, atol=5e-2, rtol=5e-2), "mismatch vs f32 reference"

    print("KERNEL_OK")
</pallas_src>

<mosaic_0001>
module attributes {stable_mosaic.version = 11 : i64} {
  func.func @mlp_kernel(%arg0: i32, %arg1: memref<8x784xf32, #tpu.memory_space<vmem>>, %arg2: memref<784x1024xbf16, #tpu.memory_space<vmem>>, %arg3: memref<1x1024xf32, #tpu.memory_space<vmem>>, %arg4: memref<1024x512xbf16, #tpu.memory_space<vmem>>, %arg5: memref<1x512xf32, #tpu.memory_space<vmem>>, %arg6: memref<512x128xbf16, #tpu.memory_space<vmem>>, %arg7: memref<1x128xf32, #tpu.memory_space<vmem>>, %arg8: memref<8x128xf32, #tpu.memory_space<vmem>>) attributes {dimension_semantics = [#tpu.dimension_semantics<parallel>], iteration_bounds = array<i64: 1>, scalar_prefetch = 0 : i64, scratch_operands = 0 : i64, tpu.core_type = #tpu.core_type<tc>, window_params = [{transform_indices = @transform_0, window_bounds = array<i64: 8, 784>}, {pipeline_mode = #tpu.pipeline_mode<synchronous>, transform_indices = @transform_1, window_bounds = array<i64: 784, 1024>}, {pipeline_mode = #tpu.pipeline_mode<synchronous>, transform_indices = @transform_2, window_bounds = array<i64: 1, 1024>}, {pipeline_mode = #tpu.pipeline_mode<synchronous>, transform_indices = @transform_3, window_bounds = array<i64: 1024, 512>}, {pipeline_mode = #tpu.pipeline_mode<synchronous>, transform_indices = @transform_4, window_bounds = array<i64: 1, 512>}, {pipeline_mode = #tpu.pipeline_mode<synchronous>, transform_indices = @transform_5, window_bounds = array<i64: 512, 128>}, {pipeline_mode = #tpu.pipeline_mode<synchronous>, transform_indices = @transform_6, window_bounds = array<i64: 1, 128>}, {transform_indices = @transform_7, window_bounds = array<i64: 8, 128>}]} {
    %c0 = arith.constant 0 : index
    %c0_0 = arith.constant 0 : index
    %0 = vector.load %arg1[%c0, %c0_0] : memref<8x784xf32, #tpu.memory_space<vmem>>, vector<8x784xf32>
    %1 = arith.truncf %0 : vector<8x784xf32> to vector<8x784xbf16>
    %c0_1 = arith.constant 0 : index
    %c0_2 = arith.constant 0 : index
    %2 = vector.load %arg2[%c0_1, %c0_2] : memref<784x1024xbf16, #tpu.memory_space<vmem>>, vector<784x1024xbf16>
    %cst = arith.constant dense<0.000000e+00> : vector<8x1024xf32>
    %3 = tpu.matmul %1, %2, %cst {dimension_numbers = #tpu.dot_dimension_numbers<[1], [0], [0], [1], [0, 0, 1, 1], [], []>} : vector<8x784xbf16>, vector<784x1024xbf16>, vector<8x1024xf32> -> vector<8x1024xf32>
    %c0_3 = arith.constant 0 : index
    %c0_4 = arith.constant 0 : index
    %4 = vector.load %arg3[%c0_3, %c0_4] : memref<1x1024xf32, #tpu.memory_space<vmem>>, vector<1x1024xf32>
    %5 = vector.broadcast %4 : vector<1x1024xf32> to vector<8x1024xf32>
    %6 = arith.addf %3, %5 : vector<8x1024xf32>
    %cst_5 = arith.constant 0.000000e+00 : f32
    %7 = vector.broadcast %cst_5 : f32 to vector<8x1024xf32>
    %8 = arith.maximumf %6, %7 : vector<8x1024xf32>
    %9 = arith.truncf %8 : vector<8x1024xf32> to vector<8x1024xbf16>
    %c0_6 = arith.constant 0 : index
    %c0_7 = arith.constant 0 : index
    %10 = vector.load %arg4[%c0_6, %c0_7] : memref<1024x512xbf16, #tpu.memory_space<vmem>>, vector<1024x512xbf16>
    %cst_8 = arith.constant dense<0.000000e+00> : vector<8x512xf32>
    %11 = tpu.matmul %9, %10, %cst_8 {dimension_numbers = #tpu.dot_dimension_numbers<[1], [0], [0], [1], [0, 0, 1, 1], [], []>} : vector<8x1024xbf16>, vector<1024x512xbf16>, vector<8x512xf32> -> vector<8x512xf32>
    %c0_9 = arith.constant 0 : index
    %c0_10 = arith.constant 0 : index
    %12 = vector.load %arg5[%c0_9, %c0_10] : memref<1x512xf32, #tpu.memory_space<vmem>>, vector<1x512xf32>
    %13 = vector.broadcast %12 : vector<1x512xf32> to vector<8x512xf32>
    %14 = arith.addf %11, %13 : vector<8x512xf32>
    %cst_11 = arith.constant 0.000000e+00 : f32
    %15 = vector.broadcast %cst_11 : f32 to vector<8x512xf32>
    %16 = arith.maximumf %14, %15 : vector<8x512xf32>
    %17 = arith.truncf %16 : vector<8x512xf32> to vector<8x512xbf16>
    %c0_12 = arith.constant 0 : index
    %c0_13 = arith.constant 0 : index
    %18 = vector.load %arg6[%c0_12, %c0_13] : memref<512x128xbf16, #tpu.memory_space<vmem>>, vector<512x128xbf16>
    %cst_14 = arith.constant dense<0.000000e+00> : vector<8x128xf32>
    %19 = tpu.matmul %17, %18, %cst_14 {dimension_numbers = #tpu.dot_dimension_numbers<[1], [0], [0], [1], [0, 0, 1, 1], [], []>} : vector<8x512xbf16>, vector<512x128xbf16>, vector<8x128xf32> -> vector<8x128xf32>
    %c0_15 = arith.constant 0 : index
    %c0_16 = arith.constant 0 : index
    %20 = vector.load %arg7[%c0_15, %c0_16] : memref<1x128xf32, #tpu.memory_space<vmem>>, vector<1x128xf32>
    %21 = vector.broadcast %20 : vector<1x128xf32> to vector<8x128xf32>
    %22 = arith.addf %19, %21 : vector<8x128xf32>
    %c0_17 = arith.constant 0 : index
    %c0_18 = arith.constant 0 : index
    %23 = vector.load %arg8[%c0_17, %c0_18] : memref<8x128xf32, #tpu.memory_space<vmem>>, vector<8x128xf32>
    tpu.vector_store %arg8[%c0_17, %c0_18], %22 {strides = array<i32>} : memref<8x128xf32, #tpu.memory_space<vmem>>, vector<8x128xf32>,
    return
  }
  func.func @transform_0(%arg0: i32) -> (i32, i32) {
    %c0_i32 = arith.constant 0 : i32
    %c0_i32_0 = arith.constant 0 : i32
    return %arg0, %c0_i32 : i32, i32
  }
  func.func @transform_1(%arg0: i32) -> (i32, i32) {
    %c0_i32 = arith.constant 0 : i32
    %c0_i32_0 = arith.constant 0 : i32
    %c0_i32_1 = arith.constant 0 : i32
    return %c0_i32, %c0_i32_0 : i32, i32
  }
  func.func @transform_2(%arg0: i32) -> (i32, i32) {
    %c0_i32 = arith.constant 0 : i32
    %c0_i32_0 = arith.constant 0 : i32
    %c0_i32_1 = arith.constant 0 : i32
    return %c0_i32, %c0_i32_0 : i32, i32
  }
  func.func @transform_3(%arg0: i32) -> (i32, i32) {
    %c0_i32 = arith.constant 0 : i32
    %c0_i32_0 = arith.constant 0 : i32
    %c0_i32_1 = arith.constant 0 : i32
    return %c0_i32, %c0_i32_0 : i32, i32
  }
  func.func @transform_4(%arg0: i32) -> (i32, i32) {
    %c0_i32 = arith.constant 0 : i32
    %c0_i32_0 = arith.constant 0 : i32
    %c0_i32_1 = arith.constant 0 : i32
    return %c0_i32, %c0_i32_0 : i32, i32
  }
  func.func @transform_5(%arg0: i32) -> (i32, i32) {
    %c0_i32 = arith.constant 0 : i32
    %c0_i32_0 = arith.constant 0 : i32
    %c0_i32_1 = arith.constant 0 : i32
    return %c0_i32, %c0_i32_0 : i32, i32
  }
  func.func @transform_6(%arg0: i32) -> (i32, i32) {
    %c0_i32 = arith.constant 0 : i32
    %c0_i32_0 = arith.constant 0 : i32
    %c0_i32_1 = arith.constant 0 : i32
    return %c0_i32, %c0_i32_0 : i32, i32
  }
  func.func @transform_7(%arg0: i32) -> (i32, i32) {
    %c0_i32 = arith.constant 0 : i32
    %c0_i32_0 = arith.constant 0 : i32
    return %arg0, %c0_i32 : i32, i32
  }
}

</mosaic_0001>

<bundles_post_ra>
// kernel: net_forward.1
= control target key start
LH: loop header
LB: loop body
LE: loop exit
PB: predicated region body
PF: predicated region fallthrough
CT: control target
= control target key end

     0   :  { %12 = vsyncpa [#allocation3], 0  ;;  %s9446_s0 = inlined_call_operand.vmem [shape: f32[8,784], index: 0, kind: input, shape index: {}]   ;;  %s9447_s1 = inlined_call_operand.hbm [shape: bf16[784,1024], index: 1, kind: input, shape index: {}]   ;;  %s9448_s2 = inlined_call_operand.hbm [shape: f32[1,1024], index: 2, kind: input, shape index: {}]   ;;  %s9449_s3 = inlined_call_operand.hbm [shape: bf16[1024,512], index: 3, kind: input, shape index: {}]   ;;  %s9450_s4 = inlined_call_operand.hbm [shape: f32[1,512], index: 4, kind: input, shape index: {}]   ;;  %s9451_s5 = inlined_call_operand.hbm [shape: bf16[512,128], index: 5, kind: input, shape index: {}]   ;;  %s9452_s6 = inlined_call_operand.hbm [shape: f32[1,128], index: 6, kind: input, shape index: {}]   ;;  %s9453_s7 = inlined_call_operand.vmem [shape: f32[8,128], index: 7, kind: output, shape index: {}]  }
   0x1   :  { %13 = vsyncpa [#allocation5], 0 }
   0x2   :  { %14 = vsyncpa [#allocation8], 0  ;;  %s36_s26 = sshll.u32 %s9448_s2, 4  ;;  %s37_s26 = int_to_ptr.hbm [resolvable:$true] %s36_s26 }
   0x3   :  { %15 = vsyncpa [#allocation11], 0  ;;  %s9114_s27 = smov [#allocation4]   ;;  %s60_s8 = sshll.u32 %s9450_s4, 4  ;;  %s61_s8 = int_to_ptr.hbm [resolvable:$true] %s60_s8 }
   0x4   :  { %s38_s28 = sshll.u32 %s9114_s27, 4  ;;  %s9115_s9 = smov [#allocation7]   ;;  %s39_s28 = int_to_ptr.vmem [resolvable:$true] %s38_s28 }
   0x5   :  { %41 = dma.hbm_to_vmem [thread:$0]  %s37_s26, 128, %s39_s28, [#allocation5]  }
   0x6   :  { %s62_s10 = sshll.u32 %s9115_s9, 4  ;;  %s22_s13 = sshll.u32 %s9447_s1, 4  ;;  %s63_s10 = int_to_ptr.vmem [resolvable:$true] %s62_s10  ;;  %s23_s13 = int_to_ptr.hbm [resolvable:$true] %s22_s13 }
   0x7   :  { %65 = dma.hbm_to_vmem [thread:$0]  %s61_s8, 64, %s63_s10, [#allocation8]  }
   0x8   :  { %s9116_s2 = smov [#allocation2]   ;;  %s46_s17 = sshll.u32 %s9449_s3, 4  ;;  %s47_s17 = int_to_ptr.hbm [resolvable:$true] %s46_s17 }
   0x9   :  { %s24_s14 = sshll.u32 %s9116_s2, 4  ;;  %s9117_s18 = smov 512   ;;  %s25_s14 = int_to_ptr.vmem [resolvable:$true] %s24_s14 }
   0xa   :  { %s9118_s4 = smov 32   ;;  %s9119_s19 = smov [#allocation6]  }
   0xb   :  { %30 = dma.hbm_to_vmem [thread:$0]  %s23_s13, 50176, %s25_s14, [#allocation3], %s9117_s18, %s9117_s18, %s9118_s4  }
   0xc   :  { %s48_s20 = sshll.u32 %s9119_s19, 4  ;;  %s9120_s21 = smov 256   ;;  %s49_s20 = int_to_ptr.vmem [resolvable:$true] %s48_s20 }
   0xd   :  { %s9121_s22 = smov 16   ;;  %s70_s24 = sshll.u32 %s9451_s5, 4  ;;  %s71_s24 = int_to_ptr.hbm [resolvable:$true] %s70_s24 }
   0xe   :  { %54 = dma.hbm_to_vmem [thread:$0]  %s47_s17, 32768, %s49_s20, [#allocation5], %s9120_s21, %s9120_s21, %s9121_s22  }
   0xf   :  { %s9122_s25 = smov [#allocation9]   ;;  %s84_s28 = sshll.u32 %s9452_s6, 4  ;;  %s85_s28 = int_to_ptr.hbm [resolvable:$true] %s84_s28 }
  0x10   :  { %s72_s26 = sshll.u32 %s9122_s25, 4  ;;  %s9123_s29 = smov 64   ;;  %s73_s26 = int_to_ptr.vmem [resolvable:$true] %s72_s26 }
  0x11   :  { %s9124_s30 = smov 4   ;;  %s9125_s8 = smov [#allocation10]  }
  0x12   :  { %78 = dma.hbm_to_vmem [thread:$0]  %s71_s24, 4096, %s73_s26, [#allocation8], %s9123_s29, %s9123_s29, %s9124_s30  }
  0x13   :  { %s86_s9 = sshll.u32 %s9125_s8, 4  ;;  %s87_s9 = int_to_ptr.vmem [resolvable:$true] %s86_s9 }
  0x14   :  { %89 = dma.hbm_to_vmem [thread:$0]  %s85_s28, 16, %s87_s9, [#allocation11]  }
  0x15   :  { %9106 = dma.done.wait [#allocation3], 50176  }
  0x16   :  { %9107 = vsyncadd [#allocation3], 4294917120 }
  0x17   :  { %9108 = dma.done.wait [#allocation5], 32896  }
  0x18   :  { %9109 = vsyncadd [#allocation5], 4294934400 }
  0x19   :  { %9110 = dma.done.wait [#allocation8], 4160  }
  0x1a   :  { %9111 = vsyncadd [#allocation8], 4294963136 }
  0x1b   :  { %9112 = dma.done.wait [#allocation11], 16  }
  0x1c   :  { %9113 = vsyncadd [#allocation11], 4294967280  ;;  %v5764_v0 = vld [vmem:[#allocation2 + $0x1c0] sm:$0xf]  ;;  %vm2499_vm0 = vcmask 130048  }
  0x1d   :  { %v8326_v1 = vld [vmem:[#allocation2 + $0x1dc] sm:$0xf0] }
  0x1e   :  { %v6020_v2 = vld [vmem:[#allocation2 + $0x3c0] sm:$0xf]  ;;  %v5765_v3 = vor.u32 %v8326_v1, %v5764_v0 }
  0x1f   :  { %v8390_v4 = vld [vmem:[#allocation2 + $0x3dc] sm:$0xf0] }
  0x20   :  { %v6276_v5 = vld [vmem:[#allocation2 + $0x5c0] sm:$0xf]  ;;  %v6021_v7 = vor.u32 %v8390_v4, %v6020_v2  ;;  %2503 = vmatpush.bf16.msra.mxu0 %v5765_v3 }
  0x21   :  { %v8454_v6 = vld [vmem:[#allocation2 + $0x5dc] sm:$0xf0] }
  0x22   :  { %v6277_v8 = vor.u32 %v8454_v6, %v6276_v5  ;;  %v6532_v9 = vld [vmem:[#allocation2 + $0x7c0] sm:$0xf]  ;;  %2516 = vmatpush.bf16.msra.mxu1 %v6021_v7 }
  0x23   :  { %v8518_v10 = vld [vmem:[#allocation2 + $0x7dc] sm:$0xf0] }
  0x24   :  { %v5732_v11 = vld [vmem:[#allocation2 + $0x180] sm:$0xf]  ;;  %v6533_v12 = vor.u32 %v8518_v10, %v6532_v9  ;;  %2529 = vmatpush.bf16.msra.mxu2 %v6277_v8 }
  0x25   :  { %v8318_v13 = vld [vmem:[#allocation2 + $0x19c] sm:$0xf0] }
  0x26   :  { %v5988_v14 = vld [vmem:[#allocation2 + $0x380] sm:$0xf]  ;;  %v5733_v16 = vor.u32 %v8318_v13, %v5732_v11  ;;  %2542 = vmatpush.bf16.msra.mxu3 %v6533_v12 }
  0x27   :  { %v8382_v15 = vld [vmem:[#allocation2 + $0x39c] sm:$0xf0] }
  0x28   :  { %v5989_v17 = vor.u32 %v8382_v15, %v5988_v14  ;;  %v6244_v18 = vld [vmem:[#allocation2 + $0x580] sm:$0xf]  ;;  %2504 = vmatpush.bf16.msra.mxu0 %v5733_v16 }
  0x29   :  { %v8446_v19 = vld [vmem:[#allocation2 + $0x59c] sm:$0xf0] }
  0x2a   :  { %v6500_v20 = vld [vmem:[#allocation2 + $0x780] sm:$0xf]  ;;  %v6245_v21 = vor.u32 %v8446_v19, %v6244_v18  ;;  %2517 = vmatpush.bf16.msra.mxu1 %v5989_v17 }
  0x2b   :  { %v8510_v22 = vld [vmem:[#allocation2 + $0x79c] sm:$0xf0] }
  0x2c   :  { %v5700_v23 = vld [vmem:[#allocation2 + $0x140] sm:$0xf]  ;;  %v6501_v25 = vor.u32 %v8510_v22, %v6500_v20  ;;  %2530 = vmatpush.bf16.msra.mxu2 %v6245_v21 }
  0x2d   :  { %v8310_v24 = vld [vmem:[#allocation2 + $0x15c] sm:$0xf0] }
  0x2e   :  { %v5956_v26 = vld [vmem:[#allocation2 + $0x340] sm:$0xf]  ;;  %v5701_v29 = vor.u32 %v8310_v24, %v5700_v23  ;;  %2543 = vmatpush.bf16.msra.mxu3 %v6501_v25 }
  0x2f   :  { %v8374_v27 = vld [vmem:[#allocation2 + $0x35c] sm:$0xf0] }
  0x30   :  { %v6212_v28 = vld [vmem:[#allocation2 + $0x540] sm:$0xf]  ;;  %v5957_v33 = vor.u32 %v8374_v27, %v5956_v26  ;;  %2505 = vmatpush.bf16.msra.mxu0 %v5701_v29 }
  0x31   :  { %v8438_v30 = vld [vmem:[#allocation2 + $0x55c] sm:$0xf0] }
  0x32   :  { %v6468_v31 = vld [vmem:[#allocation2 + $0x740] sm:$0xf]  ;;  %v6213_v34 = vor.u32 %v8438_v30, %v6212_v28  ;;  %2518 = vmatpush.bf16.msra.mxu1 %v5957_v33  ;;  %v8322_v33 = vld [vmem:[#allocation2 + $0x1c4] sm:$0xf] }
  0x33   :  { %v8502_v32 = vld [vmem:[#allocation2 + $0x75c] sm:$0xf0] }
  0x34   :  { %v5668_v35 = vld [vmem:[#allocation2 + $0x100] sm:$0xf]  ;;  %v6469_v38 = vor.u32 %v8502_v32, %v6468_v31  ;;  %2531 = vmatpush.bf16.msra.mxu2 %v6213_v34  ;;  %v5766_v34 = vld [vmem:[#allocation2 + $0x1e0] sm:$0xf0] }
  0x35   :  { %v8302_v36 = vld [vmem:[#allocation2 + $0x11c] sm:$0xf0] }
  0x36   :  { %v5924_v37 = vld [vmem:[#allocation2 + $0x300] sm:$0xf]  ;;  %v5669_v44 = vor.u32 %v8302_v36, %v5668_v35  ;;  %2544 = vmatpush.bf16.msra.mxu3 %v6469_v38  ;;  %v117_v35 = vld [vmem:[%s9446_s0 + $0x10] sm:$0xff] }
  0x37   :  { %v8366_v39 = vld [vmem:[#allocation2 + $0x31c] sm:$0xf0] }
  0x38   :  { %v6180_v40 = vld [vmem:[#allocation2 + $0x500] sm:$0xf]  ;;  %v5925_v45 = vor.u32 %v8366_v39, %v5924_v37  ;;  %2506 = vmatpush.bf16.msra.mxu0 %v5669_v44  ;;  %v6022_v44 = vld [vmem:[#allocation2 + $0x3e0] sm:$0xf0] }
  0x39   :  { %v8430_v41 = vld [vmem:[#allocation2 + $0x51c] sm:$0xf0] }
  0x3a   :  { %v6436_v42 = vld [vmem:[#allocation2 + $0x700] sm:$0xf]  ;;  %v6181_v46 = vor.u32 %v8430_v41, %v6180_v40  ;;  %2519 = vmatpush.bf16.msra.mxu1 %v5925_v45  ;;  %v118_v45 = vld [vmem:[%s9446_s0 + $0x18] sm:$0xff] }
  0x3b   :  { %v8494_v43 = vld [vmem:[#allocation2 + $0x71c] sm:$0xf0] }
  0x3c   :  { %v5636_v47 = vld [vmem:[#allocation2 + $0xc0] sm:$0xf]  ;;  %v6437_v50 = vor.u32 %v8494_v43, %v6436_v42  ;;  %2532 = vmatpush.bf16.msra.mxu2 %v6181_v46  ;;  %v8386_v43 = vld [vmem:[#allocation2 + $0x3c4] sm:$0xf] }
  0x3d   :  { %v8294_v48 = vld [vmem:[#allocation2 + $0xdc] sm:$0xf0] }
  0x3e   :  { %v5892_v49 = vld [vmem:[#allocation2 + $0x2c0] sm:$0xf]  ;;  %v5637_v56 = vor.u32 %v8294_v48, %v5636_v47  ;;  %2545 = vmatpush.bf16.msra.mxu3 %v6437_v50  ;;  %v5769_v47 = vor.u32 %v8322_v33, %v5766_v34 }
  0x3f   :  { %v8358_v51 = vld [vmem:[#allocation2 + $0x2dc] sm:$0xf0] }
  0x40   :  { %v6148_v52 = vld [vmem:[#allocation2 + $0x4c0] sm:$0xf]  ;;  %v5893_v57 = vor.u32 %v8358_v51, %v5892_v49  ;;  %2507 = vmatpush.bf16.msra.mxu0 %v5637_v56  ;;  %v9193_v51 = vpack.c.bf16 %v117_v35, %v117_v35  ;;  %v8354_v35 = vld [vmem:[#allocation2 + $0x2c4] sm:$0xf] }
  0x41   :  { %v8422_v53 = vld [vmem:[#allocation2 + $0x4dc] sm:$0xf0] }
  0x42   :  { %v6404_v54 = vld [vmem:[#allocation2 + $0x6c0] sm:$0xf]  ;;  %v6149_v58 = vor.u32 %v8422_v53, %v6148_v52  ;;  %2520 = vmatpush.bf16.msra.mxu1 %v5893_v57  ;;  %v8314_v53 = vld [vmem:[#allocation2 + $0x184] sm:$0xf]  ;;  %v9197_v57 = vpack.c.bf16 %v118_v45, %v118_v45 }
  0x43   :  { %v8486_v55 = vld [vmem:[#allocation2 + $0x6dc] sm:$0xf0] }
  0x44   :  { %v5604_v59 = vld [vmem:[#allocation2 + $0x80] sm:$0xf]  ;;  %v6405_v62 = vor.u32 %v8486_v55, %v6404_v54  ;;  %2533 = vmatpush.bf16.msra.mxu2 %v6149_v58  ;;  %v5734_v54 = vld [vmem:[#allocation2 + $0x1a0] sm:$0xf0]  ;;  %v116_v58 = vld [vmem:[%s9446_s0 + $0x8] sm:$0xff] }
  0x45   :  { %v8286_v60 = vld [vmem:[#allocation2 + $0x9c] sm:$0xf0] }
  0x46   :  { %v5860_v61 = vld [vmem:[#allocation2 + $0x280] sm:$0xf]  ;;  %v5605_v4 = vor.u32 %v8286_v60, %v5604_v59  ;;  %2546 = vmatpush.bf16.msra.mxu3 %v6405_v62  ;;  %v6025_v59 = vor.u32 %v8386_v43, %v6022_v44  ;;  %v5990_v62 = vld [vmem:[#allocation2 + $0x3a0] sm:$0xf0] }
  0x47   :  { %v8350_v63 = vld [vmem:[#allocation2 + $0x29c] sm:$0xf0]  ;;  %v8282_v43 = vld [vmem:[#allocation2 + $0x84] sm:$0xf] }
  0x48   :  { %v6116_v0 = vld [vmem:[#allocation2 + $0x480] sm:$0xf]  ;;  %v5861_v5 = vor.u32 %v8350_v63, %v5860_v61  ;;  %2508 = vmatpush.bf16.msra.mxu0 %v5605_v4  ;;  %v8378_v61 = vld [vmem:[#allocation2 + $0x384] sm:$0xf] }
  0x49   :  { %v8414_v1 = vld [vmem:[#allocation2 + $0x49c] sm:$0xf0]  ;;  %v5606_v44 = vld [vmem:[#allocation2 + $0xa0] sm:$0xf0] }
  0x4a   :  { %v6372_v2 = vld [vmem:[#allocation2 + $0x680] sm:$0xf]  ;;  %v6117_v6 = vor.u32 %v8414_v1, %v6116_v0  ;;  %2521 = vmatpush.bf16.msra.mxu1 %v5861_v5  ;;  %v5737_v0 = vor.u32 %v8314_v53, %v5734_v54  ;;  %v8306_v5 = vld [vmem:[#allocation2 + $0x144] sm:$0xf] }
  0x4b   :  { %v8478_v3 = vld [vmem:[#allocation2 + $0x69c] sm:$0xf0] }
  0x4c   :  { %v5572_v7 = vld [vmem:[#allocation2 + $0x40] sm:$0xf]  ;;  %v6373_v10 = vor.u32 %v8478_v3, %v6372_v2  ;;  %2534 = vmatpush.bf16.msra.mxu2 %v6117_v6  ;;  %v5702_v6 = vld [vmem:[#allocation2 + $0x160] sm:$0xf0] }
  0x4d   :  { %v8278_v8 = vld [vmem:[#allocation2 + $0x5c] sm:$0xf0] }
  0x4e   :  { %v5828_v9 = vld [vmem:[#allocation2 + $0x240] sm:$0xf]  ;;  %v5573_v16 = vor.u32 %v8278_v8, %v5572_v7  ;;  %2547 = vmatpush.bf16.msra.mxu3 %v6373_v10  ;;  %v9204_v7 = vpack.c.bf16 %v116_v58, %v116_v58  ;;  %v5993_v8 = vor.u32 %v8378_v61, %v5990_v62  ;;  %v8370_v10 = vld [vmem:[#allocation2 + $0x344] sm:$0xf] }
  0x4f   :  { %v8342_v11 = vld [vmem:[#allocation2 + $0x25c] sm:$0xf0] }
  0x50   :  { %v6084_v12 = vld [vmem:[#allocation2 + $0x440] sm:$0xf]  ;;  %v5829_v20 = vor.u32 %v8342_v11, %v5828_v9  ;;  %2509 = vmatpush.bf16.msra.mxu0 %v5573_v16  ;;  %v5958_v11 = vld [vmem:[#allocation2 + $0x360] sm:$0xf0] }
  0x51   :  { %v8406_v13 = vld [vmem:[#allocation2 + $0x45c] sm:$0xf0] }
  0x52   :  { %v6340_v14 = vld [vmem:[#allocation2 + $0x640] sm:$0xf]  ;;  %v6085_v21 = vor.u32 %v8406_v13, %v6084_v12  ;;  %2522 = vmatpush.bf16.msra.mxu1 %v5829_v20  ;;  %v5705_v13 = vor.u32 %v8306_v5, %v5702_v6  ;;  %v5961_v20 = vor.u32 %v8370_v10, %v5958_v11  ;;  %v8450_v10 = vld [vmem:[#allocation2 + $0x5c4] sm:$0xf] }
  0x53   :  { %v8470_v15 = vld [vmem:[#allocation2 + $0x65c] sm:$0xf0]  ;;  %v6278_v11 = vld [vmem:[#allocation2 + $0x5e0] sm:$0xf0] }
  0x54   :  { %v5540_v17 = vld [vmem:[#allocation2] sm:$0xf]  ;;  %v6341_v25 = vor.u32 %v8470_v15, %v6340_v14  ;;  %2535 = vmatpush.bf16.msra.mxu2 %v6085_v21 }
  0x55   :  { %v8270_v18 = vld [vmem:[#allocation2 + $0x1c] sm:$0xf0] }
  0x56   :  { %v5796_v19 = vld [vmem:[#allocation2 + $0x200] sm:$0xf]  ;;  %v5541_v32 = vor.u32 %v8270_v18, %v5540_v17  ;;  %2548 = vmatpush.bf16.msra.mxu3 %v6341_v25  ;;  %v8298_v18 = vld [vmem:[#allocation2 + $0x104] sm:$0xf] }
  0x57   :  { %v8334_v22 = vld [vmem:[#allocation2 + $0x21c] sm:$0xf0] }
  0x58   :  { %v6052_v23 = vld [vmem:[#allocation2 + $0x400] sm:$0xf]  ;;  %v5797_v36 = vor.u32 %v8334_v22, %v5796_v19  ;;  %2510 = vmatpush.bf16.msra.mxu0 %v5541_v32  ;;  %v5670_v19 = vld [vmem:[#allocation2 + $0x120] sm:$0xf0]  ;;  %v121_v32 = vld [vmem:[%s9446_s0 + $0x30] sm:$0xff] }
  0x59   :  { %v8398_v24 = vld [vmem:[#allocation2 + $0x41c] sm:$0xf0]  ;;  %v8362_v22 = vld [vmem:[#allocation2 + $0x304] sm:$0xf]  ;;  %v5673_v25 = vor.u32 %v8298_v18, %v5670_v19  ;;  %v9211_v45 = vpack.c.bf16 %v121_v32, %v121_v32 }
  0x5a   :  { %v6308_v26 = vld [vmem:[#allocation2 + $0x600] sm:$0xf]  ;;  %v6053_v37 = vor.u32 %v8398_v24, %v6052_v23  ;;  %2523 = vmatpush.bf16.msra.mxu1 %v5797_v36  ;;  %v5926_v23 = vld [vmem:[#allocation2 + $0x320] sm:$0xf0] }
  0x5b   :  { %v8462_v27 = vld [vmem:[#allocation2 + $0x61c] sm:$0xf0]  ;;  %v5929_v33 = vor.u32 %v8362_v22, %v5926_v23  ;;  %v5894_v36 = vld [vmem:[#allocation2 + $0x2e0] sm:$0xf0]  ;;  %v120_v23 = vld [vmem:[%s9446_s0 + $0x28] sm:$0xff] }
  0x5c   :  { %v6788_v28 = vld [vmem:[#allocation2 + $0x9c0] sm:$0xf]  ;;  %v6309_v41 = vor.u32 %v8462_v27, %v6308_v26  ;;  %2536 = vmatpush.bf16.msra.mxu2 %v6053_v37  ;;  %v5798_v22 = vld [vmem:[#allocation2 + $0x220] sm:$0xf0] }
  0x5d   :  { %v8582_v29 = vld [vmem:[#allocation2 + $0x9dc] sm:$0xf0]  ;;  %2524 = vmatmul.bf16.vlgmr.msra.gmra.mxu1 %v9204_v7  ;;  %v8506_v32 = vld [vmem:[#allocation2 + $0x784] sm:$0xf] }
  0x5e   :  { %v7044_v30 = vld [vmem:[#allocation2 + $0xbc0] sm:$0xf]  ;;  %v6789_v42 = vor.u32 %v8582_v29, %v6788_v28  ;;  %2549 = vmatpush.bf16.msra.mxu3 %v6309_v41 }
  0x5f   :  { %v8646_v31 = vld [vmem:[#allocation2 + $0xbdc] sm:$0xf0]  ;;  %2537 = vmatmul.bf16.vlgmr.msra.gmra.mxu2 %v9193_v51 }
  0x60   :  { %v7076_v38 = vld [vmem:[#allocation2 + $0xc00] sm:$0xf]  ;;  %v7045_v46 = vor.u32 %v8646_v31, %v7044_v30  ;;  %2555 = vmatpush.bf16.msrb.mxu0 %v6789_v42  ;;  %v8290_v30 = vld [vmem:[#allocation2 + $0xc4] sm:$0xf] }
  0x61   :  { %v8654_v39 = vld [vmem:[#allocation2 + $0xc1c] sm:$0xf0]  ;;  %2550 = vmatmul.bf16.vlgmr.msra.gmra.mxu3 %v9197_v57  ;;  %v5638_v31 = vld [vmem:[#allocation2 + $0xe0] sm:$0xf0] }
  0x62   :  { %v115_v40 = vld [vmem:[%s9446_s0] sm:$0xff]  ;;  %v7077_v56 = vor.u32 %v8654_v39, %v7076_v38  ;;  %2568 = vmatpush.bf16.msrb.mxu1 %v7045_v46  ;;  %2594 = vmatpush.bf16.msrb.mxu3 %v5769_v47  ;;  %v5641_v38 = vor.u32 %v8290_v30, %v5638_v31  ;;  %v5897_v46 = vor.u32 %v8354_v35, %v5894_v36 }
  0x63   :  { %v6756_v48 = vld [vmem:[#allocation2 + $0x980] sm:$0xf]  ;;  %v9195_v55 = vpack.c.bf16 %v115_v40, %v115_v40  ;;  %v6246_v31 = vld [vmem:[#allocation2 + $0x5a0] sm:$0xf0]  ;;  %v9223_v35 = vpack.c.bf16 %v120_v23, %v120_v23 }
  0x64   :  { %v8574_v49 = vld [vmem:[#allocation2 + $0x99c] sm:$0xf0]  ;;  %2588 = vmatpush.bf16.msrb.mxu2 %v7077_v56  ;;  %v8570_v36 = vld [vmem:[#allocation2 + $0x984] sm:$0xf] }
  0x65   :  { %v7012_v50 = vld [vmem:[#allocation2 + $0xb80] sm:$0xf]  ;;  %v6757_v60 = vor.u32 %v8574_v49, %v6756_v48  ;;  %2511 = vmatmul.bf16.vlgmr.msra.gmra.mxu0 %v9195_v55  ;;  %v8346_v48 = vld [vmem:[#allocation2 + $0x284] sm:$0xf] }
  0x66   :  { %v8638_v52 = vld [vmem:[#allocation2 + $0xb9c] sm:$0xf0]  ;;  %2595 = vmatpush.bf16.msrb.mxu3 %v5737_v0  ;;  %v5862_v49 = vld [vmem:[#allocation2 + $0x2a0] sm:$0xf0] }
  0x67   :  { %v7013_v63 = vor.u32 %v8638_v52, %v7012_v50  ;;  %v6724_v1 = vld [vmem:[#allocation2 + $0x940] sm:$0xf]  ;;  %2556 = vmatpush.bf16.msrb.mxu0 %v6757_v60  ;;  %v5609_v52 = vor.u32 %v8282_v43, %v5606_v44  ;;  %v5574_v60 = vld [vmem:[#allocation2 + $0x60] sm:$0xf0]  ;;  %v5865_v61 = vor.u32 %v8346_v48, %v5862_v49 }
  0x68   :  { %v8566_v2 = vld [vmem:[#allocation2 + $0x95c] sm:$0xf0]  ;;  %2607 = vmatpush.bf16.msra.mxu2 %v6025_v59  ;;  %v8274_v59 = vld [vmem:[#allocation2 + $0x44] sm:$0xf] }
  0x69   :  { %v6980_v3 = vld [vmem:[#allocation2 + $0xb40] sm:$0xf]  ;;  %v6725_v9 = vor.u32 %v8566_v2, %v6724_v1  ;;  %2569 = vmatpush.bf16.msrb.mxu1 %v7013_v63  ;;  %v8338_v63 = vld [vmem:[#allocation2 + $0x244] sm:$0xf] }
  0x6a   :  { %v8630_v4 = vld [vmem:[#allocation2 + $0xb5c] sm:$0xf0]  ;;  %2596 = vmatpush.bf16.msrb.mxu3 %v5705_v13  ;;  %v5830_v0 = vld [vmem:[#allocation2 + $0x260] sm:$0xf0] }
  0x6b   :  { %v6981_v12 = vor.u32 %v8630_v4, %v6980_v3  ;;  %v6692_v14 = vld [vmem:[#allocation2 + $0x900] sm:$0xf]  ;;  %2557 = vmatpush.bf16.msrb.mxu0 %v6725_v9  ;;  %v5577_v3 = vor.u32 %v8274_v59, %v5574_v60  ;;  %v5542_v9 = vld [vmem:[#allocation2 + $0x20] sm:$0xf0] }
  0x6c   :  { %v8558_v15 = vld [vmem:[#allocation2 + $0x91c] sm:$0xf0]  ;;  %2608 = vmatpush.bf16.msra.mxu2 %v5993_v8  ;;  %v8266_v8 = vld [vmem:[#allocation2 + $0x4] sm:$0xf] }
  0x6d   :  { %v6948_v16 = vld [vmem:[#allocation2 + $0xb00] sm:$0xf]  ;;  %v6693_v21 = vor.u32 %v8558_v15, %v6692_v14  ;;  %2570 = vmatpush.bf16.msrb.mxu1 %v6981_v12  ;;  %v8514_v12 = vld [vmem:[#allocation2 + $0x7c4] sm:$0xf]  ;;  %v5833_v14 = vor.u32 %v8338_v63, %v5830_v0 }
  0x6e   :  { %v8622_v17 = vld [vmem:[#allocation2 + $0xb1c] sm:$0xf0]  ;;  %2597 = vmatpush.bf16.msrb.mxu3 %v5673_v25  ;;  %v6534_v13 = vld [vmem:[#allocation2 + $0x7e0] sm:$0xf0] }
  0x6f   :  { %v6949_v24 = vor.u32 %v8622_v17, %v6948_v16  ;;  %v6660_v26 = vld [vmem:[#allocation2 + $0x8c0] sm:$0xf]  ;;  %2558 = vmatpush.bf16.msrb.mxu0 %v6693_v21  ;;  %7106 = vmatmul.msk.bf16.vlgmr.msrb.gmra.mxu2 %vm2499_vm0, %v9211_v45  ;;  %v8578_v16 = vld [vmem:[#allocation2 + $0x9c4] sm:$0xf]  ;;  %v6537_v25 = vor.u32 %v8514_v12, %v6534_v13 }
  0x70   :  { %v8550_v27 = vld [vmem:[#allocation2 + $0x8dc] sm:$0xf0]  ;;  %2609 = vmatpush.bf16.msra.mxu2 %v5961_v20  ;;  %v6790_v17 = vld [vmem:[#allocation2 + $0x9e0] sm:$0xf0]  ;;  %v5545_v20 = vor.u32 %v8266_v8, %v5542_v9 }
  0x71   :  { %v6916_v28 = vld [vmem:[#allocation2 + $0xac0] sm:$0xf]  ;;  %v6661_v34 = vor.u32 %v8550_v27, %v6660_v26  ;;  %2571 = vmatpush.bf16.msrb.mxu1 %v6949_v24  ;;  %v8330_v21 = vld [vmem:[#allocation2 + $0x204] sm:$0xf]  ;;  %v6281_v24 = vor.u32 %v8450_v10, %v6278_v11 }
  0x72   :  { %v8614_v29 = vld [vmem:[#allocation2 + $0xadc] sm:$0xf0]  ;;  %2598 = vmatpush.bf16.msrb.mxu3 %v5641_v38  ;;  %v8642_v26 = vld [vmem:[#allocation2 + $0xbc4] sm:$0xf] }
  0x73   :  { %v6917_v37 = vor.u32 %v8614_v29, %v6916_v28  ;;  %v6628_v39 = vld [vmem:[#allocation2 + $0x880] sm:$0xf]  ;;  %2559 = vmatpush.bf16.msrb.mxu0 %v6661_v34  ;;  %v7046_v27 = vld [vmem:[#allocation2 + $0xbe0] sm:$0xf0]  ;;  %v6793_v29 = vor.u32 %v8578_v16, %v6790_v17  ;;  %v5801_v34 = vor.u32 %v8330_v21, %v5798_v22 }
  0x74   :  { %v8542_v40 = vld [vmem:[#allocation2 + $0x89c] sm:$0xf0]  ;;  %2610 = vmatpush.bf16.msra.mxu2 %v5929_v33  ;;  %v8442_v28 = vld [vmem:[#allocation2 + $0x584] sm:$0xf]  ;;  %v7049_v38 = vor.u32 %v8642_v26, %v7046_v27 }
  0x75   :  { %v6884_v41 = vld [vmem:[#allocation2 + $0xa80] sm:$0xf]  ;;  %v6629_v47 = vor.u32 %v8542_v40, %v6628_v39  ;;  %2572 = vmatpush.bf16.msrb.mxu1 %v6917_v37  ;;  %v6502_v33 = vld [vmem:[#allocation2 + $0x7a0] sm:$0xf0]  ;;  %v6249_v39 = vor.u32 %v8442_v28, %v6246_v31 }
  0x76   :  { %v8606_v42 = vld [vmem:[#allocation2 + $0xa9c] sm:$0xf0]  ;;  %2599 = vmatpush.bf16.msrb.mxu3 %v5609_v52  ;;  %v6758_v37 = vld [vmem:[#allocation2 + $0x9a0] sm:$0xf0]  ;;  %v6505_v40 = vor.u32 %v8506_v32, %v6502_v33 }
  0x77   :  { %v6885_v50 = vor.u32 %v8606_v42, %v6884_v41  ;;  %v6596_v53 = vld [vmem:[#allocation2 + $0x840] sm:$0xf]  ;;  %2560 = vmatpush.bf16.msrb.mxu0 %v6629_v47  ;;  %v8634_v41 = vld [vmem:[#allocation2 + $0xb84] sm:$0xf]  ;;  %v6761_v44 = vor.u32 %v8570_v36, %v6758_v37 }
  0x78   :  { %v8534_v54 = vld [vmem:[#allocation2 + $0x85c] sm:$0xf0]  ;;  %2611 = vmatpush.bf16.msra.mxu2 %v5897_v46  ;;  %v7014_v42 = vld [vmem:[#allocation2 + $0xba0] sm:$0xf0] }
  0x79   :  { %v6852_v56 = vld [vmem:[#allocation2 + $0xa40] sm:$0xf]  ;;  %v6597_v62 = vor.u32 %v8534_v54, %v6596_v53  ;;  %2573 = vmatpush.bf16.msrb.mxu1 %v6885_v50  ;;  %v8434_v43 = vld [vmem:[#allocation2 + $0x544] sm:$0xf]  ;;  %v7017_v52 = vor.u32 %v8634_v41, %v7014_v42 }
  0x7a   :  { %v8598_v58 = vld [vmem:[#allocation2 + $0xa5c] sm:$0xf0]  ;;  %2600 = vmatpush.bf16.msrb.mxu3 %v5577_v3  ;;  %v6214_v46 = vld [vmem:[#allocation2 + $0x560] sm:$0xf0] }
  0x7b   :  { %v6564_v1 = vld [vmem:[#allocation2 + $0x800] sm:$0xf]  ;;  %v6853_v2 = vor.u32 %v8598_v58, %v6852_v56  ;;  %2561 = vmatpush.bf16.msrb.mxu0 %v6597_v62  ;;  %v8498_v47 = vld [vmem:[#allocation2 + $0x744] sm:$0xf]  ;;  %v6217_v53 = vor.u32 %v8434_v43, %v6214_v46 }
  0x7c   :  { %v8526_v4 = vld [vmem:[#allocation2 + $0x81c] sm:$0xf0]  ;;  %2612 = vmatpush.bf16.msra.mxu2 %v5865_v61  ;;  %v6470_v48 = vld [vmem:[#allocation2 + $0x760] sm:$0xf0] }
  0x7d   :  { %v6820_v5 = vld [vmem:[#allocation2 + $0xa00] sm:$0xf]  ;;  %v6565_v15 = vor.u32 %v8526_v4, %v6564_v1  ;;  %2574 = vmatpush.bf16.msrb.mxu1 %v6853_v2  ;;  %v8562_v49 = vld [vmem:[#allocation2 + $0x944] sm:$0xf]  ;;  %v6473_v54 = vor.u32 %v8498_v47, %v6470_v48 }
  0x7e   :  { %v8590_v6 = vld [vmem:[#allocation2 + $0xa1c] sm:$0xf0]  ;;  %2601 = vmatpush.bf16.msrb.mxu3 %v5545_v20  ;;  %v6726_v50 = vld [vmem:[#allocation2 + $0x960] sm:$0xf0] }
  0x7f   :  { %v119_v18 = vld [vmem:[%s9446_s0 + $0x20] sm:$0xff]  ;;  %v6821_v19 = vor.u32 %v8590_v6, %v6820_v5  ;;  %2562 = vmatpush.bf16.msrb.mxu0 %v6565_v15  ;;  %v6729_v60 = vor.u32 %v8562_v49, %v6726_v50 }
  0x80   :  { %v9221_v30 = vpack.c.bf16 %v119_v18, %v119_v18  ;;  %2613 = vmatpush.bf16.msra.mxu2 %v5833_v14  ;;  %v8626_v56 = vld [vmem:[#allocation2 + $0xb44] sm:$0xf] }
  0x81   :  { %2575 = vmatpush.bf16.msrb.mxu1 %v6821_v19  ;;  %2602 = vmatmul.bf16.vlgmr.msrb.gmra.mxu3 %v9195_v55  ;;  %v6982_v58 = vld [vmem:[#allocation2 + $0xb60] sm:$0xf0] }
  0x82   :  { %2646 = vmatpush.bf16.msra.mxu3 %v6793_v29  ;;  %2563 = vmatmul.bf16.vlgmr.msrb.gmra.mxu0 %v9221_v30  ;;  %v8426_v59 = vld [vmem:[#allocation2 + $0x504] sm:$0xf]  ;;  %v6985_v2 = vor.u32 %v8626_v56, %v6982_v58  ;;  %v5772_v56 = vld [vmem:[#allocation2 + $0x1c8] sm:$0xf] }
  0x83   :  { %2620 = vmatpush.bf16.msra.mxu0 %v6281_v24  ;;  %v6182_v61 = vld [vmem:[#allocation2 + $0x520] sm:$0xf0]  ;;  %v8327_v58 = vld [vmem:[#allocation2 + $0x1e4] sm:$0xf0] }
  0x84   :  { %2614 = vmatpush.bf16.msra.mxu2 %v5801_v34  ;;  %2576 = vmatmul.bf16.vlgmr.msrb.gmra.mxu1 %v9223_v35  ;;  %v8490_v62 = vld [vmem:[#allocation2 + $0x704] sm:$0xf]  ;;  %v6185_v3 = vor.u32 %v8426_v59, %v6182_v61  ;;  %v6284_v59 = vld [vmem:[#allocation2 + $0x5c8] sm:$0xf] }
  0x85   :  { %2633 = vmatpush.bf16.msra.mxu1 %v6537_v25  ;;  %v6438_v63 = vld [vmem:[#allocation2 + $0x720] sm:$0xf0]  ;;  %v8455_v61 = vld [vmem:[#allocation2 + $0x5e4] sm:$0xf0] }
  0x86   :  { %2647 = vmatpush.bf16.msra.mxu3 %v6761_v44  ;;  %v8554_v0 = vld [vmem:[#allocation2 + $0x904] sm:$0xf]  ;;  %v6441_v4 = vor.u32 %v8490_v62, %v6438_v63 }
  0x87   :  { %2621 = vmatpush.bf16.msra.mxu0 %v6249_v39  ;;  %2615 = vmatmul.bf16.vlgmr.msra.gmra.mxu2 %v9204_v7  ;;  %v6694_v1 = vld [vmem:[#allocation2 + $0x920] sm:$0xf0] }
  0x88   :  { %2659 = vmatpush.bf16.msrb.mxu2 %v7049_v38  ;;  %v8618_v5 = vld [vmem:[#allocation2 + $0xb04] sm:$0xf]  ;;  %v6697_v9 = vor.u32 %v8554_v0, %v6694_v1 }
  0x89   :  { %2634 = vmatpush.bf16.msra.mxu1 %v6505_v40  ;;  %v6950_v6 = vld [vmem:[#allocation2 + $0xb20] sm:$0xf0] }
  0x8a   :  { %v8418_v8 = vld [vmem:[#allocation2 + $0x4c4] sm:$0xf]  ;;  %2648 = vmatpush.bf16.msra.mxu3 %v6729_v60  ;;  %v6953_v15 = vor.u32 %v8618_v5, %v6950_v6  ;;  %v5773_v5 = vor.u32 %v8327_v58, %v5772_v56  ;;  %v6540_v6 = vld [vmem:[#allocation2 + $0x7c8] sm:$0xf] }
  0x8b   :  { %2622 = vmatpush.bf16.msra.mxu0 %v6217_v53  ;;  %v6150_v10 = vld [vmem:[#allocation2 + $0x4e0] sm:$0xf0]  ;;  %v8295_v56 = vld [vmem:[#allocation2 + $0xe4] sm:$0xf0] }
  0x8c   :  { %2660 = vmatpush.bf16.msrb.mxu2 %v7017_v52  ;;  %v8482_v11 = vld [vmem:[#allocation2 + $0x6c4] sm:$0xf]  ;;  %v6153_v16 = vor.u32 %v8418_v8, %v6150_v10  ;;  %v8519_v8 = vld [vmem:[#allocation2 + $0x7e4] sm:$0xf0] }
  0x8d   :  { %2635 = vmatpush.bf16.msra.mxu1 %v6473_v54  ;;  %v6406_v12 = vld [vmem:[#allocation2 + $0x6e0] sm:$0xf0]  ;;  %v6156_v58 = vld [vmem:[#allocation2 + $0x4c8] sm:$0xf] }
  0x8e   :  { %v8546_v13 = vld [vmem:[#allocation2 + $0x8c4] sm:$0xf]  ;;  %v6409_v17 = vor.u32 %v8482_v11, %v6406_v12  ;;  %2649 = vmatpush.bf16.msra.mxu3 %v6697_v9  ;;  %v6285_v9 = vor.u32 %v8455_v61, %v6284_v59  ;;  %v6028_v11 = vld [vmem:[#allocation2 + $0x3c8] sm:$0xf] }
  0x8f   :  { %v6662_v14 = vld [vmem:[#allocation2 + $0x8e0] sm:$0xf0]  ;;  %2623 = vmatpush.bf16.msra.mxu0 %v6185_v3  ;;  %v8391_v12 = vld [vmem:[#allocation2 + $0x3e4] sm:$0xf0] }
  0x90   :  { %2661 = vmatpush.bf16.msrb.mxu2 %v6985_v2  ;;  %v8610_v18 = vld [vmem:[#allocation2 + $0xac4] sm:$0xf]  ;;  %v6665_v21 = vor.u32 %v8546_v13, %v6662_v14  ;;  %v5740_v13 = vld [vmem:[#allocation2 + $0x188] sm:$0xf] }
  0x91   :  { %2636 = vmatpush.bf16.msra.mxu1 %v6441_v4  ;;  %v6918_v19 = vld [vmem:[#allocation2 + $0xae0] sm:$0xf0]  ;;  %v8423_v59 = vld [vmem:[#allocation2 + $0x4e4] sm:$0xf0] }
  0x92   :  { %v8410_v20 = vld [vmem:[#allocation2 + $0x484] sm:$0xf]  ;;  %v6921_v27 = vor.u32 %v8610_v18, %v6918_v19  ;;  %2650 = vmatpush.bf16.msra.mxu3 %v6665_v21  ;;  %v6541_v18 = vor.u32 %v8519_v8, %v6540_v6  ;;  %v6029_v19 = vor.u32 %v8391_v12, %v6028_v11  ;;  %v8511_v21 = vld [vmem:[#allocation2 + $0x7a4] sm:$0xf0] }
  0x93   :  { %v6118_v22 = vld [vmem:[#allocation2 + $0x4a0] sm:$0xf0]  ;;  %2624 = vmatpush.bf16.msra.mxu0 %v6153_v16  ;;  %v6252_v16 = vld [vmem:[#allocation2 + $0x588] sm:$0xf] }
  0x94   :  { %v8474_v23 = vld [vmem:[#allocation2 + $0x684] sm:$0xf]  ;;  %2662 = vmatpush.bf16.msrb.mxu2 %v6953_v15  ;;  %v6121_v28 = vor.u32 %v8410_v20, %v6118_v22  ;;  %v8319_v15 = vld [vmem:[#allocation2 + $0x1a4] sm:$0xf0] }
  0x95   :  { %v6374_v24 = vld [vmem:[#allocation2 + $0x6a0] sm:$0xf0]  ;;  %2637 = vmatpush.bf16.msra.mxu1 %v6409_v17  ;;  %v8447_v17 = vld [vmem:[#allocation2 + $0x5a4] sm:$0xf0]  ;;  %v5741_v22 = vor.u32 %v8319_v15, %v5740_v13 }
  0x96   :  { %v8538_v25 = vld [vmem:[#allocation2 + $0x884] sm:$0xf]  ;;  %v6377_v29 = vor.u32 %v8474_v23, %v6374_v24  ;;  %v6508_v20 = vld [vmem:[#allocation2 + $0x788] sm:$0xf]  ;;  %v6253_v23 = vor.u32 %v8447_v17, %v6252_v16 }
  0x97   :  { %v6630_v26 = vld [vmem:[#allocation2 + $0x8a0] sm:$0xf0]  ;;  %2625 = vmatpush.bf16.msra.mxu0 %v6121_v28  ;;  %v5996_v24 = vld [vmem:[#allocation2 + $0x388] sm:$0xf] }
  0x98   :  { %v8602_v31 = vld [vmem:[#allocation2 + $0xa84] sm:$0xf]  ;;  %v6633_v34 = vor.u32 %v8538_v25, %v6630_v26  ;;  %2663 = vmatpush.bf16.msrb.mxu2 %v6921_v27  ;;  %v8383_v25 = vld [vmem:[#allocation2 + $0x3a4] sm:$0xf0] }
  0x99   :  { %v6886_v32 = vld [vmem:[#allocation2 + $0xaa0] sm:$0xf0]  ;;  %2638 = vmatpush.bf16.msra.mxu1 %v6377_v29  ;;  %v5708_v26 = vld [vmem:[#allocation2 + $0x148] sm:$0xf] }
  0x9a   :  { %v8402_v33 = vld [vmem:[#allocation2 + $0x444] sm:$0xf]  ;;  %v6889_v41 = vor.u32 %v8602_v31, %v6886_v32  ;;  %2651 = vmatpush.bf16.msra.mxu3 %v6633_v34  ;;  %v8311_v27 = vld [vmem:[#allocation2 + $0x164] sm:$0xf0]  ;;  %v6509_v31 = vor.u32 %v8511_v21, %v6508_v20  ;;  %v5997_v32 = vor.u32 %v8383_v25, %v5996_v24 }
  0x9b   :  { %v6086_v36 = vld [vmem:[#allocation2 + $0x460] sm:$0xf0]  ;;  %v6220_v28 = vld [vmem:[#allocation2 + $0x548] sm:$0xf] }
  0x9c   :  { %v8466_v37 = vld [vmem:[#allocation2 + $0x644] sm:$0xf]  ;;  %v6089_v44 = vor.u32 %v8402_v33, %v6086_v36  ;;  %2664 = vmatpush.bf16.msrb.mxu2 %v6889_v41  ;;  %v8439_v29 = vld [vmem:[#allocation2 + $0x564] sm:$0xf0]  ;;  %v5709_v36 = vor.u32 %v8311_v27, %v5708_v26 }
  0x9d   :  { %v6342_v38 = vld [vmem:[#allocation2 + $0x660] sm:$0xf0]  ;;  %v6476_v33 = vld [vmem:[#allocation2 + $0x748] sm:$0xf] }
  0x9e   :  { %v8530_v39 = vld [vmem:[#allocation2 + $0x844] sm:$0xf]  ;;  %v6345_v46 = vor.u32 %v8466_v37, %v6342_v38  ;;  %2626 = vmatpush.bf16.msra.mxu0 %v6089_v44  ;;  %v8503_v34 = vld [vmem:[#allocation2 + $0x764] sm:$0xf0]  ;;  %v6221_v37 = vor.u32 %v8439_v29, %v6220_v28 }
  0x9f   :  { %v6598_v40 = vld [vmem:[#allocation2 + $0x860] sm:$0xf0]  ;;  %v5964_v38 = vld [vmem:[#allocation2 + $0x348] sm:$0xf]  ;;  %v6477_v44 = vor.u32 %v8503_v34, %v6476_v33 }
  0xa0   :  { %v8594_v42 = vld [vmem:[#allocation2 + $0xa44] sm:$0xf]  ;;  %v6601_v50 = vor.u32 %v8530_v39, %v6598_v40  ;;  %2639 = vmatpush.bf16.msra.mxu1 %v6345_v46  ;;  %v8375_v39 = vld [vmem:[#allocation2 + $0x364] sm:$0xf0] }
  0xa1   :  { %v6854_v43 = vld [vmem:[#allocation2 + $0xa60] sm:$0xf0]  ;;  %v5676_v40 = vld [vmem:[#allocation2 + $0x108] sm:$0xf]  ;;  %v5965_v46 = vor.u32 %v8375_v39, %v5964_v38 }
  0xa2   :  { %v8394_v47 = vld [vmem:[#allocation2 + $0x404] sm:$0xf]  ;;  %v6857_v60 = vor.u32 %v8594_v42, %v6854_v43  ;;  %2652 = vmatpush.bf16.msra.mxu3 %v6601_v50  ;;  %v8303_v41 = vld [vmem:[#allocation2 + $0x124] sm:$0xf0] }
  0xa3   :  { %v6054_v48 = vld [vmem:[#allocation2 + $0x420] sm:$0xf0]  ;;  %v6188_v42 = vld [vmem:[#allocation2 + $0x508] sm:$0xf] }
  0xa4   :  { %v8458_v49 = vld [vmem:[#allocation2 + $0x604] sm:$0xf]  ;;  %v6057_v0 = vor.u32 %v8394_v47, %v6054_v48  ;;  %2665 = vmatpush.bf16.msrb.mxu2 %v6857_v60  ;;  %v8431_v43 = vld [vmem:[#allocation2 + $0x524] sm:$0xf0] }
  0xa5   :  { %v6310_v52 = vld [vmem:[#allocation2 + $0x620] sm:$0xf0]  ;;  %v6444_v47 = vld [vmem:[#allocation2 + $0x708] sm:$0xf]  ;;  %v6189_v50 = vor.u32 %v8431_v43, %v6188_v42 }
  0xa6   :  { %v8522_v53 = vld [vmem:[#allocation2 + $0x804] sm:$0xf]  ;;  %v6313_v1 = vor.u32 %v8458_v49, %v6310_v52  ;;  %2627 = vmatpush.bf16.msra.mxu0 %v6057_v0  ;;  %v8495_v48 = vld [vmem:[#allocation2 + $0x724] sm:$0xf0]  ;;  %v5677_v49 = vor.u32 %v8303_v41, %v5676_v40 }
  0xa7   :  { %v6566_v54 = vld [vmem:[#allocation2 + $0x820] sm:$0xf0]  ;;  %v5932_v52 = vld [vmem:[#allocation2 + $0x308] sm:$0xf]  ;;  %v6445_v60 = vor.u32 %v8495_v48, %v6444_v47 }
  0xa8   :  { %v8650_v62 = vld [vmem:[#allocation2 + $0xc04] sm:$0xf]  ;;  %v6569_v4 = vor.u32 %v8522_v53, %v6566_v54  ;;  %2640 = vmatpush.bf16.msra.mxu1 %v6313_v1  ;;  %v8367_v53 = vld [vmem:[#allocation2 + $0x324] sm:$0xf0]  ;;  %v6157_v1 = vor.u32 %v8423_v59, %v6156_v58  ;;  %v6030_v59 = vld [vmem:[#allocation2 + $0x3e8] sm:$0xf0] }
  0xa9   :  { %v7078_v63 = vld [vmem:[#allocation2 + $0xc20] sm:$0xf0]  ;;  %2628 = vmatmul.bf16.vlgmr.msra.gmra.mxu0 %v9193_v51  ;;  %v5644_v54 = vld [vmem:[#allocation2 + $0xc8] sm:$0xf]  ;;  %v5933_v61 = vor.u32 %v8367_v53, %v5932_v52  ;;  %v8323_v53 = vld [vmem:[#allocation2 + $0x1cc] sm:$0xf] }
  0xaa   :  { %v8586_v2 = vld [vmem:[#allocation2 + $0xa04] sm:$0xf]  ;;  %v7081_v10 = vor.u32 %v8650_v62, %v7078_v63  ;;  %2653 = vmatpush.bf16.msra.mxu3 %v6569_v4  ;;  %2711 = vmatpush.bf16.msrb.mxu0 %v6285_v9  ;;  %v6412_v62 = vld [vmem:[#allocation2 + $0x6c8] sm:$0xf]  ;;  %v5645_v0 = vor.u32 %v8295_v56, %v5644_v54  ;;  %v5774_v54 = vld [vmem:[#allocation2 + $0x1e8] sm:$0xf0] }
  0xab   :  { %v6822_v3 = vld [vmem:[#allocation2 + $0xa20] sm:$0xf0]  ;;  %2641 = vmatmul.bf16.vlgmr.msra.gmra.mxu1 %v9197_v57  ;;  %v8487_v63 = vld [vmem:[#allocation2 + $0x6e4] sm:$0xf0]  ;;  %v8387_v56 = vld [vmem:[#allocation2 + $0x3cc] sm:$0xf] }
  0xac   :  { %v6825_v14 = vor.u32 %v8586_v2, %v6822_v3  ;;  %2685 = vmatpush.bf16.msrb.mxu1 %v5773_v5  ;;  %v5900_v2 = vld [vmem:[#allocation2 + $0x2c8] sm:$0xf]  ;;  %v6413_v9 = vor.u32 %v8487_v63, %v6412_v62 }
  0xad   :  { %2654 = vmatmul.bf16.vlgmr.msra.gmra.mxu3 %v9221_v30  ;;  %v8359_v3 = vld [vmem:[#allocation2 + $0x2e4] sm:$0xf0] }
  0xae   :  { %2679 = vmatpush.bf16.msrb.mxu3 %v7081_v10  ;;  %2666 = vmatpush.bf16.msrb.mxu2 %v6825_v14  ;;  %v5612_v4 = vld [vmem:[#allocation2 + $0x88] sm:$0xf]  ;;  %v5901_v10 = vor.u32 %v8359_v3, %v5900_v2  ;;  %v6033_v3 = vor.u32 %v8387_v56, %v6030_v59 }
  0xaf   :  { %2712 = vmatpush.bf16.msrb.mxu0 %v6253_v23  ;;  %v8287_v5 = vld [vmem:[#allocation2 + $0xa4] sm:$0xf0] }
  0xb0   :  { %2686 = vmatpush.bf16.msrb.mxu1 %v5741_v22  ;;  %v6124_v6 = vld [vmem:[#allocation2 + $0x488] sm:$0xf]  ;;  %v5613_v13 = vor.u32 %v8287_v5, %v5612_v4  ;;  %v8315_v5 = vld [vmem:[#allocation2 + $0x18c] sm:$0xf] }
  0xb1   :  { %2667 = vmatmul.bf16.vlgmr.msrb.gmra.mxu2 %v9223_v35  ;;  %v8415_v8 = vld [vmem:[#allocation2 + $0x4a4] sm:$0xf0] }
  0xb2   :  { %2724 = vmatpush.bf16.msra.mxu2 %v6541_v18  ;;  %2698 = vmatpush.bf16.msra.mxu3 %v6029_v19  ;;  %v6380_v11 = vld [vmem:[#allocation2 + $0x688] sm:$0xf]  ;;  %v6125_v14 = vor.u32 %v8415_v8, %v6124_v6  ;;  %v5742_v6 = vld [vmem:[#allocation2 + $0x1a8] sm:$0xf0] }
  0xb3   :  { %2713 = vmatpush.bf16.msrb.mxu0 %v6221_v37  ;;  %v8479_v12 = vld [vmem:[#allocation2 + $0x6a4] sm:$0xf0]  ;;  %v8379_v8 = vld [vmem:[#allocation2 + $0x38c] sm:$0xf] }
  0xb4   :  { %2687 = vmatpush.bf16.msrb.mxu1 %v5709_v36  ;;  %v5868_v15 = vld [vmem:[#allocation2 + $0x288] sm:$0xf]  ;;  %v6381_v21 = vor.u32 %v8479_v12, %v6380_v11 }
  0xb5   :  { %v8351_v16 = vld [vmem:[#allocation2 + $0x2a4] sm:$0xf0] }
  0xb6   :  { %2725 = vmatpush.bf16.msra.mxu2 %v6509_v31  ;;  %2699 = vmatpush.bf16.msra.mxu3 %v5997_v32  ;;  %v5580_v17 = vld [vmem:[#allocation2 + $0x48] sm:$0xf]  ;;  %v5869_v22 = vor.u32 %v8351_v16, %v5868_v15 }
  0xb7   :  { %2714 = vmatpush.bf16.msrb.mxu0 %v6189_v50  ;;  %v8279_v18 = vld [vmem:[#allocation2 + $0x64] sm:$0xf0] }
  0xb8   :  { %2688 = vmatpush.bf16.msrb.mxu1 %v5677_v49  ;;  %v6092_v19 = vld [vmem:[#allocation2 + $0x448] sm:$0xf]  ;;  %v5581_v26 = vor.u32 %v8279_v18, %v5580_v17  ;;  %v8307_v18 = vld [vmem:[#allocation2 + $0x14c] sm:$0xf] }
  0xb9   :  { %v8407_v20 = vld [vmem:[#allocation2 + $0x464] sm:$0xf0] }
  0xba   :  { %2726 = vmatpush.bf16.msra.mxu2 %v6477_v44  ;;  %2700 = vmatpush.bf16.msra.mxu3 %v5965_v46  ;;  %v5836_v23 = vld [vmem:[#allocation2 + $0x248] sm:$0xf]  ;;  %v6093_v27 = vor.u32 %v8407_v20, %v6092_v19  ;;  %v5710_v19 = vld [vmem:[#allocation2 + $0x168] sm:$0xf0] }
  0xbb   :  { %2715 = vmatpush.bf16.msrb.mxu0 %v6157_v1  ;;  %v6348_v24 = vld [vmem:[#allocation2 + $0x648] sm:$0xf]  ;;  %v8371_v20 = vld [vmem:[#allocation2 + $0x34c] sm:$0xf] }
  0xbc   :  { %2689 = vmatpush.bf16.msrb.mxu1 %v5645_v0  ;;  %v8471_v25 = vld [vmem:[#allocation2 + $0x664] sm:$0xf0]  ;;  %v5777_v0 = vor.u32 %v8323_v53, %v5774_v54 }
  0xbd   :  { %7107 = vmatmul.msk.bf16.vlgmr.msrb.gmra.mxu3 %vm2499_vm0, %v9211_v45  ;;  %v8343_v28 = vld [vmem:[#allocation2 + $0x264] sm:$0xf0]  ;;  %v6349_v36 = vor.u32 %v8471_v25, %v6348_v24  ;;  %v5713_v25 = vor.u32 %v8307_v18, %v5710_v19 }
  0xbe   :  { %2727 = vmatpush.bf16.msra.mxu2 %v6445_v60  ;;  %2701 = vmatpush.bf16.msra.mxu3 %v5933_v61  ;;  %v5548_v29 = vld [vmem:[#allocation2 + $0x8] sm:$0xf]  ;;  %v5837_v40 = vor.u32 %v8343_v28, %v5836_v23 }
  0xbf   :  { %2716 = vmatpush.bf16.msrb.mxu0 %v6125_v14  ;;  %v8271_v31 = vld [vmem:[#allocation2 + $0x24] sm:$0xf0] }
  0xc0   :  { %2690 = vmatpush.bf16.msrb.mxu1 %v5613_v13  ;;  %v6060_v32 = vld [vmem:[#allocation2 + $0x408] sm:$0xf]  ;;  %v5549_v44 = vor.u32 %v8271_v31, %v5548_v29  ;;  %v5745_v13 = vor.u32 %v8315_v5, %v5742_v6  ;;  %v8299_v31 = vld [vmem:[#allocation2 + $0x10c] sm:$0xf] }
  0xc1   :  { %v8399_v33 = vld [vmem:[#allocation2 + $0x424] sm:$0xf0] }
  0xc2   :  { %2728 = vmatpush.bf16.msra.mxu2 %v6413_v9  ;;  %2702 = vmatpush.bf16.msra.mxu3 %v5901_v10  ;;  %v6796_v34 = vld [vmem:[#allocation2 + $0x9c8] sm:$0xf]  ;;  %v6061_v46 = vor.u32 %v8399_v33, %v6060_v32  ;;  %v5998_v9 = vld [vmem:[#allocation2 + $0x3a8] sm:$0xf0] }
  0xc3   :  { %v8583_v37 = vld [vmem:[#allocation2 + $0x9e4] sm:$0xf0]  ;;  %2717 = vmatpush.bf16.msrb.mxu0 %v6093_v27  ;;  %v6001_v16 = vor.u32 %v8379_v8, %v5998_v9  ;;  %v5678_v32 = vld [vmem:[#allocation2 + $0x128] sm:$0xf0] }
  0xc4   :  { %v7084_v38 = vld [vmem:[#allocation2 + $0xc08] sm:$0xf]  ;;  %2691 = vmatpush.bf16.msrb.mxu1 %v5581_v26  ;;  %v6797_v50 = vor.u32 %v8583_v37, %v6796_v34  ;;  %v8363_v33 = vld [vmem:[#allocation2 + $0x30c] sm:$0xf] }
  0xc5   :  { %v8655_v39 = vld [vmem:[#allocation2 + $0xc24] sm:$0xf0]  ;;  %v5934_v34 = vld [vmem:[#allocation2 + $0x328] sm:$0xf0] }
  0xc6   :  { %2729 = vmatpush.bf16.msra.mxu2 %v6381_v21  ;;  %2703 = vmatpush.bf16.msra.mxu3 %v5869_v22  ;;  %v5804_v41 = vld [vmem:[#allocation2 + $0x208] sm:$0xf]  ;;  %v7085_v52 = vor.u32 %v8655_v39, %v7084_v38  ;;  %v5966_v21 = vld [vmem:[#allocation2 + $0x368] sm:$0xf0]  ;;  %v5681_v39 = vor.u32 %v8299_v31, %v5678_v32 }
  0xc7   :  { %v6316_v42 = vld [vmem:[#allocation2 + $0x608] sm:$0xf]  ;;  %2718 = vmatpush.bf16.msrb.mxu0 %v6061_v46  ;;  %v5969_v28 = vor.u32 %v8371_v20, %v5966_v21  ;;  %v5646_v46 = vld [vmem:[#allocation2 + $0xe8] sm:$0xf0] }
  0xc8   :  { %v8463_v43 = vld [vmem:[#allocation2 + $0x624] sm:$0xf0]  ;;  %2692 = vmatpush.bf16.msrb.mxu1 %v5549_v44  ;;  %v8291_v44 = vld [vmem:[#allocation2 + $0xcc] sm:$0xf] }
  0xc9   :  { %v8335_v47 = vld [vmem:[#allocation2 + $0x224] sm:$0xf0]  ;;  %v6317_v58 = vor.u32 %v8463_v43, %v6316_v42  ;;  %v5937_v42 = vor.u32 %v8363_v33, %v5934_v34  ;;  %v5649_v53 = vor.u32 %v8291_v44, %v5646_v46  ;;  %v8275_v9 = vld [vmem:[#allocation2 + $0x4c] sm:$0xf] }
  0xca   :  { %v7052_v48 = vld [vmem:[#allocation2 + $0xbc8] sm:$0xf]  ;;  %2730 = vmatpush.bf16.msra.mxu2 %v6349_v36  ;;  %2704 = vmatpush.bf16.msra.mxu3 %v5837_v40  ;;  %v5805_v62 = vor.u32 %v8335_v47, %v5804_v41  ;;  %v8355_v47 = vld [vmem:[#allocation2 + $0x2cc] sm:$0xf] }
  0xcb   :  { %v8647_v49 = vld [vmem:[#allocation2 + $0xbe4] sm:$0xf0]  ;;  %2770 = vmatpush.bf16.msra.mxu0 %v7085_v52  ;;  %2693 = vmatmul.bf16.vlgmr.msrb.gmra.mxu1 %v9195_v55  ;;  %v8579_v31 = vld [vmem:[#allocation2 + $0x9cc] sm:$0xf] }
  0xcc   :  { %v6764_v60 = vld [vmem:[#allocation2 + $0x988] sm:$0xf]  ;;  %v7053_v63 = vor.u32 %v8647_v49, %v7052_v48  ;;  %2737 = vmatpush.bf16.msra.mxu1 %v6797_v50  ;;  %2719 = vmatmul.bf16.vlgmr.msrb.gmra.mxu0 %v9193_v51  ;;  %v5902_v48 = vld [vmem:[#allocation2 + $0x2e8] sm:$0xf0] }
  0xcd   :  { %v8575_v61 = vld [vmem:[#allocation2 + $0x9a4] sm:$0xf0]  ;;  %v6798_v32 = vld [vmem:[#allocation2 + $0x9e8] sm:$0xf0] }
  0xce   :  { %v7020_v1 = vld [vmem:[#allocation2 + $0xb88] sm:$0xf]  ;;  %v6765_v4 = vor.u32 %v8575_v61, %v6764_v60  ;;  %2731 = vmatpush.bf16.msra.mxu2 %v6317_v58  ;;  %2705 = vmatpush.bf16.msra.mxu3 %v5805_v62  ;;  %v5905_v58 = vor.u32 %v8355_v47, %v5902_v48  ;;  %v8283_v60 = vld [vmem:[#allocation2 + $0x8c] sm:$0xf] }
  0xcf   :  { %v8639_v2 = vld [vmem:[#allocation2 + $0xba4] sm:$0xf0]  ;;  %2789 = vmatpush.bf16.msrb.mxu0 %v6033_v3  ;;  %v5614_v61 = vld [vmem:[#allocation2 + $0xa8] sm:$0xf0] }
  0xd0   :  { %v6732_v10 = vld [vmem:[#allocation2 + $0x948] sm:$0xf]  ;;  %v7021_v12 = vor.u32 %v8639_v2, %v7020_v1  ;;  %2738 = vmatpush.bf16.msra.mxu1 %v6765_v4  ;;  %v8347_v62 = vld [vmem:[#allocation2 + $0x28c] sm:$0xf]  ;;  %v5617_v3 = vor.u32 %v8283_v60, %v5614_v61 }
  0xd1   :  { %v8567_v11 = vld [vmem:[#allocation2 + $0x964] sm:$0xf0]  ;;  %2706 = vmatmul.bf16.vlgmr.msra.gmra.mxu3 %v9204_v7  ;;  %2732 = vmatmul.bf16.vlgmr.msra.gmra.mxu2 %v9197_v57  ;;  %v8643_v33 = vld [vmem:[#allocation2 + $0xbcc] sm:$0xf] }
  0xd2   :  { %2750 = vmatpush.bf16.msrb.mxu3 %v7053_v63  ;;  %2776 = vmatpush.bf16.msrb.mxu2 %v5777_v0  ;;  %v6988_v14 = vld [vmem:[#allocation2 + $0xb48] sm:$0xf]  ;;  %v6733_v17 = vor.u32 %v8567_v11, %v6732_v10  ;;  %v5870_v63 = vld [vmem:[#allocation2 + $0x2a8] sm:$0xf0] }
  0xd3   :  { %v8631_v15 = vld [vmem:[#allocation2 + $0xb64] sm:$0xf0]  ;;  %2790 = vmatpush.bf16.msrb.mxu0 %v6001_v16  ;;  %v5873_v6 = vor.u32 %v8347_v62, %v5870_v63  ;;  %v5582_v10 = vld [vmem:[#allocation2 + $0x68] sm:$0xf0] }
  0xd4   :  { %v6700_v22 = vld [vmem:[#allocation2 + $0x908] sm:$0xf]  ;;  %v6989_v24 = vor.u32 %v8631_v15, %v6988_v14  ;;  %2739 = vmatpush.bf16.msra.mxu1 %v6733_v17  ;;  %v8339_v11 = vld [vmem:[#allocation2 + $0x24c] sm:$0xf]  ;;  %v5585_v18 = vor.u32 %v8275_v9, %v5582_v10 }
  0xd5   :  { %v8559_v23 = vld [vmem:[#allocation2 + $0x924] sm:$0xf0]  ;;  %v8451_v15 = vld [vmem:[#allocation2 + $0x5cc] sm:$0xf] }
  0xd6   :  { %2751 = vmatpush.bf16.msrb.mxu3 %v7021_v12  ;;  %2777 = vmatpush.bf16.msrb.mxu2 %v5745_v13  ;;  %v6956_v26 = vld [vmem:[#allocation2 + $0xb08] sm:$0xf]  ;;  %v6701_v29 = vor.u32 %v8559_v23, %v6700_v22  ;;  %v5838_v12 = vld [vmem:[#allocation2 + $0x268] sm:$0xf0] }
  0xd7   :  { %v8623_v27 = vld [vmem:[#allocation2 + $0xb24] sm:$0xf0]  ;;  %2791 = vmatpush.bf16.msrb.mxu0 %v5969_v28  ;;  %v6286_v16 = vld [vmem:[#allocation2 + $0x5e8] sm:$0xf0]  ;;  %v5841_v21 = vor.u32 %v8339_v11, %v5838_v12 }
  0xd8   :  { %v6668_v36 = vld [vmem:[#allocation2 + $0x8c8] sm:$0xf]  ;;  %v6957_v38 = vor.u32 %v8623_v27, %v6956_v26  ;;  %2740 = vmatpush.bf16.msra.mxu1 %v6701_v29  ;;  %v8267_v23 = vld [vmem:[#allocation2 + $0xc] sm:$0xf]  ;;  %v6289_v26 = vor.u32 %v8451_v15, %v6286_v16 }
  0xd9   :  { %v8551_v37 = vld [vmem:[#allocation2 + $0x8e4] sm:$0xf0]  ;;  %v5806_v27 = vld [vmem:[#allocation2 + $0x228] sm:$0xf0] }
  0xda   :  { %2752 = vmatpush.bf16.msrb.mxu3 %v6989_v24  ;;  %2778 = vmatpush.bf16.msrb.mxu2 %v5713_v25  ;;  %v6924_v40 = vld [vmem:[#allocation2 + $0xac8] sm:$0xf]  ;;  %v6669_v43 = vor.u32 %v8551_v37, %v6668_v36  ;;  %v5550_v24 = vld [vmem:[#allocation2 + $0x28] sm:$0xf0] }
  0xdb   :  { %v8615_v41 = vld [vmem:[#allocation2 + $0xae4] sm:$0xf0]  ;;  %2792 = vmatpush.bf16.msrb.mxu0 %v5937_v42  ;;  %v8331_v25 = vld [vmem:[#allocation2 + $0x20c] sm:$0xf]  ;;  %v6801_v42 = vor.u32 %v8579_v31, %v6798_v32 }
  0xdc   :  { %v6636_v49 = vld [vmem:[#allocation2 + $0x888] sm:$0xf]  ;;  %v6925_v52 = vor.u32 %v8615_v41, %v6924_v40  ;;  %2741 = vmatpush.bf16.msra.mxu1 %v6669_v43  ;;  %7108 = vmatmul.msk.bf16.vlgmr.msra.gmra.mxu0 %vm2499_vm0, %v9211_v45  ;;  %v8515_v28 = vld [vmem:[#allocation2 + $0x7cc] sm:$0xf]  ;;  %v5809_v40 = vor.u32 %v8331_v25, %v5806_v27 }
  0xdd   :  { %v8543_v50 = vld [vmem:[#allocation2 + $0x8a4] sm:$0xf0]  ;;  %v6542_v29 = vld [vmem:[#allocation2 + $0x7e8] sm:$0xf0] }
  0xde   :  { %2753 = vmatpush.bf16.msrb.mxu3 %v6957_v38  ;;  %2779 = vmatpush.bf16.msrb.mxu2 %v5681_v39  ;;  %v6892_v54 = vld [vmem:[#allocation2 + $0xa88] sm:$0xf]  ;;  %v6637_v59 = vor.u32 %v8543_v50, %v6636_v49  ;;  %v7054_v36 = vld [vmem:[#allocation2 + $0xbe8] sm:$0xf0]  ;;  %v5553_v39 = vor.u32 %v8267_v23, %v5550_v24  ;;  %v6545_v41 = vor.u32 %v8515_v28, %v6542_v29  ;;  %v2525_v28 = vpop.f32.mrf.mxu1 }
  0xdf   :  { %v8607_v56 = vld [vmem:[#allocation2 + $0xaa4] sm:$0xf0]  ;;  %2793 = vmatpush.bf16.msrb.mxu0 %v5905_v58  ;;  %v8443_v37 = vld [vmem:[#allocation2 + $0x58c] sm:$0xf]  ;;  %v7057_v46 = vor.u32 %v8643_v33, %v7054_v36 }
  0xe0   :  { %v6604_v0 = vld [vmem:[#allocation2 + $0x848] sm:$0xf]  ;;  %v6893_v2 = vor.u32 %v8607_v56, %v6892_v54  ;;  %2742 = vmatpush.bf16.msra.mxu1 %v6637_v59  ;;  %v6254_v38 = vld [vmem:[#allocation2 + $0x5a8] sm:$0xf0]  ;;  %v9242_v56 = vld [vmem:[#allocation4] sm:$0xff] }
  0xe1   :  { %v8535_v1 = vld [vmem:[#allocation2 + $0x864] sm:$0xf0]  ;;  %v8507_v43 = vld [vmem:[#allocation2 + $0x78c] sm:$0xf]  ;;  %v6257_v47 = vor.u32 %v8443_v37, %v6254_v38 }
  0xe2   :  { %2754 = vmatpush.bf16.msrb.mxu3 %v6925_v52  ;;  %2780 = vmatpush.bf16.msrb.mxu2 %v5649_v53  ;;  %v6860_v4 = vld [vmem:[#allocation2 + $0xa48] sm:$0xf]  ;;  %v6605_v8 = vor.u32 %v8535_v1, %v6604_v0  ;;  %v6510_v44 = vld [vmem:[#allocation2 + $0x7a8] sm:$0xf0]  ;;  %v2538_v38 = vpop.f32.mrf.mxu2 }
  0xe3   :  { %v8599_v5 = vld [vmem:[#allocation2 + $0xa64] sm:$0xf0]  ;;  %2794 = vmatpush.bf16.msrb.mxu0 %v5873_v6  ;;  %v8571_v48 = vld [vmem:[#allocation2 + $0x98c] sm:$0xf]  ;;  %v6513_v58 = vor.u32 %v8507_v43, %v6510_v44  ;;  %v523_v6 = vperm.slane %v9242_v56, 0 }
  0xe4   :  { %v6572_v13 = vld [vmem:[#allocation2 + $0x808] sm:$0xf]  ;;  %v6861_v17 = vor.u32 %v8599_v5, %v6860_v4  ;;  %2743 = vmatpush.bf16.msra.mxu1 %v6605_v8  ;;  %v6766_v49 = vld [vmem:[#allocation2 + $0x9a8] sm:$0xf0] }
  0xe5   :  { %v8527_v14 = vld [vmem:[#allocation2 + $0x824] sm:$0xf0]  ;;  %v8635_v50 = vld [vmem:[#allocation2 + $0xb8c] sm:$0xf]  ;;  %v6769_v59 = vor.u32 %v8571_v48, %v6766_v49 }
  0xe6   :  { %2755 = vmatpush.bf16.msrb.mxu3 %v6893_v2  ;;  %2781 = vmatpush.bf16.msrb.mxu2 %v5617_v3  ;;  %v6828_v19 = vld [vmem:[#allocation2 + $0xa08] sm:$0xf]  ;;  %v6573_v22 = vor.u32 %v8527_v14, %v6572_v13  ;;  %v7022_v52 = vld [vmem:[#allocation2 + $0xba8] sm:$0xf0] }
  0xe7   :  { %v8591_v20 = vld [vmem:[#allocation2 + $0xa24] sm:$0xf0]  ;;  %2795 = vmatpush.bf16.msrb.mxu0 %v5841_v21  ;;  %v8435_v53 = vld [vmem:[#allocation2 + $0x54c] sm:$0xf]  ;;  %v7025_v63 = vor.u32 %v8635_v50, %v7022_v52 }
  0xe8   :  { %v6829_v34 = vor.u32 %v8591_v20, %v6828_v19  ;;  %2744 = vmatpush.bf16.msra.mxu1 %v6573_v22  ;;  %v6222_v54 = vld [vmem:[#allocation2 + $0x568] sm:$0xf0] }
  0xe9   :  { %v8499_v60 = vld [vmem:[#allocation2 + $0x74c] sm:$0xf]  ;;  %v6225_v0 = vor.u32 %v8435_v53, %v6222_v54 }
  0xea   :  { %2756 = vmatpush.bf16.msrb.mxu3 %v6861_v17  ;;  %2782 = vmatpush.bf16.msrb.mxu2 %v5585_v18  ;;  %v6478_v61 = vld [vmem:[#allocation2 + $0x768] sm:$0xf0]  ;;  %v2512_v17 = vpop.f32.mrf.mxu0 }
  0xeb   :  { %2745 = vmatmul.bf16.vlgmr.msra.gmra.mxu1 %v9221_v30  ;;  %2796 = vmatpush.bf16.msrb.mxu0 %v5809_v40  ;;  %v8563_v62 = vld [vmem:[#allocation2 + $0x94c] sm:$0xf]  ;;  %v6481_v8 = vor.u32 %v8499_v60, %v6478_v61  ;;  %v2513_v21 = vadd.f32 %v2512_v17, %v523_v6 }
  0xec   :  { %2802 = vmatpush.bf16.msrb.mxu1 %v6289_v26  ;;  %v6734_v1 = vld [vmem:[#allocation2 + $0x968] sm:$0xf0] }
  0xed   :  { %v8627_v2 = vld [vmem:[#allocation2 + $0xb4c] sm:$0xf]  ;;  %v6737_v9 = vor.u32 %v8563_v62, %v6734_v1  ;;  %v2526_v33 = vadd.f32 %v2525_v28, %v2513_v21  ;;  %v8392_v28 = vld [vmem:[#allocation2 + $0x3ec] sm:$0xf0] }
  0xee   :  { %2757 = vmatpush.bf16.msrb.mxu3 %v6829_v34  ;;  %2783 = vmatpush.bf16.msrb.mxu2 %v5553_v39  ;;  %v6990_v3 = vld [vmem:[#allocation2 + $0xb68] sm:$0xf0] }
  0xef   :  { %2841 = vmatpush.bf16.msra.mxu0 %v7057_v46  ;;  %v8427_v4 = vld [vmem:[#allocation2 + $0x50c] sm:$0xf]  ;;  %v6993_v12 = vor.u32 %v8627_v2, %v6990_v3 }
  0xf0   :  { %2803 = vmatpush.bf16.msrb.mxu1 %v6257_v47  ;;  %v6190_v5 = vld [vmem:[#allocation2 + $0x528] sm:$0xf0]  ;;  %2797 = vmatmul.bf16.vlgmr.msrb.gmra.mxu0 %v9204_v7 }
  0xf1   :  { %2758 = vmatmul.bf16.vlgmr.msrb.gmra.mxu3 %v9223_v35  ;;  %2784 = vmatmul.bf16.vlgmr.msrb.gmra.mxu2 %v9195_v55  ;;  %v8491_v10 = vld [vmem:[#allocation2 + $0x70c] sm:$0xf]  ;;  %v6193_v13 = vor.u32 %v8427_v4, %v6190_v5  ;;  %v2527_v5 = vpop.f32.mrf.mxu1 }
  0xf2   :  { %2815 = vmatpush.bf16.msra.mxu3 %v6545_v41  ;;  %2828 = vmatpush.bf16.msra.mxu2 %v6801_v42  ;;  %v6446_v11 = vld [vmem:[#allocation2 + $0x728] sm:$0xf0]  ;;  %v2539_v41 = vadd.f32 %v2538_v38, %v2526_v33  ;;  %v2551_v42 = vpop.f32.mrf.mxu3  ;;  %v2514_v52 = vpop.f32.mrf.mxu0  ;;  %v6548_v33 = vld [vmem:[#allocation2 + $0x7d0] sm:$0xf] }
  0xf3   :  { %2842 = vmatpush.bf16.msra.mxu0 %v7025_v63  ;;  %v8555_v14 = vld [vmem:[#allocation2 + $0x90c] sm:$0xf]  ;;  %v6449_v22 = vor.u32 %v8491_v10, %v6446_v11  ;;  %v2540_v10 = vpop.f32.mrf.mxu2  ;;  %v8512_v52 = vld [vmem:[#allocation2 + $0x7ac] sm:$0xf0] }
  0xf4   :  { %2804 = vmatpush.bf16.msrb.mxu1 %v6225_v0  ;;  %v6702_v15 = vld [vmem:[#allocation2 + $0x928] sm:$0xf0]  ;;  %v9248_v53 = vadd.f32 %v2551_v42, %v2539_v41  ;;  %v8320_v41 = vld [vmem:[#allocation2 + $0x1ac] sm:$0xf0] }
  0xf5   :  { %v8619_v16 = vld [vmem:[#allocation2 + $0xb0c] sm:$0xf]  ;;  %v6705_v23 = vor.u32 %v8555_v14, %v6702_v15  ;;  %v8304_v10 = vld [vmem:[#allocation2 + $0x12c] sm:$0xf0] }
  0xf6   :  { %2816 = vmatpush.bf16.msra.mxu3 %v6513_v58  ;;  %2829 = vmatpush.bf16.msra.mxu2 %v6769_v59  ;;  %v6958_v18 = vld [vmem:[#allocation2 + $0xb28] sm:$0xf0] }
  0xf7   :  { %v8419_v19 = vld [vmem:[#allocation2 + $0x4cc] sm:$0xf]  ;;  %2843 = vmatpush.bf16.msra.mxu0 %v6993_v12  ;;  %v6961_v26 = vor.u32 %v8619_v16, %v6958_v18 }
  0xf8   :  { %v6158_v20 = vld [vmem:[#allocation2 + $0x4e8] sm:$0xf0]  ;;  %2805 = vmatpush.bf16.msrb.mxu1 %v6193_v13 }
  0xf9   :  { %v8483_v24 = vld [vmem:[#allocation2 + $0x6cc] sm:$0xf]  ;;  %v6161_v27 = vor.u32 %v8419_v19, %v6158_v20 }
  0xfa   :  { %2817 = vmatpush.bf16.msra.mxu3 %v6481_v8  ;;  %2830 = vmatpush.bf16.msra.mxu2 %v6737_v9  ;;  %v6414_v25 = vld [vmem:[#allocation2 + $0x6e8] sm:$0xf0]  ;;  %v2553_v17 = vpop.f32.mrf.mxu3 }
  0xfb   :  { %v8547_v29 = vld [vmem:[#allocation2 + $0x8cc] sm:$0xf]  ;;  %v6417_v39 = vor.u32 %v8483_v24, %v6414_v25  ;;  %2844 = vmatpush.bf16.msra.mxu0 %v6961_v26  ;;  %v5780_v25 = vld [vmem:[#allocation2 + $0x1d0] sm:$0xf] }
  0xfc   :  { %v6670_v31 = vld [vmem:[#allocation2 + $0x8e8] sm:$0xf0]  ;;  %2806 = vmatpush.bf16.msrb.mxu1 %v6161_v27  ;;  %v8328_v26 = vld [vmem:[#allocation2 + $0x1ec] sm:$0xf0] }
  0xfd   :  { %v8611_v32 = vld [vmem:[#allocation2 + $0xacc] sm:$0xf]  ;;  %v6673_v40 = vor.u32 %v8547_v29, %v6670_v31  ;;  %v6036_v27 = vld [vmem:[#allocation2 + $0x3d0] sm:$0xf]  ;;  %v5781_v38 = vor.u32 %v8328_v26, %v5780_v25 }
  0xfe   :  { %v6926_v34 = vld [vmem:[#allocation2 + $0xae8] sm:$0xf0]  ;;  %2818 = vmatpush.bf16.msra.mxu3 %v6449_v22  ;;  %2831 = vmatpush.bf16.msra.mxu2 %v6705_v23  ;;  %v6292_v29 = vld [vmem:[#allocation2 + $0x5d0] sm:$0xf] }
  0xff   :  { %v8411_v36 = vld [vmem:[#allocation2 + $0x48c] sm:$0xf]  ;;  %v6929_v46 = vor.u32 %v8611_v32, %v6926_v34  ;;  %v8456_v32 = vld [vmem:[#allocation2 + $0x5ec] sm:$0xf0]  ;;  %v2564_v5 = vpop.f32.mrf.mxu0 }
 0x100   :  { %v6126_v37 = vld [vmem:[#allocation2 + $0x4a8] sm:$0xf0]  ;;  %v8520_v34 = vld [vmem:[#allocation2 + $0x7ec] sm:$0xf0]  ;;  %v6293_v42 = vor.u32 %v8456_v32, %v6292_v29 }
 0x101   :  { %v8475_v43 = vld [vmem:[#allocation2 + $0x68c] sm:$0xf]  ;;  %v6129_v47 = vor.u32 %v8411_v36, %v6126_v37  ;;  %2845 = vmatpush.bf16.msra.mxu0 %v6929_v46  ;;  %v8384_v46 = vld [vmem:[#allocation2 + $0x3ac] sm:$0xf0] }
 0x102   :  { %v6382_v44 = vld [vmem:[#allocation2 + $0x6a8] sm:$0xf0]  ;;  %2819 = vmatpush.bf16.msra.mxu3 %v6417_v39  ;;  %2832 = vmatpush.bf16.msra.mxu2 %v6673_v40  ;;  %v6037_v39 = vor.u32 %v8392_v28, %v6036_v27  ;;  %v5748_v40 = vld [vmem:[#allocation2 + $0x190] sm:$0xf] }
 0x103   :  { %v8539_v48 = vld [vmem:[#allocation2 + $0x88c] sm:$0xf]  ;;  %v6385_v60 = vor.u32 %v8475_v43, %v6382_v44  ;;  %2807 = vmatpush.bf16.msrb.mxu1 %v6129_v47  ;;  %v6549_v43 = vor.u32 %v8520_v34, %v6548_v33  ;;  %v6004_v44 = vld [vmem:[#allocation2 + $0x390] sm:$0xf]  ;;  %v524_v33 = vperm.slane %v9242_v56, 1 }
 0x104   :  { %v6638_v49 = vld [vmem:[#allocation2 + $0x8a8] sm:$0xf0]  ;;  %v6260_v47 = vld [vmem:[#allocation2 + $0x590] sm:$0xf] }
 0x105   :  { %v8603_v50 = vld [vmem:[#allocation2 + $0xa8c] sm:$0xf]  ;;  %v6641_v61 = vor.u32 %v8539_v48, %v6638_v49  ;;  %v2590_v48 = vpop.f32.mrf.mxu2  ;;  %v8448_v49 = vld [vmem:[#allocation2 + $0x5ac] sm:$0xf0] }
 0x106   :  { %v6894_v54 = vld [vmem:[#allocation2 + $0xaa8] sm:$0xf0]  ;;  %2820 = vmatpush.bf16.msra.mxu3 %v6385_v60  ;;  %v8312_v60 = vld [vmem:[#allocation2 + $0x16c] sm:$0xf0] }
 0x107   :  { %v8403_v58 = vld [vmem:[#allocation2 + $0x44c] sm:$0xf]  ;;  %v6897_v0 = vor.u32 %v8603_v50, %v6894_v54  ;;  %2833 = vmatpush.bf16.msra.mxu2 %v6641_v61  ;;  %v6516_v50 = vld [vmem:[#allocation2 + $0x790] sm:$0xf]  ;;  %v5749_v54 = vor.u32 %v8320_v41, %v5748_v40  ;;  %v6261_v61 = vor.u32 %v8448_v49, %v6260_v47 }
 0x108   :  { %v6094_v59 = vld [vmem:[#allocation2 + $0x468] sm:$0xf0]  ;;  %v6196_v17 = vld [vmem:[#allocation2 + $0x510] sm:$0xf] }
 0x109   :  { %v8467_v62 = vld [vmem:[#allocation2 + $0x64c] sm:$0xf]  ;;  %v6097_v1 = vor.u32 %v8403_v58, %v6094_v59  ;;  %2846 = vmatpush.bf16.msra.mxu0 %v6897_v0  ;;  %v6005_v58 = vor.u32 %v8384_v46, %v6004_v44  ;;  %v5716_v59 = vld [vmem:[#allocation2 + $0x150] sm:$0xf] }
 0x10a   :  { %v6350_v63 = vld [vmem:[#allocation2 + $0x668] sm:$0xf0]  ;;  %v8376_v0 = vld [vmem:[#allocation2 + $0x36c] sm:$0xf0] }
 0x10b   :  { %v8531_v2 = vld [vmem:[#allocation2 + $0x84c] sm:$0xf]  ;;  %v6353_v13 = vor.u32 %v8467_v62, %v6350_v63  ;;  %2808 = vmatpush.bf16.msrb.mxu1 %v6097_v1  ;;  %v6517_v62 = vor.u32 %v8512_v52, %v6516_v50  ;;  %v5972_v63 = vld [vmem:[#allocation2 + $0x350] sm:$0xf] }
 0x10c   :  { %v6606_v3 = vld [vmem:[#allocation2 + $0x868] sm:$0xf0]  ;;  %v6228_v1 = vld [vmem:[#allocation2 + $0x550] sm:$0xf] }
 0x10d   :  { %v8595_v4 = vld [vmem:[#allocation2 + $0xa4c] sm:$0xf]  ;;  %v6609_v14 = vor.u32 %v8531_v2, %v6606_v3  ;;  %2821 = vmatpush.bf16.msra.mxu3 %v6353_v13  ;;  %v8440_v2 = vld [vmem:[#allocation2 + $0x56c] sm:$0xf0] }
 0x10e   :  { %v6862_v6 = vld [vmem:[#allocation2 + $0xa68] sm:$0xf0]  ;;  %v6484_v3 = vld [vmem:[#allocation2 + $0x750] sm:$0xf] }
 0x10f   :  { %v8395_v8 = vld [vmem:[#allocation2 + $0x40c] sm:$0xf]  ;;  %v6865_v18 = vor.u32 %v8595_v4, %v6862_v6  ;;  %2834 = vmatpush.bf16.msra.mxu2 %v6609_v14  ;;  %v8504_v4 = vld [vmem:[#allocation2 + $0x76c] sm:$0xf0]  ;;  %v5717_v6 = vor.u32 %v8312_v60, %v5716_v59  ;;  %v2577_v14 = vpop.f32.mrf.mxu1 }
 0x110   :  { %v6062_v9 = vld [vmem:[#allocation2 + $0x428] sm:$0xf0]  ;;  %v6485_v13 = vor.u32 %v8504_v4, %v6484_v3  ;;  %v5652_v25 = vld [vmem:[#allocation2 + $0xd0] sm:$0xf] }
 0x111   :  { %v8651_v11 = vld [vmem:[#allocation2 + $0xc0c] sm:$0xf]  ;;  %v6065_v19 = vor.u32 %v8395_v8, %v6062_v9  ;;  %2847 = vmatpush.bf16.msra.mxu0 %v6865_v18  ;;  %v5973_v8 = vor.u32 %v8376_v0, %v5972_v63  ;;  %v5684_v9 = vld [vmem:[#allocation2 + $0x110] sm:$0xf]  ;;  %v2592_v18 = vpop.f32.mrf.mxu2 }
 0x112   :  { %v7086_v12 = vld [vmem:[#allocation2 + $0xc28] sm:$0xf0]  ;;  %v8296_v26 = vld [vmem:[#allocation2 + $0xec] sm:$0xf0] }
 0x113   :  { %v8459_v15 = vld [vmem:[#allocation2 + $0x60c] sm:$0xf]  ;;  %v7089_v24 = vor.u32 %v8651_v11, %v7086_v12  ;;  %2809 = vmatpush.bf16.msrb.mxu1 %v6065_v19  ;;  %v2565_v11 = vadd.f32 %v2564_v5, %v9248_v53  ;;  %v6229_v12 = vor.u32 %v8440_v2, %v6228_v1  ;;  %v8432_v19 = vld [vmem:[#allocation2 + $0x52c] sm:$0xf0] }
 0x114   :  { %v6318_v16 = vld [vmem:[#allocation2 + $0x628] sm:$0xf0]  ;;  %v5908_v27 = vld [vmem:[#allocation2 + $0x2d0] sm:$0xf]  ;;  %v6197_v28 = vor.u32 %v8432_v19, %v6196_v17 }
 0x115   :  { %v8523_v20 = vld [vmem:[#allocation2 + $0x80c] sm:$0xf]  ;;  %v6321_v31 = vor.u32 %v8459_v15, %v6318_v16  ;;  %v5940_v15 = vld [vmem:[#allocation2 + $0x310] sm:$0xf] }
 0x116   :  { %v6574_v21 = vld [vmem:[#allocation2 + $0x828] sm:$0xf0]  ;;  %2810 = vmatmul.bf16.vlgmr.msrb.gmra.mxu1 %v9193_v51  ;;  %v8368_v16 = vld [vmem:[#allocation2 + $0x32c] sm:$0xf0] }
 0x117   :  { %v8587_v22 = vld [vmem:[#allocation2 + $0xa0c] sm:$0xf]  ;;  %v6577_v36 = vor.u32 %v8523_v20, %v6574_v21  ;;  %2861 = vmatpush.bf16.msra.mxu1 %v7089_v24  ;;  %2822 = vmatpush.bf16.msra.mxu3 %v6321_v31  ;;  %v6452_v20 = vld [vmem:[#allocation2 + $0x710] sm:$0xf]  ;;  %v5941_v24 = vor.u32 %v8368_v16, %v5940_v15  ;;  %v2579_v52 = vpop.f32.mrf.mxu1 }
 0x118   :  { %v6830_v23 = vld [vmem:[#allocation2 + $0xa28] sm:$0xf0]  ;;  %v8496_v21 = vld [vmem:[#allocation2 + $0x72c] sm:$0xf0] }
 0x119   :  { %v6833_v37 = vor.u32 %v8587_v22, %v6830_v23  ;;  %2835 = vmatpush.bf16.msra.mxu2 %v6577_v36  ;;  %v2578_v22 = vadd.f32 %v2577_v14, %v2565_v11  ;;  %v5685_v23 = vor.u32 %v8304_v10, %v5684_v9  ;;  %v6453_v29 = vor.u32 %v8496_v21, %v6452_v20  ;;  %v8360_v31 = vld [vmem:[#allocation2 + $0x2ec] sm:$0xf0]  ;;  %v2616_v60 = vpop.f32.mrf.mxu2 }
 0x11a   :  { %2823 = vmatmul.bf16.vlgmr.msra.gmra.mxu3 %v9197_v57  ;;  %v6164_v32 = vld [vmem:[#allocation2 + $0x4d0] sm:$0xf] }
 0x11b   :  { %2848 = vmatpush.bf16.msra.mxu0 %v6833_v37  ;;  %2867 = vmatpush.bf16.msrb.mxu3 %v5781_v38  ;;  %v9255_v53 = vadd.f32 %v2590_v48, %v2578_v22  ;;  %v8424_v34 = vld [vmem:[#allocation2 + $0x4ec] sm:$0xf0]  ;;  %v5653_v38 = vor.u32 %v8296_v26, %v5652_v25 }
 0x11c   :  { %2880 = vmatpush.bf16.msrb.mxu1 %v6037_v39  ;;  %2836 = vmatmul.bf16.vlgmr.msra.gmra.mxu2 %v9221_v30  ;;  %v6420_v36 = vld [vmem:[#allocation2 + $0x6d0] sm:$0xf]  ;;  %v5909_v39 = vor.u32 %v8360_v31, %v5908_v27  ;;  %v6165_v44 = vor.u32 %v8424_v34, %v6164_v32  ;;  %v8324_v32 = vld [vmem:[#allocation2 + $0x1d4] sm:$0xf] }
 0x11d   :  { %2893 = vmatpush.bf16.msrb.mxu2 %v6293_v42  ;;  %v8488_v37 = vld [vmem:[#allocation2 + $0x6ec] sm:$0xf0]  ;;  %v2603_v42 = vpop.f32.mrf.mxu3 }
 0x11e   :  { %2849 = vmatmul.bf16.vlgmr.msra.gmra.mxu0 %v9223_v35  ;;  %v5620_v40 = vld [vmem:[#allocation2 + $0x90] sm:$0xf]  ;;  %v6421_v46 = vor.u32 %v8488_v37, %v6420_v36  ;;  %v2604_v50 = vadd.f32 %v2603_v42, %v524_v33  ;;  %v5782_v33 = vld [vmem:[#allocation2 + $0x1f0] sm:$0xf0] }
 0x11f   :  { %2906 = vmatpush.bf16.msrb.mxu0 %v6549_v43  ;;  %2868 = vmatpush.bf16.msrb.mxu3 %v5749_v54  ;;  %v8288_v41 = vld [vmem:[#allocation2 + $0xac] sm:$0xf0]  ;;  %v2566_v43 = vpop.f32.mrf.mxu0  ;;  %v6038_v42 = vld [vmem:[#allocation2 + $0x3f0] sm:$0xf0] }
 0x120   :  { %2881 = vmatpush.bf16.msrb.mxu1 %v6005_v58  ;;  %v5876_v47 = vld [vmem:[#allocation2 + $0x290] sm:$0xf]  ;;  %v5785_v43 = vor.u32 %v8324_v32, %v5782_v33  ;;  %v8292_v33 = vld [vmem:[#allocation2 + $0xd4] sm:$0xf] }
 0x121   :  { %2894 = vmatpush.bf16.msrb.mxu2 %v6261_v61  ;;  %v8352_v48 = vld [vmem:[#allocation2 + $0x2ac] sm:$0xf0]  ;;  %v9260_v61 = vadd.f32 %v2616_v60, %v2604_v50  ;;  %v2618_v25 = vpop.f32.mrf.mxu2  ;;  %v5750_v50 = vld [vmem:[#allocation2 + $0x1b0] sm:$0xf0] }
 0x122   :  { %v6132_v49 = vld [vmem:[#allocation2 + $0x490] sm:$0xf]  ;;  %v5877_v63 = vor.u32 %v8352_v48, %v5876_v47  ;;  %v6006_v60 = vld [vmem:[#allocation2 + $0x3b0] sm:$0xf0] }
 0x123   :  { %2907 = vmatpush.bf16.msrb.mxu0 %v6517_v62  ;;  %2869 = vmatpush.bf16.msrb.mxu3 %v5717_v6  ;;  %v8416_v54 = vld [vmem:[#allocation2 + $0x4ac] sm:$0xf0]  ;;  %v5621_v62 = vor.u32 %v8288_v41, %v5620_v40  ;;  %v8388_v41 = vld [vmem:[#allocation2 + $0x3d4] sm:$0xf] }
 0x124   :  { %2882 = vmatpush.bf16.msrb.mxu1 %v5973_v8  ;;  %v6388_v58 = vld [vmem:[#allocation2 + $0x690] sm:$0xf]  ;;  %v6133_v2 = vor.u32 %v8416_v54, %v6132_v49  ;;  %v8316_v49 = vld [vmem:[#allocation2 + $0x194] sm:$0xf]  ;;  %v6041_v54 = vor.u32 %v8388_v41, %v6038_v42 }
 0x125   :  { %2895 = vmatpush.bf16.msrb.mxu2 %v6229_v12  ;;  %v8480_v59 = vld [vmem:[#allocation2 + $0x6ac] sm:$0xf0]  ;;  %v2605_v16 = vpop.f32.mrf.mxu3  ;;  %v8364_v25 = vld [vmem:[#allocation2 + $0x314] sm:$0xf] }
 0x126   :  { %7109 = vmatmul.msk.bf16.vlgmr.msra.gmra.mxu1 %vm2499_vm0, %v9211_v45  ;;  %v5588_v0 = vld [vmem:[#allocation2 + $0x50] sm:$0xf]  ;;  %v6389_v3 = vor.u32 %v8480_v59, %v6388_v58  ;;  %v8380_v59 = vld [vmem:[#allocation2 + $0x394] sm:$0xf] }
 0x127   :  { %2908 = vmatpush.bf16.msrb.mxu0 %v6485_v13  ;;  %2870 = vmatpush.bf16.msrb.mxu3 %v5685_v23  ;;  %v8280_v1 = vld [vmem:[#allocation2 + $0x6c] sm:$0xf0]  ;;  %v5910_v41 = vld [vmem:[#allocation2 + $0x2f0] sm:$0xf0] }
 0x128   :  { %2883 = vmatpush.bf16.msrb.mxu1 %v5941_v24  ;;  %v5844_v4 = vld [vmem:[#allocation2 + $0x250] sm:$0xf]  ;;  %v5589_v11 = vor.u32 %v8280_v1, %v5588_v0 }
 0x129   :  { %2896 = vmatpush.bf16.msrb.mxu2 %v6197_v28  ;;  %v8344_v5 = vld [vmem:[#allocation2 + $0x26c] sm:$0xf0] }
 0x12a   :  { %v6100_v6 = vld [vmem:[#allocation2 + $0x450] sm:$0xf]  ;;  %v5845_v12 = vor.u32 %v8344_v5, %v5844_v4  ;;  %v8308_v4 = vld [vmem:[#allocation2 + $0x154] sm:$0xf] }
 0x12b   :  { %2909 = vmatpush.bf16.msrb.mxu0 %v6453_v29  ;;  %2871 = vmatpush.bf16.msrb.mxu3 %v5653_v38  ;;  %v8408_v8 = vld [vmem:[#allocation2 + $0x46c] sm:$0xf0]  ;;  %v5718_v5 = vld [vmem:[#allocation2 + $0x170] sm:$0xf0] }
 0x12c   :  { %2884 = vmatpush.bf16.msrb.mxu1 %v5909_v39  ;;  %v6356_v9 = vld [vmem:[#allocation2 + $0x650] sm:$0xf]  ;;  %v6101_v17 = vor.u32 %v8408_v8, %v6100_v6  ;;  %v6009_v6 = vor.u32 %v8380_v59, %v6006_v60  ;;  %v2629_v8 = vpop.f32.mrf.mxu0 }
 0x12d   :  { %2897 = vmatpush.bf16.msrb.mxu2 %v6165_v44  ;;  %v8472_v10 = vld [vmem:[#allocation2 + $0x66c] sm:$0xf0] }
 0x12e   :  { %v5556_v13 = vld [vmem:[#allocation2 + $0x10] sm:$0xf]  ;;  %v6357_v18 = vor.u32 %v8472_v10, %v6356_v9  ;;  %v8372_v10 = vld [vmem:[#allocation2 + $0x354] sm:$0xf] }
 0x12f   :  { %2910 = vmatpush.bf16.msrb.mxu0 %v6421_v46  ;;  %2872 = vmatpush.bf16.msrb.mxu3 %v5621_v62  ;;  %v8272_v14 = vld [vmem:[#allocation2 + $0x2c] sm:$0xf0] }
 0x130   :  { %2885 = vmatpush.bf16.msrb.mxu1 %v5877_v63  ;;  %v5812_v15 = vld [vmem:[#allocation2 + $0x210] sm:$0xf]  ;;  %v5557_v29 = vor.u32 %v8272_v14, %v5556_v13  ;;  %v5753_v63 = vor.u32 %v8316_v49, %v5750_v50  ;;  %v5721_v14 = vor.u32 %v8308_v4, %v5718_v5 }
 0x131   :  { %2898 = vmatpush.bf16.msrb.mxu2 %v6133_v2  ;;  %v8336_v19 = vld [vmem:[#allocation2 + $0x22c] sm:$0xf0] }
 0x132   :  { %v6068_v20 = vld [vmem:[#allocation2 + $0x410] sm:$0xf]  ;;  %v5813_v31 = vor.u32 %v8336_v19, %v5812_v15 }
 0x133   :  { %2911 = vmatpush.bf16.msrb.mxu0 %v6389_v3  ;;  %v8400_v21 = vld [vmem:[#allocation2 + $0x42c] sm:$0xf0]  ;;  %2873 = vmatpush.bf16.msrb.mxu3 %v5589_v11  ;;  %v5974_v11 = vld [vmem:[#allocation2 + $0x370] sm:$0xf0] }
 0x134   :  { %v6324_v22 = vld [vmem:[#allocation2 + $0x610] sm:$0xf]  ;;  %2886 = vmatpush.bf16.msrb.mxu1 %v5845_v12  ;;  %v6069_v34 = vor.u32 %v8400_v21, %v6068_v20  ;;  %v2630_v12 = vadd.f32 %v2629_v8, %v9260_v61  ;;  %v8300_v20 = vld [vmem:[#allocation2 + $0x114] sm:$0xf]  ;;  %v2631_v42 = vpop.f32.mrf.mxu0  ;;  %v2668_v49 = vpop.f32.mrf.mxu2 }
 0x135   :  { %v8464_v23 = vld [vmem:[#allocation2 + $0x62c] sm:$0xf0]  ;;  %2899 = vmatpush.bf16.msrb.mxu2 %v6101_v17  ;;  %v5686_v21 = vld [vmem:[#allocation2 + $0x130] sm:$0xf0] }
 0x136   :  { %v6804_v24 = vld [vmem:[#allocation2 + $0x9d0] sm:$0xf]  ;;  %v6325_v36 = vor.u32 %v8464_v23, %v6324_v22  ;;  %v5977_v23 = vor.u32 %v8372_v10, %v5974_v11  ;;  %v5689_v61 = vor.u32 %v8300_v20, %v5686_v21  ;;  %v8276_v8 = vld [vmem:[#allocation2 + $0x54] sm:$0xf] }
 0x137   :  { %v8584_v26 = vld [vmem:[#allocation2 + $0x9ec] sm:$0xf0]  ;;  %2912 = vmatpush.bf16.msrb.mxu0 %v6357_v18  ;;  %2874 = vmatpush.bf16.msrb.mxu3 %v5557_v29  ;;  %v2642_v18 = vpop.f32.mrf.mxu1  ;;  %v8268_v21 = vld [vmem:[#allocation2 + $0x14] sm:$0xf] }
 0x138   :  { %v7060_v27 = vld [vmem:[#allocation2 + $0xbd0] sm:$0xf]  ;;  %v6805_v38 = vor.u32 %v8584_v26, %v6804_v24  ;;  %2887 = vmatpush.bf16.msrb.mxu1 %v5813_v31  ;;  %v2643_v22 = vadd.f32 %v2642_v18, %v2630_v12  ;;  %v5942_v26 = vld [vmem:[#allocation2 + $0x330] sm:$0xf0] }
 0x139   :  { %v8648_v28 = vld [vmem:[#allocation2 + $0xbec] sm:$0xf0]  ;;  %2900 = vmatpush.bf16.msrb.mxu2 %v6069_v34  ;;  %v5654_v34 = vld [vmem:[#allocation2 + $0xf0] sm:$0xf0] }
 0x13a   :  { %v7092_v37 = vld [vmem:[#allocation2 + $0xc10] sm:$0xf]  ;;  %v7061_v39 = vor.u32 %v8648_v28, %v7060_v27  ;;  %2875 = vmatmul.bf16.vlgmr.msrb.gmra.mxu3 %v9195_v55 }
 0x13b   :  { %v8656_v40 = vld [vmem:[#allocation2 + $0xc2c] sm:$0xf0]  ;;  %2913 = vmatpush.bf16.msrb.mxu0 %v6325_v36  ;;  %2919 = vmatpush.bf16.msra.mxu3 %v6805_v38  ;;  %v2655_v36 = vpop.f32.mrf.mxu3  ;;  %v5945_v38 = vor.u32 %v8364_v25, %v5942_v26  ;;  %v6294_v25 = vld [vmem:[#allocation2 + $0x5f0] sm:$0xf0] }
 0x13c   :  { %v6772_v44 = vld [vmem:[#allocation2 + $0x990] sm:$0xf]  ;;  %v7093_v52 = vor.u32 %v8656_v40, %v7092_v37  ;;  %2932 = vmatpush.bf16.msra.mxu1 %v7061_v39  ;;  %2901 = vmatmul.bf16.vlgmr.msrb.gmra.mxu2 %v9193_v51  ;;  %v2656_v37 = vadd.f32 %v2655_v36, %v2643_v22  ;;  %v8356_v40 = vld [vmem:[#allocation2 + $0x2d4] sm:$0xf] }
 0x13d   :  { %v8576_v46 = vld [vmem:[#allocation2 + $0x9ac] sm:$0xf0]  ;;  %2888 = vmatmul.bf16.vlgmr.msrb.gmra.mxu1 %v9204_v7  ;;  %v5913_v60 = vor.u32 %v8356_v40, %v5910_v41  ;;  %v5558_v22 = vld [vmem:[#allocation2 + $0x30] sm:$0xf0] }
 0x13e   :  { %v7028_v47 = vld [vmem:[#allocation2 + $0xb90] sm:$0xf]  ;;  %v6773_v58 = vor.u32 %v8576_v46, %v6772_v44  ;;  %2952 = vmatpush.bf16.msra.mxu2 %v7093_v52  ;;  %2914 = vmatmul.bf16.vlgmr.msrb.gmra.mxu0 %v9197_v57  ;;  %v5657_v44 = vor.u32 %v8292_v33, %v5654_v34  ;;  %v8284_v52 = vld [vmem:[#allocation2 + $0x94] sm:$0xf]  ;;  %v9267_v59 = vadd.f32 %v2668_v49, %v2656_v37 }
 0x13f   :  { %v8640_v48 = vld [vmem:[#allocation2 + $0xbac] sm:$0xf0]  ;;  %2958 = vmatpush.bf16.msra.mxu0 %v5785_v43  ;;  %v8516_v26 = vld [vmem:[#allocation2 + $0x7d4] sm:$0xf]  ;;  %v5561_v33 = vor.u32 %v8268_v21, %v5558_v22  ;;  %v525_v21 = vperm.slane %v9242_v56, 2 }
 0x140   :  { %v7029_v62 = vor.u32 %v8640_v48, %v7028_v47  ;;  %v6740_v0 = vld [vmem:[#allocation2 + $0x950] sm:$0xf]  ;;  %2920 = vmatpush.bf16.msra.mxu3 %v6773_v58  ;;  %v2644_v58 = vpop.f32.mrf.mxu1  ;;  %v8332_v34 = vld [vmem:[#allocation2 + $0x214] sm:$0xf] }
 0x141   :  { %v8568_v1 = vld [vmem:[#allocation2 + $0x96c] sm:$0xf0]  ;;  %v5814_v36 = vld [vmem:[#allocation2 + $0x230] sm:$0xf0] }
 0x142   :  { %v6996_v2 = vld [vmem:[#allocation2 + $0xb50] sm:$0xf]  ;;  %2971 = vmatpush.bf16.msrb.mxu2 %v6041_v54  ;;  %v6741_v9 = vor.u32 %v8568_v1, %v6740_v0  ;;  %2933 = vmatpush.bf16.msra.mxu1 %v7029_v62  ;;  %v5622_v54 = vld [vmem:[#allocation2 + $0xb0] sm:$0xf0]  ;;  %v5817_v49 = vor.u32 %v8332_v34, %v5814_v36 }
 0x143   :  { %v8632_v3 = vld [vmem:[#allocation2 + $0xb6c] sm:$0xf0]  ;;  %2959 = vmatpush.bf16.msra.mxu0 %v5753_v63  ;;  %v8348_v63 = vld [vmem:[#allocation2 + $0x294] sm:$0xf]  ;;  %v2657_v10 = vpop.f32.mrf.mxu3 }
 0x144   :  { %v6997_v13 = vor.u32 %v8632_v3, %v6996_v2  ;;  %v6708_v15 = vld [vmem:[#allocation2 + $0x910] sm:$0xf]  ;;  %2921 = vmatpush.bf16.msra.mxu3 %v6741_v9  ;;  %v5878_v0 = vld [vmem:[#allocation2 + $0x2b0] sm:$0xf0]  ;;  %v5625_v2 = vor.u32 %v8284_v52, %v5622_v54 }
 0x145   :  { %v8560_v16 = vld [vmem:[#allocation2 + $0x92c] sm:$0xf0]  ;;  %v5590_v9 = vld [vmem:[#allocation2 + $0x70] sm:$0xf0]  ;;  %v5881_v11 = vor.u32 %v8348_v63, %v5878_v0 }
 0x146   :  { %v6964_v17 = vld [vmem:[#allocation2 + $0xb10] sm:$0xf]  ;;  %2972 = vmatpush.bf16.msrb.mxu2 %v6009_v6  ;;  %v6709_v24 = vor.u32 %v8560_v16, %v6708_v15  ;;  %2934 = vmatpush.bf16.msra.mxu1 %v6997_v13  ;;  %v8340_v13 = vld [vmem:[#allocation2 + $0x254] sm:$0xf] }
 0x147   :  { %v8624_v19 = vld [vmem:[#allocation2 + $0xb2c] sm:$0xf0]  ;;  %2960 = vmatpush.bf16.msra.mxu0 %v5721_v14  ;;  %v5846_v14 = vld [vmem:[#allocation2 + $0x270] sm:$0xf0] }
 0x148   :  { %v6965_v27 = vor.u32 %v8624_v19, %v6964_v17  ;;  %v6676_v28 = vld [vmem:[#allocation2 + $0x8d0] sm:$0xf]  ;;  %2922 = vmatpush.bf16.msra.mxu3 %v6709_v24  ;;  %v5593_v17 = vor.u32 %v8276_v8, %v5590_v9  ;;  %v2670_v24 = vpop.f32.mrf.mxu2  ;;  %v7062_v40 = vld [vmem:[#allocation2 + $0xbf0] sm:$0xf0] }
 0x149   :  { %v8552_v29 = vld [vmem:[#allocation2 + $0x8ec] sm:$0xf0]  ;;  %v8444_v41 = vld [vmem:[#allocation2 + $0x594] sm:$0xf] }
 0x14a   :  { %v6932_v31 = vld [vmem:[#allocation2 + $0xad0] sm:$0xf]  ;;  %2973 = vmatpush.bf16.msrb.mxu2 %v5977_v23  ;;  %v6677_v39 = vor.u32 %v8552_v29, %v6676_v28  ;;  %2935 = vmatpush.bf16.msra.mxu1 %v6965_v27  ;;  %v8452_v23 = vld [vmem:[#allocation2 + $0x5d4] sm:$0xf] }
 0x14b   :  { %v8616_v32 = vld [vmem:[#allocation2 + $0xaec] sm:$0xf0]  ;;  %2961 = vmatpush.bf16.msra.mxu0 %v5689_v61  ;;  %v6550_v27 = vld [vmem:[#allocation2 + $0x7f0] sm:$0xf0]  ;;  %v5849_v61 = vor.u32 %v8340_v13, %v5846_v14  ;;  %v6297_v37 = vor.u32 %v8452_v23, %v6294_v25  ;;  %v2694_v23 = vpop.f32.mrf.mxu1 }
 0x14c   :  { %v6933_v43 = vor.u32 %v8616_v32, %v6932_v31  ;;  %v6644_v46 = vld [vmem:[#allocation2 + $0x890] sm:$0xf]  ;;  %2923 = vmatpush.bf16.msra.mxu3 %v6677_v39  ;;  %7110 = vmatmul.msk.bf16.vlgmr.msra.gmra.mxu2 %vm2499_vm0, %v9211_v45  ;;  %v8580_v29 = vld [vmem:[#allocation2 + $0x9d4] sm:$0xf] }
 0x14d   :  { %v8544_v47 = vld [vmem:[#allocation2 + $0x8ac] sm:$0xf0]  ;;  %v6806_v31 = vld [vmem:[#allocation2 + $0x9f0] sm:$0xf0] }
 0x14e   :  { %v6900_v48 = vld [vmem:[#allocation2 + $0xa90] sm:$0xf]  ;;  %2974 = vmatpush.bf16.msrb.mxu2 %v5945_v38  ;;  %v6645_v62 = vor.u32 %v8544_v47, %v6644_v46  ;;  %2936 = vmatpush.bf16.msra.mxu1 %v6933_v43  ;;  %v6553_v38 = vor.u32 %v8516_v26, %v6550_v27  ;;  %v8644_v39 = vld [vmem:[#allocation2 + $0xbd4] sm:$0xf]  ;;  %v6809_v42 = vor.u32 %v8580_v29, %v6806_v31  ;;  %v2681_v43 = vpop.f32.mrf.mxu3 }
 0x14f   :  { %v8608_v50 = vld [vmem:[#allocation2 + $0xaac] sm:$0xf0]  ;;  %2962 = vmatpush.bf16.msra.mxu0 %v5657_v44  ;;  %v6262_v44 = vld [vmem:[#allocation2 + $0x5b0] sm:$0xf0]  ;;  %v7065_v54 = vor.u32 %v8644_v39, %v7062_v40 }
 0x150   :  { %v6901_v1 = vor.u32 %v8608_v50, %v6900_v48  ;;  %v6612_v3 = vld [vmem:[#allocation2 + $0x850] sm:$0xf]  ;;  %2924 = vmatpush.bf16.msra.mxu3 %v6645_v62  ;;  %v8508_v46 = vld [vmem:[#allocation2 + $0x794] sm:$0xf]  ;;  %v9272_v48 = vadd.f32 %v2681_v43, %v9267_v59  ;;  %v6265_v58 = vor.u32 %v8444_v41, %v6262_v44 }
 0x151   :  { %v8536_v4 = vld [vmem:[#allocation2 + $0x86c] sm:$0xf0]  ;;  %v6518_v47 = vld [vmem:[#allocation2 + $0x7b0] sm:$0xf0] }
 0x152   :  { %v6868_v5 = vld [vmem:[#allocation2 + $0xa50] sm:$0xf]  ;;  %2975 = vmatpush.bf16.msrb.mxu2 %v5913_v60  ;;  %v6613_v12 = vor.u32 %v8536_v4, %v6612_v3  ;;  %2937 = vmatpush.bf16.msra.mxu1 %v6901_v1  ;;  %v8572_v50 = vld [vmem:[#allocation2 + $0x994] sm:$0xf]  ;;  %v6521_v60 = vor.u32 %v8508_v46, %v6518_v47 }
 0x153   :  { %v8600_v6 = vld [vmem:[#allocation2 + $0xa6c] sm:$0xf0]  ;;  %2963 = vmatpush.bf16.msra.mxu0 %v5625_v2  ;;  %v6774_v52 = vld [vmem:[#allocation2 + $0x9b0] sm:$0xf0] }
 0x154   :  { %v6580_v15 = vld [vmem:[#allocation2 + $0x810] sm:$0xf]  ;;  %v6869_v16 = vor.u32 %v8600_v6, %v6868_v5  ;;  %2925 = vmatpush.bf16.msra.mxu3 %v6613_v12  ;;  %v8636_v62 = vld [vmem:[#allocation2 + $0xb94] sm:$0xf]  ;;  %v6777_v1 = vor.u32 %v8572_v50, %v6774_v52  ;;  %v2720_v12 = vpop.f32.mrf.mxu0 }
 0x155   :  { %v8528_v18 = vld [vmem:[#allocation2 + $0x82c] sm:$0xf0]  ;;  %v7030_v63 = vld [vmem:[#allocation2 + $0xbb0] sm:$0xf0] }
 0x156   :  { %v6836_v19 = vld [vmem:[#allocation2 + $0xa10] sm:$0xf]  ;;  %2976 = vmatpush.bf16.msrb.mxu2 %v5881_v11  ;;  %v6581_v28 = vor.u32 %v8528_v18, %v6580_v15  ;;  %2938 = vmatpush.bf16.msra.mxu1 %v6869_v16  ;;  %v8436_v0 = vld [vmem:[#allocation2 + $0x554] sm:$0xf]  ;;  %v7033_v6 = vor.u32 %v8636_v62, %v7030_v63  ;;  %v2683_v15 = vpop.f32.mrf.mxu3  ;;  %v2696_v62 = vpop.f32.mrf.mxu1 }
 0x157   :  { %v8592_v20 = vld [vmem:[#allocation2 + $0xa2c] sm:$0xf0]  ;;  %2964 = vmatpush.bf16.msra.mxu0 %v5593_v17  ;;  %v6230_v2 = vld [vmem:[#allocation2 + $0x570] sm:$0xf0]  ;;  %v6012_v62 = vld [vmem:[#allocation2 + $0x398] sm:$0xf] }
 0x158   :  { %v6837_v32 = vor.u32 %v8592_v20, %v6836_v19  ;;  %2926 = vmatpush.bf16.msra.mxu3 %v6581_v28  ;;  %v8500_v59 = vld [vmem:[#allocation2 + $0x754] sm:$0xf]  ;;  %v6233_v8 = vor.u32 %v8436_v0, %v6230_v2 }
 0x159   :  { %v6486_v3 = vld [vmem:[#allocation2 + $0x770] sm:$0xf0] }
 0x15a   :  { %2977 = vmatpush.bf16.msrb.mxu2 %v5849_v61  ;;  %2939 = vmatpush.bf16.msra.mxu1 %v6837_v32  ;;  %v8564_v4 = vld [vmem:[#allocation2 + $0x954] sm:$0xf]  ;;  %v6489_v9 = vor.u32 %v8500_v59, %v6486_v3 }
 0x15b   :  { %2965 = vmatpush.bf16.msra.mxu0 %v5561_v33  ;;  %2927 = vmatmul.bf16.vlgmr.msra.gmra.mxu3 %v9221_v30  ;;  %v6742_v5 = vld [vmem:[#allocation2 + $0x970] sm:$0xf0]  ;;  %v2695_v33 = vadd.f32 %v2694_v23, %v525_v21 }
 0x15c   :  { %2984 = vmatpush.bf16.msrb.mxu3 %v6297_v37  ;;  %v8628_v10 = vld [vmem:[#allocation2 + $0xb54] sm:$0xf]  ;;  %v6745_v14 = vor.u32 %v8564_v4, %v6742_v5  ;;  %v2722_v41 = vpop.f32.mrf.mxu0 }
 0x15d   :  { %2940 = vmatmul.bf16.vlgmr.msra.gmra.mxu1 %v9223_v35  ;;  %v6998_v11 = vld [vmem:[#allocation2 + $0xb70] sm:$0xf0]  ;;  %v8393_v41 = vld [vmem:[#allocation2 + $0x3f4] sm:$0xf0] }
 0x15e   :  { %2997 = vmatpush.bf16.msrb.mxu1 %v6553_v38  ;;  %2978 = vmatpush.bf16.msrb.mxu2 %v5817_v49  ;;  %v8428_v13 = vld [vmem:[#allocation2 + $0x514] sm:$0xf]  ;;  %v7001_v22 = vor.u32 %v8628_v10, %v6998_v11  ;;  %v2707_v44 = vpop.f32.mrf.mxu3 }
 0x15f   :  { %3010 = vmatpush.bf16.msrb.mxu0 %v6809_v42  ;;  %v6198_v16 = vld [vmem:[#allocation2 + $0x530] sm:$0xf0]  ;;  %v2708_v50 = vadd.f32 %v2707_v44, %v2695_v33 }
 0x160   :  { %2966 = vmatmul.bf16.vlgmr.msra.gmra.mxu0 %v9195_v55  ;;  %2985 = vmatpush.bf16.msrb.mxu3 %v6265_v58  ;;  %v8492_v17 = vld [vmem:[#allocation2 + $0x714] sm:$0xf]  ;;  %v6201_v24 = vor.u32 %v8428_v13, %v6198_v16  ;;  %v2733_v58 = vpop.f32.mrf.mxu2 }
 0x161   :  { %v6454_v18 = vld [vmem:[#allocation2 + $0x730] sm:$0xf0]  ;;  %2979 = vmatmul.bf16.vlgmr.msrb.gmra.mxu2 %v9204_v7 }
 0x162   :  { %3023 = vmatpush.bf16.msra.mxu2 %v7065_v54  ;;  %2998 = vmatpush.bf16.msrb.mxu1 %v6521_v60  ;;  %v8556_v19 = vld [vmem:[#allocation2 + $0x914] sm:$0xf]  ;;  %v6457_v25 = vor.u32 %v8492_v17, %v6454_v18 }
 0x163   :  { %3011 = vmatpush.bf16.msrb.mxu0 %v6777_v1  ;;  %v6710_v20 = vld [vmem:[#allocation2 + $0x930] sm:$0xf0]  ;;  %v2721_v1 = vadd.f32 %v2720_v12, %v2708_v50 }
 0x164   :  { %2986 = vmatpush.bf16.msrb.mxu3 %v6233_v8  ;;  %v8620_v26 = vld [vmem:[#allocation2 + $0xb14] sm:$0xf]  ;;  %v6713_v28 = vor.u32 %v8556_v19, %v6710_v20  ;;  %v9281_v20 = vpop.f32.mrf.mxu0 }
 0x165   :  { %v6966_v27 = vld [vmem:[#allocation2 + $0xb30] sm:$0xf0] }
 0x166   :  { %3024 = vmatpush.bf16.msra.mxu2 %v7033_v6  ;;  %2999 = vmatpush.bf16.msrb.mxu1 %v6489_v9  ;;  %v8420_v61 = vld [vmem:[#allocation2 + $0x4d4] sm:$0xf]  ;;  %v6969_v56 = vor.u32 %v8620_v26, %v6966_v27  ;;  %v9279_v9 = vadd.f32 %v2733_v58, %v2721_v1  ;;  %v5788_v26 = vld [vmem:[#allocation2 + $0x1d8] sm:$0xf] }
 0x167   :  { %3012 = vmatpush.bf16.msrb.mxu0 %v6745_v14  ;;  %v6166_v29 = vld [vmem:[#allocation2 + $0x4f0] sm:$0xf0]  ;;  %v8329_v27 = vld [vmem:[#allocation2 + $0x1f4] sm:$0xf0] }
 0x168   :  { %v8484_v31 = vld [vmem:[#allocation2 + $0x6d4] sm:$0xf]  ;;  %2987 = vmatpush.bf16.msrb.mxu3 %v6201_v24  ;;  %v6169_v37 = vor.u32 %v8420_v61, %v6166_v29  ;;  %v6300_v61 = vld [vmem:[#allocation2 + $0x5d8] sm:$0xf] }
 0x169   :  { %v6422_v32 = vld [vmem:[#allocation2 + $0x6f0] sm:$0xf0]  ;;  %v8385_v1 = vld [vmem:[#allocation2 + $0x3b4] sm:$0xf0] }
 0x16a   :  { %v8548_v34 = vld [vmem:[#allocation2 + $0x8d4] sm:$0xf]  ;;  %3025 = vmatpush.bf16.msra.mxu2 %v7001_v22  ;;  %3000 = vmatpush.bf16.msrb.mxu1 %v6457_v25  ;;  %v6425_v38 = vor.u32 %v8484_v31, %v6422_v32  ;;  %v2709_v25 = vpop.f32.mrf.mxu3  ;;  %v8457_v31 = vld [vmem:[#allocation2 + $0x5f4] sm:$0xf0] }
 0x16b   :  { %v6678_v36 = vld [vmem:[#allocation2 + $0x8f0] sm:$0xf0]  ;;  %3013 = vmatpush.bf16.msrb.mxu0 %v6713_v28  ;;  %v2735_v28 = vpop.f32.mrf.mxu2  ;;  %v6301_v44 = vor.u32 %v8457_v31, %v6300_v61  ;;  %v8497_v31 = vld [vmem:[#allocation2 + $0x734] sm:$0xf0] }
 0x16c   :  { %v8612_v39 = vld [vmem:[#allocation2 + $0xad4] sm:$0xf]  ;;  %v6681_v43 = vor.u32 %v8548_v34, %v6678_v36  ;;  %2988 = vmatpush.bf16.msrb.mxu3 %v6169_v37  ;;  %v8369_v28 = vld [vmem:[#allocation2 + $0x334] sm:$0xf0] }
 0x16d   :  { %v6934_v40 = vld [vmem:[#allocation2 + $0xaf0] sm:$0xf0] }
 0x16e   :  { %v8412_v42 = vld [vmem:[#allocation2 + $0x494] sm:$0xf]  ;;  %3026 = vmatpush.bf16.msra.mxu2 %v6969_v56  ;;  %v6937_v60 = vor.u32 %v8612_v39, %v6934_v40  ;;  %3001 = vmatpush.bf16.msrb.mxu1 %v6425_v38  ;;  %v6044_v38 = vld [vmem:[#allocation2 + $0x3d8] sm:$0xf]  ;;  %v5789_v40 = vor.u32 %v8329_v27, %v5788_v26 }
 0x16f   :  { %v6134_v46 = vld [vmem:[#allocation2 + $0x4b0] sm:$0xf0]  ;;  %3014 = vmatpush.bf16.msrb.mxu0 %v6681_v43  ;;  %v8521_v43 = vld [vmem:[#allocation2 + $0x7f4] sm:$0xf0]  ;;  %v6045_v58 = vor.u32 %v8393_v41, %v6044_v38  ;;  %v9288_v41 = vld [vmem:[#allocation4] sm:$0xff] }
 0x170   :  { %v8476_v47 = vld [vmem:[#allocation2 + $0x694] sm:$0xf]  ;;  %v6137_v63 = vor.u32 %v8412_v42, %v6134_v46  ;;  %v6556_v42 = vld [vmem:[#allocation2 + $0x7d8] sm:$0xf] }
 0x171   :  { %v6390_v49 = vld [vmem:[#allocation2 + $0x6b0] sm:$0xf0]  ;;  %v5948_v27 = vld [vmem:[#allocation2 + $0x318] sm:$0xf] }
 0x172   :  { %v8540_v52 = vld [vmem:[#allocation2 + $0x894] sm:$0xf]  ;;  %v6393_v0 = vor.u32 %v8476_v47, %v6390_v49  ;;  %3027 = vmatpush.bf16.msra.mxu2 %v6937_v60  ;;  %2989 = vmatpush.bf16.msrb.mxu3 %v6137_v63  ;;  %v5756_v47 = vld [vmem:[#allocation2 + $0x198] sm:$0xf]  ;;  %v6557_v60 = vor.u32 %v8521_v43, %v6556_v42  ;;  %v2774_v63 = vpop.f32.mrf.mxu0  ;;  %v526_v42 = vperm.slane %v9288_v41, 3 }
 0x173   :  { %v6646_v54 = vld [vmem:[#allocation2 + $0x8b0] sm:$0xf0]  ;;  %v8321_v49 = vld [vmem:[#allocation2 + $0x1b4] sm:$0xf0] }
 0x174   :  { %v8604_v2 = vld [vmem:[#allocation2 + $0xa94] sm:$0xf]  ;;  %v6649_v4 = vor.u32 %v8540_v52, %v6646_v54  ;;  %3002 = vmatpush.bf16.msrb.mxu1 %v6393_v0  ;;  %v6268_v52 = vld [vmem:[#allocation2 + $0x598] sm:$0xf]  ;;  %v5757_v0 = vor.u32 %v8321_v49, %v5756_v47  ;;  %v2785_v63 = vpop.f32.mrf.mxu2 }
 0x175   :  { %v6902_v59 = vld [vmem:[#allocation2 + $0xab0] sm:$0xf0]  ;;  %v8449_v54 = vld [vmem:[#allocation2 + $0x5b4] sm:$0xf0] }
 0x176   :  { %v8404_v3 = vld [vmem:[#allocation2 + $0x454] sm:$0xf]  ;;  %v6905_v13 = vor.u32 %v8604_v2, %v6902_v59  ;;  %3015 = vmatpush.bf16.msrb.mxu0 %v6649_v4  ;;  %v6524_v2 = vld [vmem:[#allocation2 + $0x798] sm:$0xf] }
 0x177   :  { %v6102_v5 = vld [vmem:[#allocation2 + $0x470] sm:$0xf0]  ;;  %v8513_v59 = vld [vmem:[#allocation2 + $0x7b4] sm:$0xf0] }
 0x178   :  { %v8468_v6 = vld [vmem:[#allocation2 + $0x654] sm:$0xf]  ;;  %v6105_v16 = vor.u32 %v8404_v3, %v6102_v5  ;;  %3028 = vmatpush.bf16.msra.mxu2 %v6905_v13  ;;  %v6269_v3 = vor.u32 %v8449_v54, %v6268_v52  ;;  %v5724_v4 = vld [vmem:[#allocation2 + $0x158] sm:$0xf]  ;;  %v2759_v54 = vpop.f32.mrf.mxu3 }
 0x179   :  { %v6358_v8 = vld [vmem:[#allocation2 + $0x670] sm:$0xf0]  ;;  %v8313_v5 = vld [vmem:[#allocation2 + $0x174] sm:$0xf0] }
 0x17a   :  { %v8532_v10 = vld [vmem:[#allocation2 + $0x854] sm:$0xf]  ;;  %v6361_v12 = vor.u32 %v8468_v6, %v6358_v8  ;;  %2990 = vmatpush.bf16.msrb.mxu3 %v6105_v16  ;;  %v6236_v6 = vld [vmem:[#allocation2 + $0x558] sm:$0xf] }
 0x17b   :  { %v6614_v11 = vld [vmem:[#allocation2 + $0x870] sm:$0xf0]  ;;  %v8441_v8 = vld [vmem:[#allocation2 + $0x574] sm:$0xf0] }
 0x17c   :  { %v8596_v14 = vld [vmem:[#allocation2 + $0xa54] sm:$0xf]  ;;  %v6617_v21 = vor.u32 %v8532_v10, %v6614_v11  ;;  %3003 = vmatpush.bf16.msrb.mxu1 %v6361_v12  ;;  %v6013_v10 = vor.u32 %v8385_v1, %v6012_v62  ;;  %v6525_v11 = vor.u32 %v8513_v59, %v6524_v2  ;;  %v5980_v13 = vld [vmem:[#allocation2 + $0x358] sm:$0xf]  ;;  %v2786_v59 = vadd.f32 %v2785_v63, %v526_v42 }
 0x17d   :  { %v6870_v15 = vld [vmem:[#allocation2 + $0xa70] sm:$0xf0]  ;;  %v8377_v16 = vld [vmem:[#allocation2 + $0x374] sm:$0xf0] }
 0x17e   :  { %v8396_v17 = vld [vmem:[#allocation2 + $0x414] sm:$0xf]  ;;  %v6873_v29 = vor.u32 %v8596_v14, %v6870_v15  ;;  %3016 = vmatpush.bf16.msrb.mxu0 %v6617_v21  ;;  %v2746_v14 = vpop.f32.mrf.mxu1  ;;  %v5725_v15 = vor.u32 %v8313_v5, %v5724_v4  ;;  %v6492_v12 = vld [vmem:[#allocation2 + $0x758] sm:$0xf]  ;;  %v5981_v25 = vor.u32 %v8377_v16, %v5980_v13 }
 0x17f   :  { %v6070_v18 = vld [vmem:[#allocation2 + $0x430] sm:$0xf0]  ;;  %v5692_v21 = vld [vmem:[#allocation2 + $0x118] sm:$0xf] }
 0x180   :  { %v8460_v19 = vld [vmem:[#allocation2 + $0x614] sm:$0xf]  ;;  %v6073_v34 = vor.u32 %v8396_v17, %v6070_v18  ;;  %3029 = vmatpush.bf16.msra.mxu2 %v6873_v29  ;;  %v8505_v17 = vld [vmem:[#allocation2 + $0x774] sm:$0xf0]  ;;  %v2747_v18 = vadd.f32 %v2746_v14, %v9279_v9 }
 0x181   :  { %v6326_v22 = vld [vmem:[#allocation2 + $0x630] sm:$0xf0]  ;;  %v6493_v26 = vor.u32 %v8505_v17, %v6492_v12  ;;  %v6460_v29 = vld [vmem:[#allocation2 + $0x718] sm:$0xf] }
 0x182   :  { %v8524_v23 = vld [vmem:[#allocation2 + $0x814] sm:$0xf]  ;;  %v6329_v36 = vor.u32 %v8460_v19, %v6326_v22  ;;  %2991 = vmatpush.bf16.msrb.mxu3 %v6073_v34  ;;  %v6237_v19 = vor.u32 %v8441_v8, %v6236_v6  ;;  %v8305_v22 = vld [vmem:[#allocation2 + $0x134] sm:$0xf0]  ;;  %v2798_v34 = vpop.f32.mrf.mxu0  ;;  %v6461_v38 = vor.u32 %v8497_v31, %v6460_v29  ;;  %v2761_v31 = vpop.f32.mrf.mxu3 }
 0x183   :  { %v6582_v24 = vld [vmem:[#allocation2 + $0x830] sm:$0xf0]  ;;  %v5693_v61 = vor.u32 %v8305_v22, %v5692_v21  ;;  %v8289_v52 = vld [vmem:[#allocation2 + $0xb4] sm:$0xf0]  ;;  %v9294_v14 = vadd.f32 %v2798_v34, %v2786_v59 }
 0x184   :  { %v8652_v32 = vld [vmem:[#allocation2 + $0xc14] sm:$0xf]  ;;  %v6585_v39 = vor.u32 %v8524_v23, %v6582_v24  ;;  %3004 = vmatpush.bf16.msrb.mxu1 %v6329_v36  ;;  %v6204_v23 = vld [vmem:[#allocation2 + $0x518] sm:$0xf] }
 0x185   :  { %v7094_v33 = vld [vmem:[#allocation2 + $0xc30] sm:$0xf0]  ;;  %2992 = vmatmul.bf16.vlgmr.msrb.gmra.mxu3 %v9193_v51  ;;  %v8433_v24 = vld [vmem:[#allocation2 + $0x534] sm:$0xf0] }
 0x186   :  { %v8588_v56 = vld [vmem:[#allocation2 + $0xa14] sm:$0xf]  ;;  %v7097_v46 = vor.u32 %v8652_v32, %v7094_v33  ;;  %3017 = vmatpush.bf16.msrb.mxu0 %v6585_v39  ;;  %v6205_v9 = vor.u32 %v8433_v24, %v6204_v23  ;;  %v5660_v32 = vld [vmem:[#allocation2 + $0xd8] sm:$0xf]  ;;  %v2748_v47 = vpop.f32.mrf.mxu1 }
 0x187   :  { %v6838_v37 = vld [vmem:[#allocation2 + $0xa30] sm:$0xf0]  ;;  %3005 = vmatmul.bf16.vlgmr.msrb.gmra.mxu1 %v9197_v57  ;;  %v8297_v33 = vld [vmem:[#allocation2 + $0xf4] sm:$0xf0]  ;;  %v8325_v47 = vld [vmem:[#allocation2 + $0x1dc] sm:$0xf] }
 0x188   :  { %v6841_v50 = vor.u32 %v8588_v56, %v6838_v37  ;;  %3049 = vmatpush.bf16.msra.mxu1 %v5789_v40  ;;  %3043 = vmatpush.bf16.msra.mxu3 %v7097_v46  ;;  %v6172_v36 = vld [vmem:[#allocation2 + $0x4d8] sm:$0xf]  ;;  %v5949_v37 = vor.u32 %v8369_v28, %v5948_v27  ;;  %v5661_v43 = vor.u32 %v8297_v33, %v5660_v32 }
 0x189   :  { %3018 = vmatmul.bf16.vlgmr.msrb.gmra.mxu0 %v9221_v30  ;;  %v8425_v56 = vld [vmem:[#allocation2 + $0x4f4] sm:$0xf0] }
 0x18a   :  { %3075 = vmatpush.bf16.msra.mxu0 %v6301_v44  ;;  %3030 = vmatpush.bf16.msra.mxu2 %v6841_v50  ;;  %v5916_v39 = vld [vmem:[#allocation2 + $0x2d8] sm:$0xf]  ;;  %v6173_v49 = vor.u32 %v8425_v56, %v6172_v36 }
 0x18b   :  { %v8361_v40 = vld [vmem:[#allocation2 + $0x2f4] sm:$0xf0] }
 0x18c   :  { %3062 = vmatpush.bf16.msrb.mxu3 %v6045_v58  ;;  %3050 = vmatpush.bf16.msra.mxu1 %v5757_v0  ;;  %v6428_v44 = vld [vmem:[#allocation2 + $0x6d8] sm:$0xf]  ;;  %v5917_v58 = vor.u32 %v8361_v40, %v5916_v39  ;;  %v2760_v0 = vadd.f32 %v2759_v54, %v2747_v18  ;;  %v6046_v54 = vld [vmem:[#allocation2 + $0x3f8] sm:$0xf0] }
 0x18d   :  { %3031 = vmatmul.bf16.vlgmr.msra.gmra.mxu2 %v9223_v35  ;;  %v8489_v46 = vld [vmem:[#allocation2 + $0x6f4] sm:$0xf0] }
 0x18e   :  { %3088 = vmatpush.bf16.msrb.mxu2 %v6557_v60  ;;  %3076 = vmatpush.bf16.msra.mxu0 %v6269_v3  ;;  %v5628_v50 = vld [vmem:[#allocation2 + $0x98] sm:$0xf]  ;;  %v6429_v1 = vor.u32 %v8489_v46, %v6428_v44  ;;  %v9292_v8 = vadd.f32 %v9281_v20, %v2760_v0 }
 0x18f   :  { %v6140_v60 = vld [vmem:[#allocation2 + $0x498] sm:$0xf]  ;;  %v5629_v3 = vor.u32 %v8289_v52, %v5628_v50  ;;  %v5790_v50 = vld [vmem:[#allocation2 + $0x1f8] sm:$0xf0] }
 0x190   :  { %3063 = vmatpush.bf16.msrb.mxu3 %v6013_v10  ;;  %3051 = vmatpush.bf16.msra.mxu1 %v5725_v15  ;;  %v8417_v62 = vld [vmem:[#allocation2 + $0x4b4] sm:$0xf0]  ;;  %v2800_v15 = vpop.f32.mrf.mxu0  ;;  %v8389_v52 = vld [vmem:[#allocation2 + $0x3dc] sm:$0xf] }
 0x191   :  { %v5884_v2 = vld [vmem:[#allocation2 + $0x298] sm:$0xf]  ;;  %v6141_v10 = vor.u32 %v8417_v62, %v6140_v60 }
 0x192   :  { %3089 = vmatpush.bf16.msrb.mxu2 %v6525_v11  ;;  %3077 = vmatpush.bf16.msra.mxu0 %v6237_v19  ;;  %v8353_v4 = vld [vmem:[#allocation2 + $0x2b4] sm:$0xf0] }
 0x193   :  { %v6396_v5 = vld [vmem:[#allocation2 + $0x698] sm:$0xf]  ;;  %v5885_v17 = vor.u32 %v8353_v4, %v5884_v2  ;;  %v6049_v2 = vor.u32 %v8389_v52, %v6046_v54  ;;  %v8317_v4 = vld [vmem:[#allocation2 + $0x19c] sm:$0xf] }
 0x194   :  { %3064 = vmatpush.bf16.msrb.mxu3 %v5981_v25  ;;  %3052 = vmatpush.bf16.msra.mxu1 %v5693_v61  ;;  %v8481_v6 = vld [vmem:[#allocation2 + $0x6b4] sm:$0xf0]  ;;  %v5662_v52 = vld [vmem:[#allocation2 + $0xf8] sm:$0xf0] }
 0x195   :  { %v5596_v11 = vld [vmem:[#allocation2 + $0x58] sm:$0xf]  ;;  %7111 = vmatmul.msk.bf16.vlgmr.msra.gmra.mxu3 %vm2499_vm0, %v9211_v45  ;;  %v6397_v18 = vor.u32 %v8481_v6, %v6396_v5  ;;  %v5758_v6 = vld [vmem:[#allocation2 + $0x1b8] sm:$0xf0] }
 0x196   :  { %3090 = vmatpush.bf16.msrb.mxu2 %v6493_v26  ;;  %3078 = vmatpush.bf16.msra.mxu0 %v6205_v9  ;;  %v8281_v13 = vld [vmem:[#allocation2 + $0x74] sm:$0xf0]  ;;  %v2787_v9 = vpop.f32.mrf.mxu2  ;;  %v8357_v54 = vld [vmem:[#allocation2 + $0x2dc] sm:$0xf] }
 0x197   :  { %v6108_v16 = vld [vmem:[#allocation2 + $0x458] sm:$0xf]  ;;  %v5597_v21 = vor.u32 %v8281_v13, %v5596_v11  ;;  %v6014_v11 = vld [vmem:[#allocation2 + $0x3b8] sm:$0xf0] }
 0x198   :  { %3065 = vmatpush.bf16.msrb.mxu3 %v5949_v37  ;;  %3053 = vmatpush.bf16.msra.mxu1 %v5661_v43  ;;  %v8409_v12 = vld [vmem:[#allocation2 + $0x474] sm:$0xf0] }
 0x199   :  { %v5852_v19 = vld [vmem:[#allocation2 + $0x258] sm:$0xf]  ;;  %v6109_v24 = vor.u32 %v8409_v12, %v6108_v16  ;;  %v5761_v12 = vor.u32 %v8317_v4, %v5758_v6  ;;  %v8285_v6 = vld [vmem:[#allocation2 + $0x9c] sm:$0xf] }
 0x19a   :  { %3091 = vmatpush.bf16.msrb.mxu2 %v6461_v38  ;;  %3079 = vmatpush.bf16.msra.mxu0 %v6173_v49  ;;  %v8345_v20 = vld [vmem:[#allocation2 + $0x274] sm:$0xf0] }
 0x19b   :  { %v6364_v22 = vld [vmem:[#allocation2 + $0x658] sm:$0xf]  ;;  %v5853_v32 = vor.u32 %v8345_v20, %v5852_v19  ;;  %v2811_v20 = vpop.f32.mrf.mxu1 }
 0x19c   :  { %3066 = vmatpush.bf16.msrb.mxu3 %v5917_v58  ;;  %3054 = vmatpush.bf16.msra.mxu1 %v5629_v3  ;;  %v8473_v23 = vld [vmem:[#allocation2 + $0x674] sm:$0xf0] }
 0x19d   :  { %v5564_v25 = vld [vmem:[#allocation2 + $0x18] sm:$0xf]  ;;  %v6365_v33 = vor.u32 %v8473_v23, %v6364_v22  ;;  %v5726_v23 = vld [vmem:[#allocation2 + $0x178] sm:$0xf0] }
 0x19e   :  { %3092 = vmatpush.bf16.msrb.mxu2 %v6429_v1  ;;  %3080 = vmatpush.bf16.msra.mxu0 %v6141_v10  ;;  %v8273_v26 = vld [vmem:[#allocation2 + $0x34] sm:$0xf0]  ;;  %v5793_v1 = vor.u32 %v8325_v47, %v5790_v50  ;;  %v8381_v10 = vld [vmem:[#allocation2 + $0x39c] sm:$0xf] }
 0x19f   :  { %v6076_v27 = vld [vmem:[#allocation2 + $0x418] sm:$0xf]  ;;  %v5565_v37 = vor.u32 %v8273_v26, %v5564_v25  ;;  %v5982_v25 = vld [vmem:[#allocation2 + $0x378] sm:$0xf0]  ;;  %v2812_v26 = vadd.f32 %v2811_v20, %v9294_v14 }
 0x1a0   :  { %v8401_v61 = vld [vmem:[#allocation2 + $0x434] sm:$0xf0]  ;;  %3067 = vmatpush.bf16.msrb.mxu3 %v5885_v17  ;;  %3055 = vmatpush.bf16.msra.mxu1 %v5597_v21  ;;  %v6017_v17 = vor.u32 %v8381_v10, %v6014_v11  ;;  %v8309_v21 = vld [vmem:[#allocation2 + $0x15c] sm:$0xf] }
 0x1a1   :  { %v6812_v28 = vld [vmem:[#allocation2 + $0x9d8] sm:$0xf]  ;;  %v6077_v42 = vor.u32 %v8401_v61, %v6076_v27  ;;  %v5950_v14 = vld [vmem:[#allocation2 + $0x338] sm:$0xf0] }
 0x1a2   :  { %v8585_v29 = vld [vmem:[#allocation2 + $0x9f4] sm:$0xf0]  ;;  %3093 = vmatpush.bf16.msrb.mxu2 %v6397_v18  ;;  %3081 = vmatpush.bf16.msra.mxu0 %v6109_v24  ;;  %v8373_v24 = vld [vmem:[#allocation2 + $0x35c] sm:$0xf] }
 0x1a3   :  { %v5820_v34 = vld [vmem:[#allocation2 + $0x218] sm:$0xf]  ;;  %v6813_v43 = vor.u32 %v8585_v29, %v6812_v28  ;;  %v5729_v29 = vor.u32 %v8309_v21, %v5726_v23  ;;  %v5985_v31 = vor.u32 %v8373_v24, %v5982_v25  ;;  %v8293_v47 = vld [vmem:[#allocation2 + $0xdc] sm:$0xf] }
 0x1a4   :  { %v7100_v36 = vld [vmem:[#allocation2 + $0xc18] sm:$0xf]  ;;  %3068 = vmatpush.bf16.msrb.mxu3 %v5853_v32  ;;  %3056 = vmatpush.bf16.msra.mxu1 %v5565_v37  ;;  %v5630_v11 = vld [vmem:[#allocation2 + $0xb8] sm:$0xf0] }
 0x1a5   :  { %v8657_v56 = vld [vmem:[#allocation2 + $0xc34] sm:$0xf0]  ;;  %v5633_v20 = vor.u32 %v8285_v6, %v5630_v11  ;;  %v8277_v25 = vld [vmem:[#allocation2 + $0x5c] sm:$0xf] }
 0x1a6   :  { %v8337_v38 = vld [vmem:[#allocation2 + $0x234] sm:$0xf0]  ;;  %v7101_v49 = vor.u32 %v8657_v56, %v7100_v36  ;;  %3094 = vmatpush.bf16.msrb.mxu2 %v6365_v33  ;;  %3082 = vmatpush.bf16.msra.mxu0 %v6077_v42  ;;  %v8301_v33 = vld [vmem:[#allocation2 + $0x11c] sm:$0xf] }
 0x1a7   :  { %v6332_v39 = vld [vmem:[#allocation2 + $0x618] sm:$0xf]  ;;  %v5821_v58 = vor.u32 %v8337_v38, %v5820_v34  ;;  %3057 = vmatmul.bf16.vlgmr.msra.gmra.mxu1 %v9195_v55  ;;  %v5694_v36 = vld [vmem:[#allocation2 + $0x138] sm:$0xf0] }
 0x1a8   :  { %v8465_v40 = vld [vmem:[#allocation2 + $0x634] sm:$0xf0]  ;;  %3101 = vmatpush.bf16.msrb.mxu1 %v6813_v43  ;;  %v8365_v56 = vld [vmem:[#allocation2 + $0x31c] sm:$0xf]  ;;  %v5697_v42 = vor.u32 %v8301_v33, %v5694_v36 }
 0x1a9   :  { %v7068_v44 = vld [vmem:[#allocation2 + $0xbd8] sm:$0xf]  ;;  %v6333_v60 = vor.u32 %v8465_v40, %v6332_v39  ;;  %3069 = vmatpush.bf16.msrb.mxu3 %v5821_v58  ;;  %3083 = vmatmul.bf16.vlgmr.msra.gmra.mxu0 %v9193_v51  ;;  %v2850_v39 = vpop.f32.mrf.mxu0  ;;  %v5953_v43 = vor.u32 %v8365_v56, %v5950_v14  ;;  %v5918_v58 = vld [vmem:[#allocation2 + $0x2f8] sm:$0xf0] }
 0x1aa   :  { %v8649_v46 = vld [vmem:[#allocation2 + $0xbf4] sm:$0xf0]  ;;  %3134 = vmatpush.bf16.msrb.mxu0 %v7101_v49  ;;  %v2813_v49 = vpop.f32.mrf.mxu1  ;;  %v6302_v36 = vld [vmem:[#allocation2 + $0x5f8] sm:$0xf0] }
 0x1ab   :  { %v6780_v62 = vld [vmem:[#allocation2 + $0x998] sm:$0xf]  ;;  %v7069_v0 = vor.u32 %v8649_v46, %v7068_v44  ;;  %3095 = vmatpush.bf16.msrb.mxu2 %v6333_v60  ;;  %v6526_v11 = vld [vmem:[#allocation2 + $0x7b8] sm:$0xf0] }
 0x1ac   :  { %v8577_v63 = vld [vmem:[#allocation2 + $0x9b4] sm:$0xf0]  ;;  %3070 = vmatmul.bf16.vlgmr.msrb.gmra.mxu3 %v9204_v7 }
 0x1ad   :  { %v7036_v59 = vld [vmem:[#allocation2 + $0xb98] sm:$0xf]  ;;  %v6781_v5 = vor.u32 %v8577_v63, %v6780_v62  ;;  %3114 = vmatpush.bf16.msra.mxu3 %v7069_v0  ;;  %v2824_v63 = vpop.f32.mrf.mxu3  ;;  %v2837_v0 = vpop.f32.mrf.mxu2 }
 0x1ae   :  { %v8641_v3 = vld [vmem:[#allocation2 + $0xbb4] sm:$0xf0]  ;;  %3153 = vmatpush.bf16.msra.mxu0 %v6049_v2  ;;  %3096 = vmatmul.bf16.vlgmr.msrb.gmra.mxu2 %v9197_v57  ;;  %v2825_v2 = vadd.f32 %v2824_v63, %v2812_v26  ;;  %v7070_v63 = vld [vmem:[#allocation2 + $0xbf8] sm:$0xf0] }
 0x1af   :  { %v6748_v13 = vld [vmem:[#allocation2 + $0x958] sm:$0xf]  ;;  %v7037_v16 = vor.u32 %v8641_v3, %v7036_v59  ;;  %3140 = vmatpush.bf16.msra.mxu2 %v5793_v1  ;;  %3102 = vmatpush.bf16.msrb.mxu1 %v6781_v5  ;;  %v5665_v59 = vor.u32 %v8293_v47, %v5662_v52  ;;  %v5921_v3 = vor.u32 %v8357_v54, %v5918_v58  ;;  %v5822_v47 = vld [vmem:[#allocation2 + $0x238] sm:$0xf0] }
 0x1b0   :  { %v8569_v15 = vld [vmem:[#allocation2 + $0x974] sm:$0xf0]  ;;  %v6558_v52 = vld [vmem:[#allocation2 + $0x7f8] sm:$0xf0] }
 0x1b1   :  { %v7004_v18 = vld [vmem:[#allocation2 + $0xb58] sm:$0xf]  ;;  %v6749_v22 = vor.u32 %v8569_v15, %v6748_v13  ;;  %3115 = vmatpush.bf16.msra.mxu3 %v7037_v16  ;;  %v8349_v13 = vld [vmem:[#allocation2 + $0x29c] sm:$0xf]  ;;  %v2838_v16 = vadd.f32 %v2837_v0, %v2825_v2 }
 0x1b2   :  { %v8633_v19 = vld [vmem:[#allocation2 + $0xb74] sm:$0xf0]  ;;  %3154 = vmatpush.bf16.msra.mxu0 %v6017_v17  ;;  %v5886_v15 = vld [vmem:[#allocation2 + $0x2b8] sm:$0xf0]  ;;  %v2863_v26 = vpop.f32.mrf.mxu1 }
 0x1b3   :  { %v6716_v27 = vld [vmem:[#allocation2 + $0x918] sm:$0xf]  ;;  %v7005_v28 = vor.u32 %v8633_v19, %v7004_v18  ;;  %3141 = vmatpush.bf16.msra.mxu2 %v5761_v12  ;;  %3103 = vmatpush.bf16.msrb.mxu1 %v6749_v22  ;;  %v2852_v18 = vpop.f32.mrf.mxu0  ;;  %v2851_v21 = vadd.f32 %v2850_v39, %v2838_v16  ;;  %v5889_v22 = vor.u32 %v8349_v13, %v5886_v15  ;;  %v8581_v54 = vld [vmem:[#allocation2 + $0x9dc] sm:$0xf] }
 0x1b4   :  { %v8561_v61 = vld [vmem:[#allocation2 + $0x934] sm:$0xf0]  ;;  %v6270_v2 = vld [vmem:[#allocation2 + $0x5b8] sm:$0xf0] }
 0x1b5   :  { %v6972_v9 = vld [vmem:[#allocation2 + $0xb18] sm:$0xf]  ;;  %v6717_v34 = vor.u32 %v8561_v61, %v6716_v27  ;;  %3116 = vmatpush.bf16.msra.mxu3 %v7005_v28  ;;  %v5598_v61 = vld [vmem:[#allocation2 + $0x78] sm:$0xf0]  ;;  %v2839_v56 = vpop.f32.mrf.mxu2  ;;  %v2826_v14 = vpop.f32.mrf.mxu3 }
 0x1b6   :  { %v8625_v32 = vld [vmem:[#allocation2 + $0xb34] sm:$0xf0]  ;;  %3155 = vmatpush.bf16.msra.mxu0 %v5985_v31  ;;  %v8341_v28 = vld [vmem:[#allocation2 + $0x25c] sm:$0xf]  ;;  %v9305_v31 = vadd.f32 %v2863_v26, %v2851_v21 }
 0x1b7   :  { %v6684_v37 = vld [vmem:[#allocation2 + $0x8d8] sm:$0xf]  ;;  %v6973_v40 = vor.u32 %v8625_v32, %v6972_v9  ;;  %3142 = vmatpush.bf16.msra.mxu2 %v5729_v29  ;;  %3104 = vmatpush.bf16.msrb.mxu1 %v6717_v34  ;;  %v5854_v29 = vld [vmem:[#allocation2 + $0x278] sm:$0xf0] }
 0x1b8   :  { %v8553_v38 = vld [vmem:[#allocation2 + $0x8f4] sm:$0xf0]  ;;  %v8453_v34 = vld [vmem:[#allocation2 + $0x5dc] sm:$0xf] }
 0x1b9   :  { %v6940_v44 = vld [vmem:[#allocation2 + $0xad8] sm:$0xf]  ;;  %v6685_v50 = vor.u32 %v8553_v38, %v6684_v37  ;;  %3117 = vmatpush.bf16.msra.mxu3 %v6973_v40  ;;  %7112 = vmatmul.msk.bf16.vlgmr.msrb.gmra.mxu0 %vm2499_vm0, %v9211_v45  ;;  %v5601_v37 = vor.u32 %v8277_v25, %v5598_v61  ;;  %v5857_v38 = vor.u32 %v8341_v28, %v5854_v29  ;;  %v8573_v13 = vld [vmem:[#allocation2 + $0x99c] sm:$0xf] }
 0x1ba   :  { %v8617_v46 = vld [vmem:[#allocation2 + $0xaf4] sm:$0xf0]  ;;  %3156 = vmatpush.bf16.msra.mxu0 %v5953_v43  ;;  %v6305_v49 = vor.u32 %v8453_v34, %v6302_v36  ;;  %v6782_v16 = vld [vmem:[#allocation2 + $0x9b8] sm:$0xf0] }
 0x1bb   :  { %v6652_v60 = vld [vmem:[#allocation2 + $0x898] sm:$0xf]  ;;  %v6941_v1 = vor.u32 %v8617_v46, %v6940_v44  ;;  %3143 = vmatpush.bf16.msra.mxu2 %v5697_v42  ;;  %3105 = vmatpush.bf16.msrb.mxu1 %v6685_v50  ;;  %v8269_v42 = vld [vmem:[#allocation2 + $0x1c] sm:$0xf] }
 0x1bc   :  { %v8545_v62 = vld [vmem:[#allocation2 + $0x8b4] sm:$0xf0]  ;;  %v5566_v44 = vld [vmem:[#allocation2 + $0x38] sm:$0xf0] }
 0x1bd   :  { %v6908_v4 = vld [vmem:[#allocation2 + $0xa98] sm:$0xf]  ;;  %v6653_v10 = vor.u32 %v8545_v62, %v6652_v60  ;;  %3118 = vmatpush.bf16.msra.mxu3 %v6941_v1  ;;  %v8333_v46 = vld [vmem:[#allocation2 + $0x21c] sm:$0xf]  ;;  %v5569_v0 = vor.u32 %v8269_v42, %v5566_v44 }
 0x1be   :  { %v8609_v5 = vld [vmem:[#allocation2 + $0xab4] sm:$0xf0]  ;;  %3157 = vmatpush.bf16.msra.mxu0 %v5921_v3  ;;  %v8517_v50 = vld [vmem:[#allocation2 + $0x7dc] sm:$0xf] }
 0x1bf   :  { %v6620_v12 = vld [vmem:[#allocation2 + $0x858] sm:$0xf]  ;;  %v6909_v19 = vor.u32 %v8609_v5, %v6908_v4  ;;  %3144 = vmatpush.bf16.msra.mxu2 %v5665_v59  ;;  %3106 = vmatpush.bf16.msrb.mxu1 %v6653_v10  ;;  %v6814_v60 = vld [vmem:[#allocation2 + $0x9f8] sm:$0xf0]  ;;  %v5825_v59 = vor.u32 %v8333_v46, %v5822_v47  ;;  %v6561_v3 = vor.u32 %v8517_v50, %v6558_v52  ;;  %v2865_v4 = vpop.f32.mrf.mxu1  ;;  %v527_v46 = vperm.slane %v9288_v41, 4 }
 0x1c0   :  { %v8537_v17 = vld [vmem:[#allocation2 + $0x874] sm:$0xf0]  ;;  %v8645_v62 = vld [vmem:[#allocation2 + $0xbdc] sm:$0xf]  ;;  %v6817_v5 = vor.u32 %v8581_v54, %v6814_v60 }
 0x1c1   :  { %v6876_v23 = vld [vmem:[#allocation2 + $0xa58] sm:$0xf]  ;;  %v6621_v27 = vor.u32 %v8537_v17, %v6620_v12  ;;  %3119 = vmatpush.bf16.msra.mxu3 %v6909_v19  ;;  %v8445_v1 = vld [vmem:[#allocation2 + $0x59c] sm:$0xf]  ;;  %v7073_v6 = vor.u32 %v8645_v62, %v7070_v63 }
 0x1c2   :  { %v8601_v24 = vld [vmem:[#allocation2 + $0xa74] sm:$0xf0]  ;;  %3158 = vmatpush.bf16.msra.mxu0 %v5889_v22  ;;  %v8509_v10 = vld [vmem:[#allocation2 + $0x79c] sm:$0xf]  ;;  %v6273_v15 = vor.u32 %v8445_v1, %v6270_v2 }
 0x1c3   :  { %v6588_v9 = vld [vmem:[#allocation2 + $0x818] sm:$0xf]  ;;  %v6877_v33 = vor.u32 %v8601_v24, %v6876_v23  ;;  %3145 = vmatpush.bf16.msra.mxu2 %v5633_v20  ;;  %3107 = vmatpush.bf16.msrb.mxu1 %v6621_v27  ;;  %v8637_v12 = vld [vmem:[#allocation2 + $0xb9c] sm:$0xf]  ;;  %v6529_v21 = vor.u32 %v8509_v10, %v6526_v11  ;;  %v6785_v20 = vor.u32 %v8573_v13, %v6782_v16 }
 0x1c4   :  { %v8529_v32 = vld [vmem:[#allocation2 + $0x834] sm:$0xf0]  ;;  %v7038_v17 = vld [vmem:[#allocation2 + $0xbb8] sm:$0xf0] }
 0x1c5   :  { %v6844_v39 = vld [vmem:[#allocation2 + $0xa18] sm:$0xf]  ;;  %v6589_v43 = vor.u32 %v8529_v32, %v6588_v9  ;;  %3120 = vmatpush.bf16.msra.mxu3 %v6877_v33  ;;  %v8437_v18 = vld [vmem:[#allocation2 + $0x55c] sm:$0xf]  ;;  %v7041_v22 = vor.u32 %v8637_v12, %v7038_v17 }
 0x1c6   :  { %v8593_v40 = vld [vmem:[#allocation2 + $0xa34] sm:$0xf0]  ;;  %3159 = vmatpush.bf16.msra.mxu0 %v5857_v38  ;;  %v6238_v19 = vld [vmem:[#allocation2 + $0x578] sm:$0xf0] }
 0x1c7   :  { %v6845_v58 = vor.u32 %v8593_v40, %v6844_v39  ;;  %3146 = vmatpush.bf16.msra.mxu2 %v5601_v37  ;;  %3108 = vmatpush.bf16.msrb.mxu1 %v6589_v43  ;;  %v8501_v23 = vld [vmem:[#allocation2 + $0x75c] sm:$0xf]  ;;  %v6241_v26 = vor.u32 %v8437_v18, %v6238_v19  ;;  %v2889_v42 = vpop.f32.mrf.mxu1 }
 0x1c8   :  { %v6494_v24 = vld [vmem:[#allocation2 + $0x778] sm:$0xf0] }
 0x1c9   :  { %3121 = vmatpush.bf16.msra.mxu3 %v6845_v58  ;;  %v8565_v25 = vld [vmem:[#allocation2 + $0x95c] sm:$0xf]  ;;  %v6497_v32 = vor.u32 %v8501_v23, %v6494_v24 }
 0x1ca   :  { %3109 = vmatmul.bf16.vlgmr.msrb.gmra.mxu1 %v9221_v30  ;;  %3160 = vmatpush.bf16.msra.mxu0 %v5825_v59  ;;  %v6750_v27 = vld [vmem:[#allocation2 + $0x978] sm:$0xf0] }
 0x1cb   :  { %3166 = vmatpush.bf16.msra.mxu1 %v6305_v49  ;;  %3147 = vmatpush.bf16.msra.mxu2 %v5569_v0  ;;  %v8629_v61 = vld [vmem:[#allocation2 + $0xb5c] sm:$0xf]  ;;  %v6753_v33 = vor.u32 %v8565_v25, %v6750_v27  ;;  %v2876_v0 = vpop.f32.mrf.mxu3 }
 0x1cc   :  { %3122 = vmatmul.bf16.vlgmr.msra.gmra.mxu3 %v9223_v35  ;;  %v7006_v28 = vld [vmem:[#allocation2 + $0xb78] sm:$0xf0]  ;;  %v2877_v59 = vadd.f32 %v2876_v0, %v527_v46  ;;  %v8752_v0 = vld [vmem:[#allocation6 + $0x2ec] sm:$0xf0] }
 0x1cd   :  { %3179 = vmatpush.bf16.msrb.mxu3 %v6561_v3  ;;  %v8429_v29 = vld [vmem:[#allocation2 + $0x51c] sm:$0xf]  ;;  %3161 = vmatmul.bf16.vlgmr.msra.gmra.mxu0 %v9204_v7  ;;  %v7009_v34 = vor.u32 %v8629_v61, %v7006_v28  ;;  %v2902_v3 = vpop.f32.mrf.mxu2 }
 0x1ce   :  { %3205 = vmatpush.bf16.msrb.mxu0 %v7073_v6  ;;  %v6206_v9 = vld [vmem:[#allocation2 + $0x538] sm:$0xf0]  ;;  %3148 = vmatmul.bf16.vlgmr.msra.gmra.mxu2 %v9195_v55  ;;  %v2915_v55 = vpop.f32.mrf.mxu0  ;;  %v2890_v13 = vadd.f32 %v2889_v42, %v2877_v59  ;;  %v8784_v59 = vld [vmem:[#allocation6 + $0x3ec] sm:$0xf0] }
 0x1cf   :  { %3192 = vmatpush.bf16.msrb.mxu2 %v6817_v5  ;;  %3167 = vmatpush.bf16.msra.mxu1 %v6273_v15  ;;  %v8493_v36 = vld [vmem:[#allocation2 + $0x71c] sm:$0xf]  ;;  %v6209_v37 = vor.u32 %v8429_v29, %v6206_v9  ;;  %v2891_v18 = vpop.f32.mrf.mxu1 }
 0x1d0   :  { %v6462_v56 = vld [vmem:[#allocation2 + $0x738] sm:$0xf0]  ;;  %v7596_v18 = vld [vmem:[#allocation6 + $0x3c0] sm:$0xf] }
 0x1d1   :  { %3180 = vmatpush.bf16.msrb.mxu3 %v6529_v21  ;;  %v8557_v14 = vld [vmem:[#allocation2 + $0x91c] sm:$0xf]  ;;  %v6465_v7 = vor.u32 %v8493_v36, %v6462_v56 }
 0x1d2   :  { %3206 = vmatpush.bf16.msrb.mxu0 %v7041_v22  ;;  %v6718_v38 = vld [vmem:[#allocation2 + $0x938] sm:$0xf0]  ;;  %v2903_v22 = vadd.f32 %v2902_v3, %v2890_v13 }
 0x1d3   :  { %3193 = vmatpush.bf16.msrb.mxu2 %v6785_v20  ;;  %3168 = vmatpush.bf16.msra.mxu1 %v6241_v26  ;;  %v8621_v39 = vld [vmem:[#allocation2 + $0xb1c] sm:$0xf]  ;;  %v6721_v47 = vor.u32 %v8557_v14, %v6718_v38  ;;  %v2878_v56 = vpop.f32.mrf.mxu3 }
 0x1d4   :  { %v6974_v40 = vld [vmem:[#allocation2 + $0xb38] sm:$0xf0]  ;;  %v9312_v28 = vadd.f32 %v2915_v55, %v2903_v22  ;;  %v8676_v56 = vld [vmem:[#allocation6 + $0x8c] sm:$0xf0] }
 0x1d5   :  { %v8421_v43 = vld [vmem:[#allocation2 + $0x4dc] sm:$0xf]  ;;  %3181 = vmatpush.bf16.msrb.mxu3 %v6497_v32  ;;  %v6977_v49 = vor.u32 %v8621_v39, %v6974_v40  ;;  %v2904_v14 = vpop.f32.mrf.mxu2 }
 0x1d6   :  { %v6174_v44 = vld [vmem:[#allocation2 + $0x4f8] sm:$0xf0]  ;;  %3207 = vmatpush.bf16.msrb.mxu0 %v7009_v34  ;;  %v2917_v20 = vpop.f32.mrf.mxu0  ;;  %v7308_v14 = vld [vmem:[#allocation6 + $0x180] sm:$0xf] }
 0x1d7   :  { %3194 = vmatpush.bf16.msrb.mxu2 %v6753_v33  ;;  %v8485_v50 = vld [vmem:[#allocation2 + $0x6dc] sm:$0xf]  ;;  %3169 = vmatpush.bf16.msra.mxu1 %v6209_v37  ;;  %v6177_v58 = vor.u32 %v8421_v43, %v6174_v44 }
 0x1d8   :  { %v6430_v52 = vld [vmem:[#allocation2 + $0x6f8] sm:$0xf0] }
 0x1d9   :  { %v8549_v54 = vld [vmem:[#allocation2 + $0x8dc] sm:$0xf]  ;;  %3182 = vmatpush.bf16.msrb.mxu3 %v6465_v7  ;;  %v6433_v4 = vor.u32 %v8485_v50, %v6430_v52  ;;  %v7228_v52 = vld [vmem:[#allocation6 + $0xe0] sm:$0xf] }
 0x1da   :  { %v6686_v60 = vld [vmem:[#allocation2 + $0x8f8] sm:$0xf0]  ;;  %3208 = vmatpush.bf16.msrb.mxu0 %v6977_v49 }
 0x1db   :  { %v8613_v62 = vld [vmem:[#allocation2 + $0xadc] sm:$0xf]  ;;  %3195 = vmatpush.bf16.msrb.mxu2 %v6721_v47  ;;  %v6689_v41 = vor.u32 %v8549_v54, %v6686_v60  ;;  %3170 = vmatpush.bf16.msra.mxu1 %v6177_v58  ;;  %v8688_v54 = vld [vmem:[#allocation6 + $0xec] sm:$0xf0]  ;;  %v7356_v58 = vld [vmem:[#allocation6 + $0x1e0] sm:$0xf] }
 0x1dc   :  { %v6942_v63 = vld [vmem:[#allocation2 + $0xaf8] sm:$0xf0] }
 0x1dd   :  { %v8413_v1 = vld [vmem:[#allocation2 + $0x49c] sm:$0xf]  ;;  %v6945_v5 = vor.u32 %v8613_v62, %v6942_v63  ;;  %3183 = vmatpush.bf16.msrb.mxu3 %v6433_v4  ;;  %v8720_v62 = vld [vmem:[#allocation6 + $0x1ec] sm:$0xf0]  ;;  %v7484_v63 = vld [vmem:[#allocation6 + $0x2e0] sm:$0xf]  ;;  %v7229_v4 = vor.u32 %v8688_v54, %v7228_v52 }
 0x1de   :  { %v6142_v2 = vld [vmem:[#allocation2 + $0x4b8] sm:$0xf0]  ;;  %v8704_v52 = vld [vmem:[#allocation6 + $0x16c] sm:$0xf0]  ;;  %v7420_v54 = vld [vmem:[#allocation6 + $0x260] sm:$0xf] }
 0x1df   :  { %v8477_v6 = vld [vmem:[#allocation2 + $0x69c] sm:$0xf]  ;;  %v6145_v15 = vor.u32 %v8413_v1, %v6142_v2  ;;  %3196 = vmatpush.bf16.msrb.mxu2 %v6689_v41  ;;  %3209 = vmatpush.bf16.msrb.mxu0 %v6945_v5  ;;  %v7612_v2 = vld [vmem:[#allocation6 + $0x3e0] sm:$0xf]  ;;  %v7357_v41 = vor.u32 %v8720_v62, %v7356_v58  ;;  %v7485_v5 = vor.u32 %v8752_v0, %v7484_v63  ;;  %v8736_v58 = vld [vmem:[#allocation6 + $0x26c] sm:$0xf0] }
 0x1e0   :  { %v6398_v10 = vld [vmem:[#allocation2 + $0x6b8] sm:$0xf0]  ;;  %v7613_v13 = vor.u32 %v8784_v59, %v7612_v2  ;;  %v7548_v62 = vld [vmem:[#allocation6 + $0x360] sm:$0xf]  ;;  %v8768_v63 = vld [vmem:[#allocation6 + $0x36c] sm:$0xf0]  ;;  %v7421_v2 = vor.u32 %v8736_v58, %v7420_v54 }
 0x1e1   :  { %v8541_v11 = vld [vmem:[#allocation2 + $0x89c] sm:$0xf]  ;;  %v6401_v23 = vor.u32 %v8477_v6, %v6398_v10  ;;  %3171 = vmatpush.bf16.msra.mxu1 %v6145_v15  ;;  %v7212_v6 = vld [vmem:[#allocation6 + $0xc0] sm:$0xf]  ;;  %v8684_v10 = vld [vmem:[#allocation6 + $0xcc] sm:$0xf0] }
 0x1e2   :  { %v6654_v16 = vld [vmem:[#allocation2 + $0x8b8] sm:$0xf0]  ;;  %v8716_v15 = vld [vmem:[#allocation6 + $0x1cc] sm:$0xf0]  ;;  %v7148_v59 = vld [vmem:[#allocation6 + $0x40] sm:$0xf] }
 0x1e3   :  { %v8605_v12 = vld [vmem:[#allocation2 + $0xa9c] sm:$0xf]  ;;  %v6657_v24 = vor.u32 %v8541_v11, %v6654_v16  ;;  %3184 = vmatpush.bf16.msrb.mxu3 %v6401_v23  ;;  %v7340_v11 = vld [vmem:[#allocation6 + $0x1c0] sm:$0xf] }
 0x1e4   :  { %v6910_v17 = vld [vmem:[#allocation2 + $0xab8] sm:$0xf0]  ;;  %v7468_v16 = vld [vmem:[#allocation6 + $0x2c0] sm:$0xf]  ;;  %v7341_v20 = vor.u32 %v8716_v15, %v7340_v11  ;;  %v8764_v15 = vld [vmem:[#allocation6 + $0x34c] sm:$0xf0] }
 0x1e5   :  { %v8405_v19 = vld [vmem:[#allocation2 + $0x45c] sm:$0xf]  ;;  %v6913_v25 = vor.u32 %v8605_v12, %v6910_v17  ;;  %3197 = vmatpush.bf16.msrb.mxu2 %v6657_v24  ;;  %v8748_v12 = vld [vmem:[#allocation6 + $0x2cc] sm:$0xf0]  ;;  %v9314_v17 = vpop.f32.mrf.mxu2  ;;  %v7196_v23 = vld [vmem:[#allocation6 + $0xa0] sm:$0xf] }
 0x1e6   :  { %v6110_v21 = vld [vmem:[#allocation2 + $0x478] sm:$0xf0]  ;;  %v7469_v22 = vor.u32 %v8748_v12, %v7468_v16  ;;  %v8680_v24 = vld [vmem:[#allocation6 + $0xac] sm:$0xf0] }
 0x1e7   :  { %v8469_v26 = vld [vmem:[#allocation2 + $0x65c] sm:$0xf]  ;;  %v6113_v29 = vor.u32 %v8405_v19, %v6110_v21  ;;  %3210 = vmatpush.bf16.msrb.mxu0 %v6913_v25  ;;  %v8780_v19 = vld [vmem:[#allocation6 + $0x3cc] sm:$0xf0]  ;;  %v7213_v21 = vor.u32 %v8684_v10, %v7212_v6  ;;  %v7324_v25 = vld [vmem:[#allocation6 + $0x1a0] sm:$0xf] }
 0x1e8   :  { %v6366_v27 = vld [vmem:[#allocation2 + $0x678] sm:$0xf0]  ;;  %v7404_v6 = vld [vmem:[#allocation6 + $0x240] sm:$0xf]  ;;  %v8732_v10 = vld [vmem:[#allocation6 + $0x24c] sm:$0xf0] }
 0x1e9   :  { %v8533_v61 = vld [vmem:[#allocation2 + $0x85c] sm:$0xf]  ;;  %v6369_v37 = vor.u32 %v8469_v26, %v6366_v27  ;;  %3172 = vmatpush.bf16.msra.mxu1 %v6113_v29  ;;  %v7597_v26 = vor.u32 %v8780_v19, %v7596_v18  ;;  %v8712_v27 = vld [vmem:[#allocation6 + $0x1ac] sm:$0xf0]  ;;  %v7580_v29 = vld [vmem:[#allocation6 + $0x3a0] sm:$0xf] }
 0x1ea   :  { %v6622_v9 = vld [vmem:[#allocation2 + $0x878] sm:$0xf0] }
 0x1eb   :  { %v8597_v32 = vld [vmem:[#allocation2 + $0xa5c] sm:$0xf]  ;;  %v6625_v40 = vor.u32 %v8533_v61, %v6622_v9  ;;  %3185 = vmatpush.bf16.msrb.mxu3 %v6369_v37  ;;  %v7452_v61 = vld [vmem:[#allocation6 + $0x2a0] sm:$0xf]  ;;  %v8776_v9 = vld [vmem:[#allocation6 + $0x3ac] sm:$0xf0] }
 0x1ec   :  { %v6878_v33 = vld [vmem:[#allocation2 + $0xa78] sm:$0xf0]  ;;  %v8708_v37 = vld [vmem:[#allocation6 + $0x18c] sm:$0xf0] }
 0x1ed   :  { %v8397_v34 = vld [vmem:[#allocation2 + $0x41c] sm:$0xf]  ;;  %v6881_v42 = vor.u32 %v8597_v32, %v6878_v33  ;;  %3198 = vmatpush.bf16.msrb.mxu2 %v6625_v40  ;;  %v7197_v32 = vor.u32 %v8680_v24, %v7196_v23  ;;  %v7325_v33 = vor.u32 %v8712_v27, %v7324_v25  ;;  %v9320_v40 = vpop.f32.mrf.mxu1  ;;  %v7260_v23 = vld [vmem:[#allocation6 + $0x120] sm:$0xf]  ;;  %v8696_v25 = vld [vmem:[#allocation6 + $0x12c] sm:$0xf0] }
 0x1ee   :  { %v6078_v36 = vld [vmem:[#allocation2 + $0x438] sm:$0xf0]  ;;  %v8728_v27 = vld [vmem:[#allocation6 + $0x22c] sm:$0xf0] }
 0x1ef   :  { %v8653_v38 = vld [vmem:[#allocation2 + $0xc1c] sm:$0xf]  ;;  %v6081_v7 = vor.u32 %v8397_v34, %v6078_v36  ;;  %3211 = vmatpush.bf16.msrb.mxu0 %v6881_v42  ;;  %v7180_v36 = vld [vmem:[#allocation6 + $0x80] sm:$0xf]  ;;  %v8772_v42 = vld [vmem:[#allocation6 + $0x38c] sm:$0xf0] }
 0x1f0   :  { %v7102_v39 = vld [vmem:[#allocation2 + $0xc38] sm:$0xf0] }
 0x1f1   :  { %v8461_v43 = vld [vmem:[#allocation2 + $0x61c] sm:$0xf]  ;;  %v7105_v50 = vor.u32 %v8653_v38, %v7102_v39  ;;  %3173 = vmatpush.bf16.msra.mxu1 %v6081_v7  ;;  %v7436_v38 = vld [vmem:[#allocation6 + $0x280] sm:$0xf]  ;;  %v8740_v39 = vld [vmem:[#allocation6 + $0x28c] sm:$0xf0] }
 0x1f2   :  { %v6334_v44 = vld [vmem:[#allocation2 + $0x638] sm:$0xf0]  ;;  %v7437_v7 = vor.u32 %v8740_v39, %v7436_v38  ;;  %v7500_v38 = vld [vmem:[#allocation6 + $0x300] sm:$0xf]  ;;  %v8756_v39 = vld [vmem:[#allocation6 + $0x30c] sm:$0xf0] }
 0x1f3   :  { %v8525_v55 = vld [vmem:[#allocation2 + $0x81c] sm:$0xf]  ;;  %v6337_v60 = vor.u32 %v8461_v43, %v6334_v44  ;;  %v9322_v43 = vpop.f32.mrf.mxu0  ;;  %v7181_v44 = vor.u32 %v8676_v56, %v7180_v36  ;;  %v7244_v36 = vld [vmem:[#allocation6 + $0x100] sm:$0xf]  ;;  %v8692_v56 = vld [vmem:[#allocation6 + $0x10c] sm:$0xf0]  ;;  %v7501_v54 = vor.u32 %v8756_v39, %v7500_v38 }
 0x1f4   :  { %v6590_v46 = vld [vmem:[#allocation2 + $0x838] sm:$0xf0]  ;;  %3174 = vmatmul.bf16.vlgmr.msra.gmra.mxu1 %v9193_v51  ;;  %v8744_v51 = vld [vmem:[#allocation6 + $0x2ac] sm:$0xf0]  ;;  %v7804_v38 = vld [vmem:[#allocation6 + $0x560] sm:$0xf] }
 0x1f5   :  { %v8589_v47 = vld [vmem:[#allocation2 + $0xa1c] sm:$0xf]  ;;  %v6593_v1 = vor.u32 %v8525_v55, %v6590_v46  ;;  %3225 = vmatpush.bf16.msrb.mxu1 %v7105_v50  ;;  %3186 = vmatpush.bf16.msrb.mxu3 %v6337_v60  ;;  %v7453_v34 = vor.u32 %v8744_v51, %v7452_v61  ;;  %v7309_v55 = vor.u32 %v8708_v37, %v7308_v14  ;;  %v7164_v46 = vld [vmem:[#allocation6 + $0x60] sm:$0xf]  ;;  %v9324_v60 = vpop.f32.mrf.mxu3  ;;  %v2943_v11 = vpop.f32.mrf.mxu1  ;;  %v8760_v61 = vld [vmem:[#allocation6 + $0x32c] sm:$0xf0] }
 0x1f6   :  { %v6846_v49 = vld [vmem:[#allocation2 + $0xa38] sm:$0xf0]  ;;  %v8724_v37 = vld [vmem:[#allocation6 + $0x20c] sm:$0xf0] }
 0x1f7   :  { %v6849_v3 = vor.u32 %v8589_v47, %v6846_v49  ;;  %3199 = vmatpush.bf16.msrb.mxu2 %v6593_v1  ;;  %v8672_v47 = vld [vmem:[#allocation6 + $0x6c] sm:$0xf0]  ;;  %v7292_v49 = vld [vmem:[#allocation6 + $0x160] sm:$0xf] }
 0x1f8   :  { %3187 = vmatmul.bf16.vlgmr.msrb.gmra.mxu3 %v9197_v57  ;;  %v7581_v57 = vor.u32 %v8776_v9, %v7580_v29  ;;  %v7165_v0 = vor.u32 %v8672_v47, %v7164_v46  ;;  %v7293_v1 = vor.u32 %v8704_v52, %v7292_v49  ;;  %v7116_v9 = vld [vmem:[#allocation6] sm:$0xf]  ;;  %v3231_v46 = vmax.f32 %v9255_v53, 0.0  ;;  %v8832_v39 = vld [vmem:[#allocation6 + $0x56c] sm:$0xf0] }
 0x1f9   :  { %3212 = vmatpush.bf16.msrb.mxu0 %v6849_v3  ;;  %4793 = vmatpush.bf16.msra.mxu3 %v7229_v4  ;;  %v8668_v3 = vld [vmem:[#allocation6 + $0x4c] sm:$0xf0]  ;;  %v7276_v4 = vld [vmem:[#allocation6 + $0x140] sm:$0xf]  ;;  %v7245_v47 = vor.u32 %v8692_v56, %v7244_v36  ;;  %v3233_v52 = vmax.f32 %v9292_v8, 0.0 }
 0x1fa   :  { %4806 = vmatpush.bf16.msra.mxu1 %v7357_v41  ;;  %3200 = vmatmul.bf16.vlgmr.msrb.gmra.mxu2 %v9221_v30  ;;  %v2956_v30 = vpop.f32.mrf.mxu2  ;;  %v7549_v41 = vor.u32 %v8768_v63, %v7548_v62  ;;  %v7149_v18 = vor.u32 %v8668_v3, %v7148_v59  ;;  %v7996_v62 = vld [vmem:[#allocation6 + $0x6e0] sm:$0xf]  ;;  %v8880_v63 = vld [vmem:[#allocation6 + $0x6ec] sm:$0xf0] }
 0x1fb   :  { %4819 = vmatpush.bf16.msra.mxu2 %v7485_v5  ;;  %v8700_v5 = vld [vmem:[#allocation6 + $0x14c] sm:$0xf0]  ;;  %v2969_v12 = vpop.f32.mrf.mxu0  ;;  %v7740_v30 = vld [vmem:[#allocation6 + $0x4e0] sm:$0xf]  ;;  %v9338_v8 = vpack.c.bf16 %v3233_v52, %v3233_v52 }
 0x1fc   :  { %3213 = vmatmul.bf16.vlgmr.msrb.gmra.mxu0 %v9223_v35  ;;  %v7564_v35 = vld [vmem:[#allocation6 + $0x380] sm:$0xf]  ;;  %v7277_v19 = vor.u32 %v8700_v5, %v7276_v4  ;;  %v8812_v59 = vld [vmem:[#allocation6 + $0x4cc] sm:$0xf0]  ;;  %v9334_v4 = vpack.c.bf16 %v3231_v46, %v3231_v46  ;;  %v9345_v12 = vld [vmem:[#allocation4] sm:$0xff] }
 0x1fd   :  { %4832 = vmatpush.bf16.msra.mxu0 %v7613_v13  ;;  %4794 = vmatpush.bf16.msra.mxu3 %v7213_v21  ;;  %v7565_v50 = vor.u32 %v8772_v42, %v7564_v35  ;;  %v7532_v13 = vld [vmem:[#allocation6 + $0x340] sm:$0xf]  ;;  %v7405_v21 = vor.u32 %v8732_v10, %v7404_v6  ;;  %v2930_v51 = vpop.f32.mrf.mxu3  ;;  %v8816_v35 = vld [vmem:[#allocation6 + $0x4ec] sm:$0xf0] }
 0x1fe   :  { %4807 = vmatpush.bf16.msra.mxu1 %v7341_v20  ;;  %v7132_v20 = vld [vmem:[#allocation6 + $0x20] sm:$0xf]  ;;  %v7533_v24 = vor.u32 %v8764_v15, %v7532_v13  ;;  %v7741_v58 = vor.u32 %v8816_v35, %v7740_v30  ;;  %v8844_v3 = vld [vmem:[#allocation6 + $0x5cc] sm:$0xf0]  ;;  %v2929_v35 = vadd.f32 %v9324_v60, %v9312_v28 }
 0x1ff   :  { %4820 = vmatpush.bf16.msra.mxu2 %v7469_v22  ;;  %v8664_v22 = vld [vmem:[#allocation6 + $0x2c] sm:$0xf0]  ;;  %v7852_v53 = vld [vmem:[#allocation6 + $0x5c0] sm:$0xf] }
 0x200   :  { %v7133_v29 = vor.u32 %v8664_v22, %v7132_v20  ;;  %v7980_v6 = vld [vmem:[#allocation6 + $0x6c0] sm:$0xf]  ;;  %v7853_v11 = vor.u32 %v8844_v3, %v7852_v53  ;;  %v8808_v15 = vld [vmem:[#allocation6 + $0x4ac] sm:$0xf0] }
 0x201   :  { %4833 = vmatpush.bf16.msra.mxu0 %v7597_v26  ;;  %4795 = vmatpush.bf16.msra.mxu3 %v7197_v32  ;;  %v7388_v26 = vld [vmem:[#allocation6 + $0x220] sm:$0xf]  ;;  %v7261_v32 = vor.u32 %v8696_v25, %v7260_v23  ;;  %v8836_v51 = vld [vmem:[#allocation6 + $0x58c] sm:$0xf0] }
 0x202   :  { %4808 = vmatpush.bf16.msra.mxu1 %v7325_v33  ;;  %v9328_v16 = vpop.f32.mrf.mxu2  ;;  %v7389_v33 = vor.u32 %v8728_v27, %v7388_v26  ;;  %v7708_v13 = vld [vmem:[#allocation6 + $0x4a0] sm:$0xf]  ;;  %v8804_v27 = vld [vmem:[#allocation6 + $0x48c] sm:$0xf0] }
 0x203   :  { %4821 = vmatpush.bf16.msra.mxu2 %v7453_v34  ;;  %v8660_v34 = vld [vmem:[#allocation6 + $0xc] sm:$0xf0]  ;;  %v7709_v22 = vor.u32 %v8808_v15, %v7708_v13  ;;  %v7964_v23 = vld [vmem:[#allocation6 + $0x6a0] sm:$0xf] }
 0x204   :  { %7113 = vmatmul.msk.bf16.vlgmr.msrb.gmra.mxu1 %vm2499_vm0, %v9211_v45  ;;  %v7516_v45 = vld [vmem:[#allocation6 + $0x320] sm:$0xf]  ;;  %v8828_v52 = vld [vmem:[#allocation6 + $0x54c] sm:$0xf0] }
 0x205   :  { %4834 = vmatpush.bf16.msra.mxu0 %v7581_v57  ;;  %4796 = vmatpush.bf16.msra.mxu3 %v7181_v44  ;;  %v7517_v14 = vor.u32 %v8760_v61, %v7516_v45  ;;  %v7372_v57 = vld [vmem:[#allocation6 + $0x200] sm:$0xf]  ;;  %v7117_v44 = vor.u32 %v8660_v34, %v7116_v9  ;;  %v8868_v34 = vld [vmem:[#allocation6 + $0x68c] sm:$0xf0] }
 0x206   :  { %4809 = vmatpush.bf16.msra.mxu1 %v7309_v55  ;;  %v7868_v55 = vld [vmem:[#allocation6 + $0x5e0] sm:$0xf]  ;;  %v7373_v49 = vor.u32 %v8724_v37, %v7372_v57  ;;  %v3006_v57 = vpop.f32.mrf.mxu1  ;;  %v8860_v60 = vld [vmem:[#allocation6 + $0x64c] sm:$0xf0] }
 0x207   :  { %4822 = vmatpush.bf16.msra.mxu2 %v7437_v7  ;;  %v8848_v7 = vld [vmem:[#allocation6 + $0x5ec] sm:$0xf0]  ;;  %v7692_v26 = vld [vmem:[#allocation6 + $0x480] sm:$0xf] }
 0x208   :  { %v7820_v61 = vld [vmem:[#allocation6 + $0x580] sm:$0xf]  ;;  %v2993_v30 = vpop.f32.mrf.mxu3  ;;  %v8856_v13 = vld [vmem:[#allocation6 + $0x62c] sm:$0xf0] }
 0x209   :  { %4835 = vmatpush.bf16.msra.mxu0 %v7565_v50  ;;  %4797 = vmatpush.bf16.msra.mxu3 %v7165_v0  ;;  %v3232_v50 = vmax.f32 %v9272_v48, 0.0  ;;  %v3234_v0 = vmax.f32 %v9305_v31, 0.0  ;;  %v7997_v48 = vor.u32 %v8880_v63, %v7996_v62  ;;  %v8876_v31 = vld [vmem:[#allocation6 + $0x6cc] sm:$0xf0]  ;;  %v7821_v36 = vor.u32 %v8836_v51, %v7820_v61  ;;  %v7676_v56 = vld [vmem:[#allocation6 + $0x460] sm:$0xf] }
 0x20a   :  { %4810 = vmatpush.bf16.msra.mxu1 %v7293_v1  ;;  %v2982_v42 = vpop.f32.mrf.mxu2  ;;  %v7869_v1 = vor.u32 %v8848_v7, %v7868_v55  ;;  %v7981_v20 = vor.u32 %v8876_v31, %v7980_v6  ;;  %v8864_v55 = vld [vmem:[#allocation6 + $0x66c] sm:$0xf0]  ;;  %v7805_v7 = vor.u32 %v8832_v39, %v7804_v38  ;;  %v7660_v46 = vld [vmem:[#allocation6 + $0x440] sm:$0xf]  ;;  %v2942_v62 = vadd.f32 %v9320_v40, %v2929_v35 }
 0x20b   :  { %4823 = vmatpush.bf16.msra.mxu2 %v7421_v2  ;;  %v7724_v2 = vld [vmem:[#allocation6 + $0x4c0] sm:$0xf]  ;;  %v9340_v10 = vpack.c.bf16 %v3234_v0, %v3234_v0  ;;  %v8912_v38 = vld [vmem:[#allocation6 + $0x7ec] sm:$0xf0] }
 0x20c   :  { %v7725_v5 = vor.u32 %v8812_v59, %v7724_v2  ;;  %v7916_v28 = vld [vmem:[#allocation6 + $0x640] sm:$0xf]  ;;  %v8792_v2 = vld [vmem:[#allocation6 + $0x42c] sm:$0xf0]  ;;  %v2955_v31 = vadd.f32 %v9314_v17, %v2942_v62 }
 0x20d   :  { %4836 = vmatpush.bf16.msra.mxu0 %v7549_v41  ;;  %4798 = vmatpush.bf16.msra.mxu3 %v7149_v18  ;;  %v9336_v41 = vpack.c.bf16 %v3232_v50, %v3232_v50  ;;  %v528_v18 = vperm.slane %v9345_v12, 5  ;;  %v7788_v50 = vld [vmem:[#allocation6 + $0x540] sm:$0xf]  ;;  %v7917_v6 = vor.u32 %v8860_v60, %v7916_v28  ;;  %v8908_v62 = vld [vmem:[#allocation6 + $0x7cc] sm:$0xf0] }
 0x20e   :  { %4811 = vmatpush.bf16.msra.mxu1 %v7277_v19  ;;  %v7836_v19 = vld [vmem:[#allocation6 + $0x5a0] sm:$0xf]  ;;  %v7789_v0 = vor.u32 %v8828_v52, %v7788_v50  ;;  %v3008_v59 = vpop.f32.mrf.mxu1  ;;  %v3235_v61 = vmax.f32 %v2955_v31, 0.0  ;;  %v8746_v50 = vld [vmem:[#allocation6 + $0x2c4] sm:$0xf] }
 0x20f   :  { %4824 = vmatpush.bf16.msra.mxu2 %v7405_v21  ;;  %v8840_v21 = vld [vmem:[#allocation6 + $0x5ac] sm:$0xf0]  ;;  %v2968_v45 = vadd.f32 %v9322_v43, %v528_v18  ;;  %v7772_v3 = vld [vmem:[#allocation6 + $0x520] sm:$0xf]  ;;  %v7470_v52 = vld [vmem:[#allocation6 + $0x2d0] sm:$0xf0] }
 0x210   :  { %v7837_v25 = vor.u32 %v8840_v21, %v7836_v19  ;;  %v7900_v40 = vld [vmem:[#allocation6 + $0x620] sm:$0xf]  ;;  %v8788_v19 = vld [vmem:[#allocation6 + $0x40c] sm:$0xf0]  ;;  %v7326_v28 = vld [vmem:[#allocation6 + $0x1b0] sm:$0xf0] }
 0x211   :  { %4837 = vmatpush.bf16.msra.mxu0 %v7533_v24  ;;  %4799 = vmatpush.bf16.msra.mxu3 %v7133_v29  ;;  %v8872_v24 = vld [vmem:[#allocation6 + $0x6ac] sm:$0xf0]  ;;  %v3019_v29 = vpop.f32.mrf.mxu0  ;;  %v2981_v37 = vadd.f32 %v9328_v16, %v2968_v45  ;;  %v7628_v18 = vld [vmem:[#allocation6 + $0x400] sm:$0xf]  ;;  %v7901_v45 = vor.u32 %v8856_v13, %v7900_v40  ;;  %v8674_v59 = vld [vmem:[#allocation6 + $0x84] sm:$0xf] }
 0x212   :  { %4812 = vmatpush.bf16.msra.mxu1 %v7261_v32  ;;  %v7965_v9 = vor.u32 %v8872_v24, %v7964_v23  ;;  %v7693_v32 = vor.u32 %v8804_v27, %v7692_v26  ;;  %v3032_v16 = vpop.f32.mrf.mxu2  ;;  %v7756_v21 = vld [vmem:[#allocation6 + $0x500] sm:$0xf]  ;;  %v8686_v23 = vld [vmem:[#allocation6 + $0xe4] sm:$0xf]  ;;  %v7230_v24 = vld [vmem:[#allocation6 + $0xf0] sm:$0xf0]  ;;  %v7629_v17 = vor.u32 %v8788_v19, %v7628_v18 }
 0x213   :  { %4825 = vmatpush.bf16.msra.mxu2 %v7389_v33  ;;  %v7948_v33 = vld [vmem:[#allocation6 + $0x680] sm:$0xf]  ;;  %v8718_v26 = vld [vmem:[#allocation6 + $0x1e4] sm:$0xf]  ;;  %v7358_v27 = vld [vmem:[#allocation6 + $0x1f0] sm:$0xf0] }
 0x214   :  { %v7949_v43 = vor.u32 %v8868_v34, %v7948_v33  ;;  %v7884_v51 = vld [vmem:[#allocation6 + $0x600] sm:$0xf]  ;;  %v7233_v33 = vor.u32 %v8686_v23, %v7230_v24  ;;  %v8682_v34 = vld [vmem:[#allocation6 + $0xc4] sm:$0xf]  ;;  %v8904_v31 = vld [vmem:[#allocation6 + $0x7ac] sm:$0xf0] }
 0x215   :  { %4838 = vmatpush.bf16.msra.mxu0 %v7517_v14  ;;  %4800 = vmatpush.bf16.msra.mxu3 %v7117_v44  ;;  %v8800_v14 = vld [vmem:[#allocation6 + $0x46c] sm:$0xf0]  ;;  %v7932_v44 = vld [vmem:[#allocation6 + $0x660] sm:$0xf]  ;;  %v8706_v13 = vld [vmem:[#allocation6 + $0x184] sm:$0xf] }
 0x216   :  { %4813 = vmatpush.bf16.msra.mxu1 %v7245_v47  ;;  %v7677_v42 = vor.u32 %v8800_v14, %v7676_v56  ;;  %v8796_v47 = vld [vmem:[#allocation6 + $0x44c] sm:$0xf0]  ;;  %v7486_v56 = vld [vmem:[#allocation6 + $0x2f0] sm:$0xf0]  ;;  %v7361_v14 = vor.u32 %v8718_v26, %v7358_v27  ;;  %v8076_v27 = vld [vmem:[#allocation6 + $0x780] sm:$0xf] }
 0x217   :  { %4826 = vmatpush.bf16.msra.mxu2 %v7373_v49  ;;  %v2994_v49 = vadd.f32 %v2993_v30, %v2981_v37  ;;  %v7661_v63 = vor.u32 %v8796_v47, %v7660_v46  ;;  %v8124_v37 = vld [vmem:[#allocation6 + $0x7e0] sm:$0xf]  ;;  %v8714_v30 = vld [vmem:[#allocation6 + $0x1c4] sm:$0xf]  ;;  %v9355_v46 = vpack.c.bf16 %v3235_v61, %v3235_v61  ;;  %v7438_v23 = vld [vmem:[#allocation6 + $0x290] sm:$0xf0] }
 0x218   :  { %4801 = vmatmul.bf16.vlgmr.msra.gmra.mxu3 %v9334_v4  ;;  %v7166_v26 = vld [vmem:[#allocation6 + $0x70] sm:$0xf0]  ;;  %v8702_v61 = vld [vmem:[#allocation6 + $0x164] sm:$0xf] }
 0x219   :  { %4839 = vmatpush.bf16.msra.mxu0 %v7501_v54  ;;  %4845 = vmatpush.bf16.msrb.mxu3 %v7741_v58  ;;  %v3021_v54 = vpop.f32.mrf.mxu0  ;;  %v7933_v58 = vor.u32 %v8864_v55, %v7932_v44  ;;  %v3007_v53 = vadd.f32 %v3006_v57, %v2994_v49  ;;  %v7214_v57 = vld [vmem:[#allocation6 + $0xd0] sm:$0xf0]  ;;  %v8678_v55 = vld [vmem:[#allocation6 + $0xa4] sm:$0xf] }
 0x21a   :  { %4858 = vmatpush.bf16.msrb.mxu1 %v7869_v1  ;;  %4827 = vmatmul.bf16.vlgmr.msra.gmra.mxu2 %v9338_v8  ;;  %v7644_v1 = vld [vmem:[#allocation6 + $0x420] sm:$0xf]  ;;  %v7217_v47 = vor.u32 %v8682_v34, %v7214_v57  ;;  %v7198_v49 = vld [vmem:[#allocation6 + $0xb0] sm:$0xf0]  ;;  %v8734_v34 = vld [vmem:[#allocation6 + $0x264] sm:$0xf] }
 0x21b   :  { %4814 = vmatmul.bf16.vlgmr.msra.gmra.mxu1 %v9336_v41  ;;  %4871 = vmatpush.bf16.msrb.mxu2 %v7997_v48  ;;  %v8824_v48 = vld [vmem:[#allocation6 + $0x52c] sm:$0xf0] }
 0x21c   :  { %4840 = vmatmul.bf16.vlgmr.msra.gmra.mxu0 %v9340_v10  ;;  %v7773_v15 = vor.u32 %v8824_v48, %v7772_v3  ;;  %v7454_v3 = vld [vmem:[#allocation6 + $0x2b0] sm:$0xf0]  ;;  %v8896_v57 = vld [vmem:[#allocation6 + $0x76c] sm:$0xf0] }
 0x21d   :  { %4846 = vmatpush.bf16.msrb.mxu3 %v7725_v5  ;;  %v2995_v5 = vpop.f32.mrf.mxu3 }
 0x21e   :  { %4859 = vmatpush.bf16.msrb.mxu1 %v7853_v11  ;;  %v7645_v11 = vor.u32 %v8792_v2, %v7644_v1  ;;  %v7473_v1 = vor.u32 %v8746_v50, %v7470_v52  ;;  %v7201_v2 = vor.u32 %v8678_v55, %v7198_v49  ;;  %v7182_v5 = vld [vmem:[#allocation6 + $0x90] sm:$0xf0]  ;;  %v8662_v55 = vld [vmem:[#allocation6 + $0x24] sm:$0xf] }
 0x21f   :  { %4872 = vmatpush.bf16.msrb.mxu2 %v7981_v20  ;;  %v3020_v20 = vadd.f32 %v3019_v29, %v3007_v53  ;;  %v8742_v53 = vld [vmem:[#allocation6 + $0x2a4] sm:$0xf]  ;;  %v7134_v50 = vld [vmem:[#allocation6 + $0x30] sm:$0xf0] }
 0x220   :  { %v7457_v19 = vor.u32 %v8742_v53, %v7454_v3  ;;  %v7390_v53 = vld [vmem:[#allocation6 + $0x230] sm:$0xf0] }
 0x221   :  { %4847 = vmatpush.bf16.msrb.mxu3 %v7709_v22  ;;  %v8820_v22 = vld [vmem:[#allocation6 + $0x50c] sm:$0xf0]  ;;  %v3033_v29 = vadd.f32 %v3032_v16, %v3020_v20  ;;  %v8670_v20 = vld [vmem:[#allocation6 + $0x64] sm:$0xf] }
 0x222   :  { %4860 = vmatpush.bf16.msrb.mxu1 %v7837_v25  ;;  %v3034_v25 = vpop.f32.mrf.mxu2 }
 0x223   :  { %4873 = vmatpush.bf16.msrb.mxu2 %v7965_v9  ;;  %v8852_v9 = vld [vmem:[#allocation6 + $0x60c] sm:$0xf0] }
 0x224   :  { %v7885_v35 = vor.u32 %v8852_v9, %v7884_v51  ;;  %v9363_v25 = vpop.f32.mrf.mxu1 }
 0x225   :  { %4848 = vmatpush.bf16.msrb.mxu3 %v7693_v32  ;;  %v7757_v32 = vor.u32 %v8820_v22, %v7756_v21  ;;  %v3045_v39 = vpop.f32.mrf.mxu3  ;;  %v7185_v21 = vor.u32 %v8674_v59, %v7182_v5  ;;  %v8738_v22 = vld [vmem:[#allocation6 + $0x284] sm:$0xf]  ;;  %v8028_v5 = vld [vmem:[#allocation6 + $0x720] sm:$0xf] }
 0x226   :  { %4861 = vmatpush.bf16.msrb.mxu1 %v7821_v36  ;;  %v8750_v36 = vld [vmem:[#allocation6 + $0x2e4] sm:$0xf]  ;;  %v3046_v44 = vadd.f32 %v3045_v39, %v3033_v29  ;;  %v9361_v40 = vpop.f32.mrf.mxu0  ;;  %v7441_v9 = vor.u32 %v8738_v22, %v7438_v23  ;;  %v7150_v29 = vld [vmem:[#allocation6 + $0x50] sm:$0xf0] }
 0x227   :  { %4874 = vmatpush.bf16.msrb.mxu2 %v7949_v43  ;;  %v7342_v43 = vld [vmem:[#allocation6 + $0x1d0] sm:$0xf0]  ;;  %v8698_v39 = vld [vmem:[#allocation6 + $0x144] sm:$0xf] }
 0x228   :  { %v3236_v16 = vmax.f32 %v3046_v44, 0.0  ;;  %v7345_v54 = vor.u32 %v8714_v30, %v7342_v43  ;;  %v7278_v30 = vld [vmem:[#allocation6 + $0x150] sm:$0xf0]  ;;  %v8726_v59 = vld [vmem:[#allocation6 + $0x224] sm:$0xf] }
 0x229   :  { %4849 = vmatpush.bf16.msrb.mxu3 %v7677_v42  ;;  %v8125_v42 = vor.u32 %v8912_v38, %v8124_v37  ;;  %v7281_v49 = vor.u32 %v8698_v39, %v7278_v30  ;;  %v7393_v23 = vor.u32 %v8726_v59, %v7390_v53  ;;  %v7822_v59 = vld [vmem:[#allocation6 + $0x590] sm:$0xf0] }
 0x22a   :  { %4862 = vmatpush.bf16.msrb.mxu1 %v7805_v7  ;;  %v7489_v7 = vor.u32 %v8750_v36, %v7486_v56  ;;  %v7422_v36 = vld [vmem:[#allocation6 + $0x270] sm:$0xf0] }
 0x22b   :  { %4875 = vmatpush.bf16.msrb.mxu2 %v7933_v58  ;;  %4884 = vmatpush.bf16.msrb.mxu0 %v8125_v42  ;;  %v8108_v58 = vld [vmem:[#allocation6 + $0x7c0] sm:$0xf]  ;;  %v7425_v42 = vor.u32 %v8734_v34, %v7422_v36  ;;  %v7726_v34 = vld [vmem:[#allocation6 + $0x4d0] sm:$0xf0] }
 0x22c   :  { %v8109_v60 = vor.u32 %v8908_v62, %v8108_v58  ;;  %v3060_v52 = vpop.f32.mrf.mxu1  ;;  %v8694_v58 = vld [vmem:[#allocation6 + $0x124] sm:$0xf]  ;;  %v7262_v62 = vld [vmem:[#allocation6 + $0x130] sm:$0xf0] }
 0x22d   :  { %4850 = vmatpush.bf16.msrb.mxu3 %v7661_v63  ;;  %v8710_v63 = vld [vmem:[#allocation6 + $0x1a4] sm:$0xf]  ;;  %v7265_v3 = vor.u32 %v8694_v58, %v7262_v62  ;;  %v7838_v52 = vld [vmem:[#allocation6 + $0x5b0] sm:$0xf0] }
 0x22e   :  { %4863 = vmatpush.bf16.msrb.mxu1 %v7789_v0  ;;  %v9358_v0 = vpack.c.bf16 %v3236_v16, %v3236_v16  ;;  %v7329_v48 = vor.u32 %v8710_v63, %v7326_v28  ;;  %v3086_v38 = vpop.f32.mrf.mxu0  ;;  %v8044_v16 = vld [vmem:[#allocation6 + $0x740] sm:$0xf]  ;;  %v8658_v28 = vld [vmem:[#allocation6 + $0x4] sm:$0xf] }
 0x22f   :  { %4876 = vmatpush.bf16.msrb.mxu2 %v7917_v6  ;;  %4885 = vmatpush.bf16.msrb.mxu0 %v8109_v60  ;;  %v8092_v6 = vld [vmem:[#allocation6 + $0x7a0] sm:$0xf]  ;;  %v7614_v38 = vld [vmem:[#allocation6 + $0x3f0] sm:$0xf0]  ;;  %v8802_v58 = vld [vmem:[#allocation6 + $0x484] sm:$0xf] }
 0x230   :  { %v8093_v18 = vor.u32 %v8904_v31, %v8092_v6  ;;  %v8888_v6 = vld [vmem:[#allocation6 + $0x72c] sm:$0xf0]  ;;  %v7246_v31 = vld [vmem:[#allocation6 + $0x110] sm:$0xf0] }
 0x231   :  { %4851 = vmatpush.bf16.msrb.mxu3 %v7645_v11  ;;  %v3047_v11 = vpop.f32.mrf.mxu3 }
 0x232   :  { %4864 = vmatpush.bf16.msrb.mxu1 %v7773_v15  ;;  %v7310_v15 = vld [vmem:[#allocation6 + $0x190] sm:$0xf0]  ;;  %v8814_v11 = vld [vmem:[#allocation6 + $0x4e4] sm:$0xf] }
 0x233   :  { %4877 = vmatpush.bf16.msrb.mxu2 %v7901_v45  ;;  %v7313_v24 = vor.u32 %v8706_v13, %v7310_v15  ;;  %4886 = vmatpush.bf16.msrb.mxu0 %v8093_v18  ;;  %v8900_v45 = vld [vmem:[#allocation6 + $0x78c] sm:$0xf0]  ;;  %v7742_v13 = vld [vmem:[#allocation6 + $0x4f0] sm:$0xf0] }
 0x234   :  { %v8077_v51 = vor.u32 %v8900_v45, %v8076_v27  ;;  %v7374_v27 = vld [vmem:[#allocation6 + $0x210] sm:$0xf0]  ;;  %v529_v45 = vperm.slane %v9345_v12, 6 }
 0x235   :  { %4852 = vmatpush.bf16.msrb.mxu3 %v7629_v17  ;;  %v7294_v17 = vld [vmem:[#allocation6 + $0x170] sm:$0xf0] }
 0x236   :  { %4865 = vmatpush.bf16.msrb.mxu1 %v7757_v32  ;;  %v7169_v32 = vor.u32 %v8670_v20, %v7166_v26  ;;  %v7297_v56 = vor.u32 %v8702_v61, %v7294_v17  ;;  %v9369_v18 = vpop.f32.mrf.mxu0  ;;  %v7870_v20 = vld [vmem:[#allocation6 + $0x5f0] sm:$0xf0]  ;;  %v8722_v26 = vld [vmem:[#allocation6 + $0x204] sm:$0xf]  ;;  %v7745_v17 = vor.u32 %v8814_v11, %v7742_v13  ;;  %v3059_v30 = vadd.f32 %v9363_v25, %v529_v45 }
 0x237   :  { %4878 = vmatpush.bf16.msrb.mxu2 %v7885_v35  ;;  %4887 = vmatpush.bf16.msrb.mxu0 %v8077_v51  ;;  %v9367_v35 = vpop.f32.mrf.mxu2  ;;  %v8012_v51 = vld [vmem:[#allocation6 + $0x700] sm:$0xf]  ;;  %v7566_v11 = vld [vmem:[#allocation6 + $0x390] sm:$0xf0]  ;;  %v8830_v13 = vld [vmem:[#allocation6 + $0x564] sm:$0xf] }
 0x238   :  { %4853 = vmatmul.bf16.vlgmr.msrb.gmra.mxu3 %v9355_v46 }
 0x239   :  { %4897 = vmatpush.bf16.msra.mxu3 %v7233_v33  ;;  %4866 = vmatmul.bf16.vlgmr.msrb.gmra.mxu1 %v9358_v0  ;;  %v8666_v33 = vld [vmem:[#allocation6 + $0x44] sm:$0xf]  ;;  %v9365_v37 = vpop.f32.mrf.mxu3 }
 0x23a   :  { %4910 = vmatpush.bf16.msra.mxu1 %v7361_v14  ;;  %v8060_v14 = vld [vmem:[#allocation6 + $0x760] sm:$0xf]  ;;  %v7153_v44 = vor.u32 %v8666_v33, %v7150_v29  ;;  %v8810_v33 = vld [vmem:[#allocation6 + $0x4c4] sm:$0xf] }
 0x23b   :  { %4923 = vmatpush.bf16.msra.mxu2 %v7489_v7  ;;  %v8061_v43 = vor.u32 %v8896_v57, %v8060_v14  ;;  %v8730_v7 = vld [vmem:[#allocation6 + $0x244] sm:$0xf]  ;;  %v7854_v14 = vld [vmem:[#allocation6 + $0x5d0] sm:$0xf0]  ;;  %v7377_v57 = vor.u32 %v8722_v26, %v7374_v27 }
 0x23c   :  { %v8842_v29 = vld [vmem:[#allocation6 + $0x5c4] sm:$0xf]  ;;  %v7550_v27 = vld [vmem:[#allocation6 + $0x370] sm:$0xf0] }
 0x23d   :  { %4898 = vmatpush.bf16.msra.mxu3 %v7217_v47  ;;  %v7406_v47 = vld [vmem:[#allocation6 + $0x250] sm:$0xf0]  ;;  %4888 = vmatpush.bf16.msrb.mxu0 %v8061_v43  ;;  %v7729_v43 = vor.u32 %v8810_v33, %v7726_v34  ;;  %v8766_v26 = vld [vmem:[#allocation6 + $0x364] sm:$0xf] }
 0x23e   :  { %4911 = vmatpush.bf16.msra.mxu1 %v7345_v54  ;;  %v8892_v54 = vld [vmem:[#allocation6 + $0x74c] sm:$0xf0]  ;;  %v7409_v60 = vor.u32 %v8730_v7, %v7406_v47  ;;  %v3138_v7 = vpop.f32.mrf.mxu0  ;;  %v8778_v47 = vld [vmem:[#allocation6 + $0x3c4] sm:$0xf] }
 0x23f   :  { %4924 = vmatpush.bf16.msra.mxu2 %v7473_v1  ;;  %v8045_v63 = vor.u32 %v8892_v54, %v8044_v16  ;;  %v7137_v1 = vor.u32 %v8662_v55, %v7134_v50  ;;  %v3099_v22 = vpop.f32.mrf.mxu2  ;;  %v7710_v55 = vld [vmem:[#allocation6 + $0x4b0] sm:$0xf0]  ;;  %v8838_v50 = vld [vmem:[#allocation6 + $0x5a4] sm:$0xf]  ;;  %v3072_v16 = vadd.f32 %v9365_v37, %v3059_v30 }
 0x240   :  { %v7841_v62 = vor.u32 %v8838_v50, %v7838_v52  ;;  %v7774_v30 = vld [vmem:[#allocation6 + $0x530] sm:$0xf0]  ;;  %v8818_v52 = vld [vmem:[#allocation6 + $0x504] sm:$0xf] }
 0x241   :  { %4899 = vmatpush.bf16.msra.mxu3 %v7201_v2  ;;  %v7118_v2 = vld [vmem:[#allocation6 + $0x10] sm:$0xf0]  ;;  %4889 = vmatpush.bf16.msrb.mxu0 %v8045_v63  ;;  %v3073_v15 = vpop.f32.mrf.mxu3 }
 0x242   :  { %4912 = vmatpush.bf16.msra.mxu1 %v7329_v48  ;;  %v8690_v48 = vld [vmem:[#allocation6 + $0x104] sm:$0xf]  ;;  %v7694_v63 = vld [vmem:[#allocation6 + $0x490] sm:$0xf0] }
 0x243   :  { %4925 = vmatpush.bf16.msra.mxu2 %v7457_v19  ;;  %v8029_v19 = vor.u32 %v8888_v6, %v8028_v5  ;;  %v7249_v61 = vor.u32 %v8690_v48, %v7246_v31  ;;  %v7697_v48 = vor.u32 %v8802_v58, %v7694_v63  ;;  %v8798_v5 = vld [vmem:[#allocation6 + $0x464] sm:$0xf]  ;;  %v7678_v6 = vld [vmem:[#allocation6 + $0x470] sm:$0xf0] }
 0x244   :  { %v8770_v31 = vld [vmem:[#allocation6 + $0x384] sm:$0xf]  ;;  %v7806_v15 = vld [vmem:[#allocation6 + $0x570] sm:$0xf0]  ;;  %v7681_v22 = vor.u32 %v8798_v5, %v7678_v6 }
 0x245   :  { %4900 = vmatpush.bf16.msra.mxu3 %v7185_v21  ;;  %v8846_v21 = vld [vmem:[#allocation6 + $0x5e4] sm:$0xf]  ;;  %4890 = vmatpush.bf16.msrb.mxu0 %v8029_v19  ;;  %v7630_v50 = vld [vmem:[#allocation6 + $0x410] sm:$0xf0] }
 0x246   :  { %4913 = vmatpush.bf16.msra.mxu1 %v7313_v24  ;;  %v7121_v24 = vor.u32 %v8658_v28, %v7118_v2  ;;  %v8774_v28 = vld [vmem:[#allocation6 + $0x3a4] sm:$0xf] }
 0x247   :  { %4926 = vmatpush.bf16.msra.mxu2 %v7441_v9  ;;  %v8884_v9 = vld [vmem:[#allocation6 + $0x70c] sm:$0xf0]  ;;  %v8834_v2 = vld [vmem:[#allocation6 + $0x584] sm:$0xf] }
 0x248   :  { %v8013_v36 = vor.u32 %v8884_v9, %v8012_v51  ;;  %v7825_v37 = vor.u32 %v8834_v2, %v7822_v59  ;;  %v8758_v58 = vld [vmem:[#allocation6 + $0x324] sm:$0xf]  ;;  %v7982_v59 = vld [vmem:[#allocation6 + $0x6d0] sm:$0xf0] }
 0x249   :  { %4901 = vmatpush.bf16.msra.mxu3 %v7169_v32  ;;  %v7873_v32 = vor.u32 %v8846_v21, %v7870_v20  ;;  %v7569_v21 = vor.u32 %v8770_v31, %v7566_v11  ;;  %v8874_v2 = vld [vmem:[#allocation6 + $0x6c4] sm:$0xf]  ;;  %v7220_v31 = vld [vmem:[#allocation6 + $0xc8] sm:$0xf] }
 0x24a   :  { %4914 = vmatpush.bf16.msra.mxu1 %v7297_v56  ;;  %v8782_v56 = vld [vmem:[#allocation6 + $0x3e4] sm:$0xf]  ;;  %4891 = vmatpush.bf16.msrb.mxu0 %v8013_v36  ;;  %v9377_v19 = vpop.f32.mrf.mxu0 }
 0x24b   :  { %4927 = vmatpush.bf16.msra.mxu2 %v7425_v42  ;;  %v7617_v39 = vor.u32 %v8782_v56, %v7614_v38  ;;  %v8806_v42 = vld [vmem:[#allocation6 + $0x4a4] sm:$0xf]  ;;  %v7534_v38 = vld [vmem:[#allocation6 + $0x350] sm:$0xf0] }
 0x24c   :  { %v7713_v54 = vor.u32 %v8806_v42, %v7710_v55  ;;  %v8790_v36 = vld [vmem:[#allocation6 + $0x424] sm:$0xf]  ;;  %v7998_v42 = vld [vmem:[#allocation6 + $0x6f0] sm:$0xf0] }
 0x24d   :  { %4902 = vmatpush.bf16.msra.mxu3 %v7153_v44  ;;  %v7857_v44 = vor.u32 %v8842_v29, %v7854_v14  ;;  %v8822_v14 = vld [vmem:[#allocation6 + $0x524] sm:$0xf] }
 0x24e   :  { %4915 = vmatpush.bf16.msra.mxu1 %v7281_v49  ;;  %v7598_v49 = vld [vmem:[#allocation6 + $0x3d0] sm:$0xf0]  ;;  %4936 = vmatpush.bf16.msra.mxu0 %v7617_v39  ;;  %v8786_v55 = vld [vmem:[#allocation6 + $0x404] sm:$0xf] }
 0x24f   :  { %4928 = vmatpush.bf16.msra.mxu2 %v7409_v60  ;;  %v7601_v25 = vor.u32 %v8778_v47, %v7598_v49  ;;  %v7582_v60 = vld [vmem:[#allocation6 + $0x3b0] sm:$0xf0]  ;;  %v3123_v9 = vpop.f32.mrf.mxu3  ;;  %v8754_v11 = vld [vmem:[#allocation6 + $0x304] sm:$0xf] }
 0x250   :  { %v7585_v53 = vor.u32 %v8774_v28, %v7582_v60  ;;  %v8689_v28 = vld [vmem:[#allocation6 + $0xf4] sm:$0xf0]  ;;  %v7364_v60 = vld [vmem:[#allocation6 + $0x1e8] sm:$0xf] }
 0x251   :  { %4903 = vmatpush.bf16.msra.mxu3 %v7137_v1  ;;  %v3110_v1 = vpop.f32.mrf.mxu1  ;;  %v9380_v56 = vpop.f32.mrf.mxu2 }
 0x252   :  { %4916 = vmatpush.bf16.msra.mxu1 %v7265_v3  ;;  %4937 = vmatpush.bf16.msra.mxu0 %v7601_v25  ;;  %v3085_v3 = vadd.f32 %v9361_v40, %v3072_v16  ;;  %v7809_v40 = vor.u32 %v8830_v13, %v7806_v15  ;;  %v7777_v25 = vor.u32 %v8822_v14, %v7774_v30  ;;  %v8709_v30 = vld [vmem:[#allocation6 + $0x194] sm:$0xf0] }
 0x253   :  { %4929 = vmatpush.bf16.msra.mxu2 %v7393_v23  ;;  %v8794_v23 = vld [vmem:[#allocation6 + $0x444] sm:$0xf]  ;;  %v7985_v15 = vor.u32 %v8874_v2, %v7982_v59  ;;  %v7284_v2 = vld [vmem:[#allocation6 + $0x148] sm:$0xf]  ;;  %v8701_v59 = vld [vmem:[#allocation6 + $0x154] sm:$0xf0] }
 0x254   :  { %v3098_v20 = vadd.f32 %v9367_v35, %v3085_v3  ;;  %v7646_v35 = vld [vmem:[#allocation6 + $0x430] sm:$0xf0] }
 0x255   :  { %4904 = vmatpush.bf16.msra.mxu3 %v7121_v24  ;;  %v7662_v24 = vld [vmem:[#allocation6 + $0x450] sm:$0xf0]  ;;  %v7649_v49 = vor.u32 %v8790_v36, %v7646_v35  ;;  %v530_v36 = vperm.slane %v9345_v12, 7 }
 0x256   :  { %4917 = vmatpush.bf16.msra.mxu1 %v7249_v61  ;;  %4938 = vmatpush.bf16.msra.mxu0 %v7585_v53  ;;  %v3111_v45 = vadd.f32 %v3110_v1, %v3098_v20  ;;  %v8826_v61 = vld [vmem:[#allocation6 + $0x544] sm:$0xf]  ;;  %v7665_v34 = vor.u32 %v8794_v23, %v7662_v24  ;;  %v8721_v1 = vld [vmem:[#allocation6 + $0x1f4] sm:$0xf0]  ;;  %v7348_v20 = vld [vmem:[#allocation6 + $0x1c8] sm:$0xf] }
 0x257   :  { %4930 = vmatpush.bf16.msra.mxu2 %v7377_v57  ;;  %v8762_v57 = vld [vmem:[#allocation6 + $0x344] sm:$0xf]  ;;  %v3125_v53 = vpop.f32.mrf.mxu3  ;;  %v7365_v13 = vor.u32 %v8721_v1, %v7364_v60  ;;  %v8717_v23 = vld [vmem:[#allocation6 + $0x1d4] sm:$0xf0]  ;;  %v7966_v24 = vld [vmem:[#allocation6 + $0x6b0] sm:$0xf0] }
 0x258   :  { %4905 = vmatmul.bf16.vlgmr.msra.gmra.mxu3 %v9334_v4  ;;  %v3124_v33 = vadd.f32 %v3123_v9, %v3111_v45  ;;  %v7537_v7 = vor.u32 %v8762_v57, %v7534_v38  ;;  %v7349_v45 = vor.u32 %v8717_v23, %v7348_v20  ;;  %v7332_v9 = vld [vmem:[#allocation6 + $0x1a8] sm:$0xf]  ;;  %v8677_v38 = vld [vmem:[#allocation6 + $0x94] sm:$0xf0]  ;;  %v8854_v53 = vld [vmem:[#allocation6 + $0x624] sm:$0xf] }
 0x259   :  { %4949 = vmatpush.bf16.msrb.mxu3 %v7745_v17  ;;  %4918 = vmatmul.bf16.vlgmr.msra.gmra.mxu1 %v9336_v41  ;;  %v7790_v17 = vld [vmem:[#allocation6 + $0x550] sm:$0xf0]  ;;  %v3112_v51 = vpop.f32.mrf.mxu1  ;;  %v3151_v5 = vpop.f32.mrf.mxu2  ;;  %v7188_v57 = vld [vmem:[#allocation6 + $0x88] sm:$0xf]  ;;  %v8669_v1 = vld [vmem:[#allocation6 + $0x54] sm:$0xf0] }
 0x25a   :  { %4962 = vmatpush.bf16.msrb.mxu1 %v7873_v32  ;;  %4939 = vmatpush.bf16.msra.mxu0 %v7569_v21  ;;  %v7553_v32 = vor.u32 %v8766_v26, %v7550_v27  ;;  %v7793_v29 = vor.u32 %v8826_v61, %v7790_v17  ;;  %v3137_v39 = vadd.f32 %v9369_v18, %v3124_v33  ;;  %v7236_v18 = vld [vmem:[#allocation6 + $0xe8] sm:$0xf]  ;;  %v8685_v21 = vld [vmem:[#allocation6 + $0xd4] sm:$0xf0]  ;;  %v8866_v33 = vld [vmem:[#allocation6 + $0x684] sm:$0xf] }
 0x25b   :  { %v7237_v6 = vor.u32 %v8689_v28, %v7236_v18  ;;  %v7221_v27 = vor.u32 %v8685_v21, %v7220_v31  ;;  %v7204_v17 = vld [vmem:[#allocation6 + $0xa8] sm:$0xf]  ;;  %v8681_v51 = vld [vmem:[#allocation6 + $0xb4] sm:$0xf0]  ;;  %v8850_v23 = vld [vmem:[#allocation6 + $0x604] sm:$0xf] }
 0x25c   :  { %v3237_v47 = vmax.f32 %v3137_v39, 0.0  ;;  %v7205_v35 = vor.u32 %v8681_v51, %v7204_v17  ;;  %v7316_v39 = vld [vmem:[#allocation6 + $0x188] sm:$0xf]  ;;  %v8665_v21 = vld [vmem:[#allocation6 + $0x34] sm:$0xf0] }
 0x25d   :  { %4950 = vmatpush.bf16.msrb.mxu3 %v7729_v43  ;;  %v8878_v43 = vld [vmem:[#allocation6 + $0x6e4] sm:$0xf]  ;;  %v7317_v12 = vor.u32 %v8709_v30, %v7316_v39  ;;  %v7156_v60 = vld [vmem:[#allocation6 + $0x48] sm:$0xf]  ;;  %v8849_v39 = vld [vmem:[#allocation6 + $0x5f4] sm:$0xf0] }
 0x25e   :  { %4963 = vmatpush.bf16.msrb.mxu1 %v7857_v44  ;;  %v3164_v44 = vpop.f32.mrf.mxu0  ;;  %4940 = vmatpush.bf16.msra.mxu0 %v7553_v32  ;;  %v8001_v16 = vor.u32 %v8878_v43, %v7998_v42  ;;  %v9383_v63 = vpack.c.bf16 %v3237_v47, %v3237_v47  ;;  %v8713_v32 = vld [vmem:[#allocation6 + $0x1b4] sm:$0xf0]  ;;  %v8862_v43 = vld [vmem:[#allocation6 + $0x664] sm:$0xf]  ;;  %v7934_v42 = vld [vmem:[#allocation6 + $0x670] sm:$0xf0] }
 0x25f   :  { %v3150_v44 = vadd.f32 %v9380_v56, %v530_v36  ;;  %v7937_v47 = vor.u32 %v8862_v43, %v7934_v42  ;;  %v7268_v20 = vld [vmem:[#allocation6 + $0x128] sm:$0xf]  ;;  %v8693_v36 = vld [vmem:[#allocation6 + $0x114] sm:$0xf0] }
 0x260   :  { %4879 = vmatmul.bf16.vlgmr.msrb.gmra.mxu2 %v9383_v63  ;;  %v7124_v17 = vld [vmem:[#allocation6 + $0x8] sm:$0xf]  ;;  %v8749_v43 = vld [vmem:[#allocation6 + $0x2d4] sm:$0xf0] }
 0x261   :  { %4951 = vmatpush.bf16.msrb.mxu3 %v7713_v54  ;;  %v7758_v54 = vld [vmem:[#allocation6 + $0x510] sm:$0xf0]  ;;  %4975 = vmatpush.bf16.msrb.mxu2 %v8001_v16  ;;  %v8858_v16 = vld [vmem:[#allocation6 + $0x644] sm:$0xf]  ;;  %v7476_v30 = vld [vmem:[#allocation6 + $0x2c8] sm:$0xf] }
 0x262   :  { %4964 = vmatpush.bf16.msrb.mxu1 %v7841_v62  ;;  %v7518_v62 = vld [vmem:[#allocation6 + $0x330] sm:$0xf0]  ;;  %4941 = vmatpush.bf16.msra.mxu0 %v7537_v7  ;;  %v7189_v7 = vor.u32 %v8677_v38, %v7188_v57  ;;  %v7876_v57 = vld [vmem:[#allocation6 + $0x5e8] sm:$0xf] }
 0x263   :  { %v7521_v3 = vor.u32 %v8758_v58, %v7518_v62  ;;  %v3163_v58 = vadd.f32 %v9377_v19, %v3150_v44  ;;  %v7157_v19 = vor.u32 %v8669_v1, %v7156_v60 }
 0x265   :  { %4952 = vmatpush.bf16.msrb.mxu3 %v7697_v48  ;;  %v7633_v48 = vor.u32 %v8786_v55, %v7630_v50  ;;  %4976 = vmatpush.bf16.msrb.mxu2 %v7985_v15  ;;  %v8673_v50 = vld [vmem:[#allocation6 + $0x74] sm:$0xf0]  ;;  %v7140_v15 = vld [vmem:[#allocation6 + $0x28] sm:$0xf] }
 0x266   :  { %4965 = vmatpush.bf16.msrb.mxu1 %v7825_v37  ;;  %v7761_v37 = vor.u32 %v8818_v52, %v7758_v54  ;;  %4942 = vmatpush.bf16.msra.mxu0 %v7521_v3  ;;  %v7300_v52 = vld [vmem:[#allocation6 + $0x168] sm:$0xf]  ;;  %v7918_v54 = vld [vmem:[#allocation6 + $0x650] sm:$0xf0] }
 0x267   :  { %v7921_v28 = vor.u32 %v8858_v16, %v7918_v54  ;;  %v7902_v3 = vld [vmem:[#allocation6 + $0x630] sm:$0xf0]  ;;  %v7877_v16 = vor.u32 %v8849_v39, %v7876_v57  ;;  %v7477_v54 = vor.u32 %v8749_v43, %v7476_v30  ;;  %v9398_v57 = vld [vmem:[#allocation7] sm:$0xf]  ;;  %v7412_v39 = vld [vmem:[#allocation6 + $0x248] sm:$0xf] }
 0x268   :  { %v8733_v30 = vld [vmem:[#allocation6 + $0x254] sm:$0xf0] }
 0x269   :  { %4953 = vmatpush.bf16.msrb.mxu3 %v7681_v22  ;;  %v7502_v22 = vld [vmem:[#allocation6 + $0x310] sm:$0xf0] }
 0x26a   :  { %4966 = vmatpush.bf16.msrb.mxu1 %v7809_v40  ;;  %v8870_v40 = vld [vmem:[#allocation6 + $0x6a4] sm:$0xf]  ;;  %v7505_v26 = vor.u32 %v8754_v11, %v7502_v22  ;;  %v7285_v11 = vor.u32 %v8701_v59, %v7284_v2  ;;  %v8697_v22 = vld [vmem:[#allocation6 + $0x134] sm:$0xf0] }
 0x26b   :  { %v7969_v61 = vor.u32 %v8870_v40, %v7966_v24  ;;  %v7886_v40 = vld [vmem:[#allocation6 + $0x610] sm:$0xf0]  ;;  %v8906_v59 = vld [vmem:[#allocation6 + $0x7c4] sm:$0xf] }
 0x26c   :  { %4943 = vmatpush.bf16.msra.mxu0 %v7505_v26 }
 0x26d   :  { %4954 = vmatpush.bf16.msrb.mxu3 %v7665_v34  ;;  %v7950_v34 = vld [vmem:[#allocation6 + $0x690] sm:$0xf0]  ;;  %4977 = vmatpush.bf16.msrb.mxu2 %v7969_v61  ;;  %v7141_v61 = vor.u32 %v8665_v21, %v7140_v15 }
 0x26e   :  { %4967 = vmatpush.bf16.msrb.mxu1 %v7793_v29  ;;  %v7333_v29 = vor.u32 %v8713_v32, %v7332_v9  ;;  %v7953_v14 = vor.u32 %v8866_v33, %v7950_v34  ;;  %v7269_v9 = vor.u32 %v8697_v22, %v7268_v20  ;;  %v7889_v32 = vor.u32 %v8850_v23, %v7886_v40  ;;  %v8661_v33 = vld [vmem:[#allocation6 + $0x14] sm:$0xf0]  ;;  %v7252_v34 = vld [vmem:[#allocation6 + $0x108] sm:$0xf]  ;;  %v8902_v20 = vld [vmem:[#allocation6 + $0x7a4] sm:$0xf] }
 0x26f   :  { %v8094_v22 = vld [vmem:[#allocation6 + $0x7b0] sm:$0xf0] }
 0x270   :  { %4931 = vmatmul.bf16.vlgmr.msra.gmra.mxu2 %v9338_v8 }
 0x271   :  { %4955 = vmatpush.bf16.msrb.mxu3 %v7649_v49  ;;  %v3175_v55 = vpop.f32.mrf.mxu1  ;;  %4978 = vmatpush.bf16.msrb.mxu2 %v7953_v14  ;;  %v7172_v49 = vld [vmem:[#allocation6 + $0x68] sm:$0xf]  ;;  %v8817_v14 = vld [vmem:[#allocation6 + $0x4f4] sm:$0xf0] }
 0x272   :  { %4968 = vmatpush.bf16.msrb.mxu1 %v7777_v25  ;;  %v8705_v25 = vld [vmem:[#allocation6 + $0x174] sm:$0xf0]  ;;  %v7173_v56 = vor.u32 %v8673_v50, %v7172_v49  ;;  %v8910_v49 = vld [vmem:[#allocation6 + $0x7e4] sm:$0xf]  ;;  %v8126_v50 = vld [vmem:[#allocation6 + $0x7f0] sm:$0xf0] }
 0x273   :  { %v7301_v18 = vor.u32 %v8705_v25, %v7300_v52  ;;  %v7732_v52 = vld [vmem:[#allocation6 + $0x4c8] sm:$0xf]  ;;  %v8129_v1 = vor.u32 %v8910_v49, %v8126_v50  ;;  %v7413_v50 = vor.u32 %v8733_v30, %v7412_v39  ;;  %v8877_v39 = vld [vmem:[#allocation6 + $0x6d4] sm:$0xf0] }
 0x275   :  { %4956 = vmatpush.bf16.msrb.mxu3 %v7633_v48  ;;  %4979 = vmatpush.bf16.msrb.mxu2 %v7937_v47  ;;  %v3176_v48 = vadd.f32 %v3175_v55, %v3163_v58  ;;  %v7125_v55 = vor.u32 %v8661_v33, %v7124_v17  ;;  %v8813_v58 = vld [vmem:[#allocation6 + $0x4d4] sm:$0xf0]  ;;  %v8078_v33 = vld [vmem:[#allocation6 + $0x790] sm:$0xf0] }
 0x276   :  { %4969 = vmatpush.bf16.msrb.mxu1 %v7761_v37  ;;  %v7733_v2 = vor.u32 %v8813_v58, %v7732_v52  ;;  %v8737_v17 = vld [vmem:[#allocation6 + $0x274] sm:$0xf0]  ;;  %v7668_v52 = vld [vmem:[#allocation6 + $0x448] sm:$0xf] }
 0x277   :  { %v7396_v58 = vld [vmem:[#allocation6 + $0x228] sm:$0xf] }
 0x278   :  { %4957 = vmatmul.bf16.vlgmr.msrb.gmra.mxu3 %v9355_v46 }
 0x279   :  { %5001 = vmatpush.bf16.msra.mxu3 %v7237_v6  ;;  %4970 = vmatmul.bf16.vlgmr.msrb.gmra.mxu1 %v9358_v0  ;;  %v3214_v62 = vpop.f32.mrf.mxu0  ;;  %v3177_v5 = vpop.f32.mrf.mxu1 }
 0x27a   :  { %5014 = vmatpush.bf16.msra.mxu1 %v7365_v13  ;;  %4980 = vmatpush.bf16.msrb.mxu2 %v7921_v28  ;;  %v7905_v13 = vor.u32 %v8854_v53, %v7902_v3  ;;  %v8745_v28 = vld [vmem:[#allocation6 + $0x2b4] sm:$0xf0]  ;;  %v8110_v53 = vld [vmem:[#allocation6 + $0x7d0] sm:$0xf0]  ;;  %v7716_v5 = vld [vmem:[#allocation6 + $0x4a8] sm:$0xf] }
 0x27b   :  { %v3188_v37 = vpop.f32.mrf.mxu3  ;;  %v8113_v15 = vor.u32 %v8906_v59, %v8110_v53 }
 0x27c   :  { %v3189_v6 = vadd.f32 %v3188_v37, %v3176_v48  ;;  %v8809_v37 = vld [vmem:[#allocation6 + $0x4b4] sm:$0xf0] }
 0x27d   :  { %5002 = vmatpush.bf16.msra.mxu3 %v7221_v27  ;;  %v3201_v31 = vpop.f32.mrf.mxu2  ;;  %v7492_v27 = vld [vmem:[#allocation6 + $0x2e8] sm:$0xf]  ;;  %v7717_v21 = vor.u32 %v8809_v37, %v7716_v5  ;;  %v8793_v37 = vld [vmem:[#allocation6 + $0x434] sm:$0xf0] }
 0x27e   :  { %5015 = vmatpush.bf16.msra.mxu1 %v7349_v45  ;;  %v3202_v24 = vadd.f32 %v3201_v31, %v3189_v6  ;;  %v8753_v45 = vld [vmem:[#allocation6 + $0x2f4] sm:$0xf0]  ;;  %4981 = vmatpush.bf16.msrb.mxu2 %v7905_v13  ;;  %v7652_v5 = vld [vmem:[#allocation6 + $0x428] sm:$0xf] }
 0x27f   :  { %v8841_v31 = vld [vmem:[#allocation6 + $0x5b4] sm:$0xf0] }
 0x280   :  { %v3215_v51 = vadd.f32 %v3214_v62, %v3202_v24  ;;  %v7860_v62 = vld [vmem:[#allocation6 + $0x5c8] sm:$0xf]  ;;  %v8741_v13 = vld [vmem:[#allocation6 + $0x294] sm:$0xf0] }
 0x281   :  { %5003 = vmatpush.bf16.msra.mxu3 %v7205_v35  ;;  %v3216_v26 = vpop.f32.mrf.mxu0  ;;  %v7493_v35 = vor.u32 %v8753_v45, %v7492_v27  ;;  %v3227_v38 = vpop.f32.mrf.mxu1  ;;  %v7700_v24 = vld [vmem:[#allocation6 + $0x488] sm:$0xf]  ;;  %v8837_v45 = vld [vmem:[#allocation6 + $0x594] sm:$0xf0] }
 0x282   :  { %5016 = vmatpush.bf16.msra.mxu1 %v7333_v29  ;;  %v7748_v29 = vld [vmem:[#allocation6 + $0x4e8] sm:$0xf]  ;;  %v3228_v42 = vadd.f32 %v3227_v38, %v3215_v51  ;;  %4982 = vmatpush.bf16.msrb.mxu2 %v7889_v32  ;;  %v8805_v26 = vld [vmem:[#allocation6 + $0x494] sm:$0xf0]  ;;  %v8097_v51 = vor.u32 %v8902_v20, %v8094_v22  ;;  %v8898_v32 = vld [vmem:[#allocation6 + $0x784] sm:$0xf] }
 0x283   :  { %v3190_v44 = vpop.f32.mrf.mxu3  ;;  %v7749_v47 = vor.u32 %v8817_v14, %v7748_v29  ;;  %v7828_v27 = vld [vmem:[#allocation6 + $0x588] sm:$0xf]  ;;  %v8801_v29 = vld [vmem:[#allocation6 + $0x474] sm:$0xf0] }
 0x284   :  { %v3238_v25 = vmax.f32 %v3228_v42, 0.0  ;;  %v7812_v14 = vld [vmem:[#allocation6 + $0x568] sm:$0xf]  ;;  %v8833_v38 = vld [vmem:[#allocation6 + $0x574] sm:$0xf0]  ;;  %v8081_v42 = vor.u32 %v8898_v32, %v8078_v33 }
 0x285   :  { %5004 = vmatpush.bf16.msra.mxu3 %v7189_v7  ;;  %v3203_v7 = vpop.f32.mrf.mxu2  ;;  %4983 = vmatmul.bf16.vlgmr.msrb.gmra.mxu2 %v9383_v63  ;;  %v7813_v49 = vor.u32 %v8833_v38, %v7812_v14  ;;  %v8004_v20 = vld [vmem:[#allocation6 + $0x6e8] sm:$0xf]  ;;  %v8881_v22 = vld [vmem:[#allocation6 + $0x6f4] sm:$0xf0]  ;;  %v7366_v14 = vld [vmem:[#allocation6 + $0x1f8] sm:$0xf0] }
 0x286   :  { %5017 = vmatpush.bf16.msra.mxu1 %v7317_v12  ;;  %v7253_v12 = vor.u32 %v8693_v36, %v7252_v34  ;;  %5027 = vmatpush.bf16.msra.mxu2 %v7493_v35  ;;  %v9392_v60 = vpack.c.bf16 %v3238_v25, %v3238_v25  ;;  %v7684_v34 = vld [vmem:[#allocation6 + $0x468] sm:$0xf]  ;;  %v7829_v36 = vor.u32 %v8837_v45, %v7828_v27  ;;  %v3505_v7 = vperm.slane %v9398_v57, 0  ;;  %v8797_v25 = vld [vmem:[#allocation6 + $0x454] sm:$0xf0] }
 0x287   :  { %v7636_v27 = vld [vmem:[#allocation6 + $0x408] sm:$0xf]  ;;  %v8821_v32 = vld [vmem:[#allocation6 + $0x514] sm:$0xf0]  ;;  %v8005_v33 = vor.u32 %v8881_v22, %v8004_v20 }
 0x288   :  { %4892 = vmatmul.bf16.vlgmr.msrb.gmra.mxu0 %v9392_v60  ;;  %v7988_v38 = vld [vmem:[#allocation6 + $0x6c8] sm:$0xf]  ;;  %v8777_v20 = vld [vmem:[#allocation6 + $0x3b4] sm:$0xf0] }
 0x289   :  { %5005 = vmatpush.bf16.msra.mxu3 %v7173_v56  ;;  %v8845_v56 = vld [vmem:[#allocation6 + $0x5d4] sm:$0xf0]  ;;  %v3229_v6 = vpop.f32.mrf.mxu1  ;;  %4988 = vmatpush.bf16.msrb.mxu0 %v8129_v1  ;;  %v8890_v1 = vld [vmem:[#allocation6 + $0x744] sm:$0xf] }
 0x28a   :  { %5018 = vmatpush.bf16.msra.mxu1 %v7301_v18  ;;  %v7460_v18 = vld [vmem:[#allocation6 + $0x2a8] sm:$0xf]  ;;  %5028 = vmatpush.bf16.msra.mxu2 %v7477_v54  ;;  %v7861_v3 = vor.u32 %v8845_v56, %v7860_v62  ;;  %v8829_v54 = vld [vmem:[#allocation6 + $0x554] sm:$0xf0] }
 0x28b   :  { %v7461_v48 = vor.u32 %v8745_v28, %v7460_v18  ;;  %v8729_v62 = vld [vmem:[#allocation6 + $0x234] sm:$0xf0]  ;;  %v7669_v28 = vor.u32 %v8797_v25, %v7668_v52 }
 0x28c   :  { %v8825_v6 = vld [vmem:[#allocation6 + $0x534] sm:$0xf0] }
 0x28d   :  { %5006 = vmatpush.bf16.msra.mxu3 %v7157_v19  ;;  %v7844_v19 = vld [vmem:[#allocation6 + $0x5a8] sm:$0xf]  ;;  %4989 = vmatpush.bf16.msrb.mxu0 %v8113_v15  ;;  %v8785_v52 = vld [vmem:[#allocation6 + $0x3f4] sm:$0xf0] }
 0x28e   :  { %5019 = vmatpush.bf16.msra.mxu1 %v7285_v11  ;;  %v7444_v11 = vld [vmem:[#allocation6 + $0x288] sm:$0xf]  ;;  %5029 = vmatpush.bf16.msra.mxu2 %v7461_v48  ;;  %v7845_v23 = vor.u32 %v8841_v31, %v7844_v19  ;;  %v7397_v48 = vor.u32 %v8729_v62, %v7396_v58  ;;  %v7222_v58 = vld [vmem:[#allocation6 + $0xd8] sm:$0xf0]  ;;  %v8715_v62 = vld [vmem:[#allocation6 + $0x1cc] sm:$0xf] }
 0x28f   :  { %v7445_v40 = vor.u32 %v8741_v13, %v7444_v11  ;;  %v7780_v19 = vld [vmem:[#allocation6 + $0x528] sm:$0xf]  ;;  %v8725_v11 = vld [vmem:[#allocation6 + $0x214] sm:$0xf0] }
 0x290   :  { %v7380_v31 = vld [vmem:[#allocation6 + $0x208] sm:$0xf] }
 0x291   :  { %5007 = vmatpush.bf16.msra.mxu3 %v7141_v61  ;;  %v7428_v61 = vld [vmem:[#allocation6 + $0x268] sm:$0xf]  ;;  %4990 = vmatpush.bf16.msrb.mxu0 %v8097_v51  ;;  %v8789_v51 = vld [vmem:[#allocation6 + $0x414] sm:$0xf0] }
 0x292   :  { %5020 = vmatpush.bf16.msra.mxu1 %v7269_v9  ;;  %v7701_v9 = vor.u32 %v8805_v26, %v7700_v24  ;;  %5030 = vmatpush.bf16.msra.mxu2 %v7445_v40  ;;  %v7429_v35 = vor.u32 %v8737_v17, %v7428_v61  ;;  %v7653_v40 = vor.u32 %v8793_v37, %v7652_v5  ;;  %v8886_v24 = vld [vmem:[#allocation6 + $0x724] sm:$0xf]  ;;  %v8030_v26 = vld [vmem:[#allocation6 + $0x730] sm:$0xf0]  ;;  %v7206_v5 = vld [vmem:[#allocation6 + $0xb8] sm:$0xf0] }
 0x293   :  { %v7781_v61 = vor.u32 %v8825_v6, %v7780_v19  ;;  %v7381_v17 = vor.u32 %v8725_v11, %v7380_v31  ;;  %v8711_v19 = vld [vmem:[#allocation6 + $0x1ac] sm:$0xf]  ;;  %v7334_v6 = vld [vmem:[#allocation6 + $0x1b8] sm:$0xf0]  ;;  %v7956_v11 = vld [vmem:[#allocation6 + $0x688] sm:$0xf] }
 0x294   :  { %v7337_v22 = vor.u32 %v8711_v19, %v7334_v6  ;;  %v7892_v19 = vld [vmem:[#allocation6 + $0x608] sm:$0xf]  ;;  %v8853_v6 = vld [vmem:[#allocation6 + $0x614] sm:$0xf0] }
 0x295   :  { %5008 = vmatpush.bf16.msra.mxu3 %v7125_v55  ;;  %v7685_v55 = vor.u32 %v8801_v29, %v7684_v34  ;;  %4991 = vmatpush.bf16.msrb.mxu0 %v8081_v42  ;;  %v8687_v34 = vld [vmem:[#allocation6 + $0xec] sm:$0xf]  ;;  %v8033_v29 = vor.u32 %v8886_v24, %v8030_v26  ;;  %v7637_v42 = vor.u32 %v8789_v51, %v7636_v27  ;;  %v7318_v27 = vld [vmem:[#allocation6 + $0x198] sm:$0xf0] }
 0x296   :  { %5021 = vmatpush.bf16.msra.mxu1 %v7253_v12  ;;  %v8894_v12 = vld [vmem:[#allocation6 + $0x764] sm:$0xf]  ;;  %5031 = vmatpush.bf16.msra.mxu2 %v7429_v35  ;;  %v8719_v35 = vld [vmem:[#allocation6 + $0x1ec] sm:$0xf] }
 0x297   :  { %v7369_v25 = vor.u32 %v8719_v35, %v7366_v14  ;;  %v8707_v26 = vld [vmem:[#allocation6 + $0x18c] sm:$0xf]  ;;  %v7302_v14 = vld [vmem:[#allocation6 + $0x178] sm:$0xf0] }
 0x298   :  { %5009 = vmatmul.bf16.vlgmr.msra.gmra.mxu3 %v9334_v4  ;;  %v4815_v43 = vpop.f32.mrf.mxu1  ;;  %4944 = vmatmul.bf16.vlgmr.msra.gmra.mxu0 %v9340_v10 }
 0x299   :  { %5053 = vmatpush.bf16.msrb.mxu3 %v7749_v47  ;;  %5022 = vmatmul.bf16.vlgmr.msra.gmra.mxu1 %v9336_v41  ;;  %v9400_v44 = vpop.f32.mrf.mxu0  ;;  %v8062_v47 = vld [vmem:[#allocation6 + $0x770] sm:$0xf0] }
 0x29a   :  { %5066 = vmatpush.bf16.msrb.mxu1 %v7877_v16  ;;  %v7796_v16 = vld [vmem:[#allocation6 + $0x548] sm:$0xf]  ;;  %v8065_v56 = vor.u32 %v8894_v12, %v8062_v47  ;;  %5032 = vmatpush.bf16.msra.mxu2 %v7413_v50 }
 0x29b   :  { %v4802_v18 = vpop.f32.mrf.mxu3  ;;  %v7620_v50 = vld [vmem:[#allocation6 + $0x3e8] sm:$0xf] }
 0x29c   :  { %v4803_v59 = vadd.f32 %v4802_v18, %v3505_v7  ;;  %4992 = vmatpush.bf16.msrb.mxu0 %v8065_v56  ;;  %v8014_v7 = vld [vmem:[#allocation6 + $0x710] sm:$0xf0]  ;;  %v7350_v56 = vld [vmem:[#allocation6 + $0x1d8] sm:$0xf0]  ;;  %v7621_v18 = vor.u32 %v8785_v52, %v7620_v50  ;;  %v8699_v52 = vld [vmem:[#allocation6 + $0x14c] sm:$0xf] }
 0x29d   :  { %5054 = vmatpush.bf16.msrb.mxu3 %v7733_v2  ;;  %v8046_v2 = vld [vmem:[#allocation6 + $0x750] sm:$0xf0]  ;;  %v4828_v53 = vpop.f32.mrf.mxu2 }
 0x29e   :  { %5067 = vmatpush.bf16.msrb.mxu1 %v7861_v3  ;;  %v7797_v3 = vor.u32 %v8829_v54, %v7796_v16  ;;  %v4816_v13 = vadd.f32 %v4815_v43, %v4803_v59  ;;  %5033 = vmatpush.bf16.msra.mxu2 %v7397_v48  ;;  %v7989_v16 = vor.u32 %v8877_v39, %v7988_v38  ;;  %v8683_v54 = vld [vmem:[#allocation6 + $0xcc] sm:$0xf]  ;;  %v7604_v59 = vld [vmem:[#allocation6 + $0x3c8] sm:$0xf] }
 0x29f   :  { %v8679_v48 = vld [vmem:[#allocation6 + $0xac] sm:$0xf]  ;;  %v7924_v39 = vld [vmem:[#allocation6 + $0x648] sm:$0xf] }
 0x2a0   :  { %v4817_v15 = vpop.f32.mrf.mxu1  ;;  %v4829_v45 = vadd.f32 %v4828_v53, %v4816_v13  ;;  %v8781_v53 = vld [vmem:[#allocation6 + $0x3d4] sm:$0xf0] }
 0x2a1   :  { %5055 = vmatpush.bf16.msrb.mxu3 %v7717_v21  ;;  %v8049_v21 = vor.u32 %v8890_v1, %v8046_v2  ;;  %v8873_v1 = vld [vmem:[#allocation6 + $0x6b4] sm:$0xf0]  ;;  %v7225_v2 = vor.u32 %v8683_v54, %v7222_v58  ;;  %v7605_v31 = vor.u32 %v8781_v53, %v7604_v59  ;;  %v7209_v15 = vor.u32 %v8679_v48, %v7206_v5  ;;  %v7908_v58 = vld [vmem:[#allocation6 + $0x628] sm:$0xf]  ;;  %v7142_v59 = vld [vmem:[#allocation6 + $0x38] sm:$0xf0] }
 0x2a2   :  { %5068 = vmatpush.bf16.msrb.mxu1 %v7845_v23  ;;  %v4843_v23 = vpop.f32.mrf.mxu0  ;;  %v9405_v30 = vadd.f32 %v9400_v44, %v4829_v45  ;;  %5034 = vmatpush.bf16.msra.mxu2 %v7381_v17  ;;  %v8869_v13 = vld [vmem:[#allocation6 + $0x694] sm:$0xf0]  ;;  %v8695_v48 = vld [vmem:[#allocation6 + $0x12c] sm:$0xf]  ;;  %v7270_v5 = vld [vmem:[#allocation6 + $0x138] sm:$0xf0] }
 0x2a3   :  { %4993 = vmatpush.bf16.msrb.mxu0 %v8049_v21  ;;  %v4804_v43 = vpop.f32.mrf.mxu3  ;;  %v7588_v21 = vld [vmem:[#allocation6 + $0x3a8] sm:$0xf]  ;;  %v8675_v23 = vld [vmem:[#allocation6 + $0x8c] sm:$0xf]  ;;  %v7957_v24 = vor.u32 %v8869_v13, %v7956_v11  ;;  %v8865_v17 = vld [vmem:[#allocation6 + $0x674] sm:$0xf0] }
 0x2a4   :  { %v7589_v45 = vor.u32 %v8777_v20, %v7588_v21  ;;  %v8861_v43 = vld [vmem:[#allocation6 + $0x654] sm:$0xf0]  ;;  %v8751_v21 = vld [vmem:[#allocation6 + $0x2ec] sm:$0xf]  ;;  %v7494_v20 = vld [vmem:[#allocation6 + $0x2f8] sm:$0xf0] }
 0x2a5   :  { %5056 = vmatpush.bf16.msrb.mxu3 %v7701_v9  ;;  %v7764_v9 = vld [vmem:[#allocation6 + $0x508] sm:$0xf]  ;;  %v4830_v12 = vpop.f32.mrf.mxu2  ;;  %5035 = vmatmul.bf16.vlgmr.msra.gmra.mxu2 %v9338_v8  ;;  %v7925_v50 = vor.u32 %v8861_v43, %v7924_v39  ;;  %v8913_v43 = vld [vmem:[#allocation6 + $0x7f4] sm:$0xf0] }
 0x2a6   :  { %5069 = vmatpush.bf16.msrb.mxu1 %v7829_v36  ;;  %v7238_v36 = vld [vmem:[#allocation6 + $0xf8] sm:$0xf0]  ;;  %v7765_v47 = vor.u32 %v8821_v32, %v7764_v9  ;;  %5079 = vmatpush.bf16.msrb.mxu2 %v8005_v33  ;;  %v7572_v9 = vld [vmem:[#allocation6 + $0x388] sm:$0xf]  ;;  %v8773_v32 = vld [vmem:[#allocation6 + $0x394] sm:$0xf0]  ;;  %v7321_v33 = vor.u32 %v8707_v26, %v7318_v27 }
 0x2a7   :  { %4994 = vmatpush.bf16.msrb.mxu0 %v8033_v29  ;;  %v8703_v29 = vld [vmem:[#allocation6 + $0x16c] sm:$0xf]  ;;  %v7573_v38 = vor.u32 %v8773_v32, %v7572_v9  ;;  %v7254_v26 = vld [vmem:[#allocation6 + $0x118] sm:$0xf0]  ;;  %v8132_v39 = vld [vmem:[#allocation6 + $0x7e8] sm:$0xf] }
 0x2a8   :  { %v7305_v12 = vor.u32 %v8703_v29, %v7302_v14  ;;  %v8815_v27 = vld [vmem:[#allocation6 + $0x4ec] sm:$0xf]  ;;  %v7878_v32 = vld [vmem:[#allocation6 + $0x5f8] sm:$0xf0] }
 0x2a9   :  { %5057 = vmatpush.bf16.msrb.mxu3 %v7685_v55  ;;  %v8882_v55 = vld [vmem:[#allocation6 + $0x704] sm:$0xf]  ;;  %v8847_v9 = vld [vmem:[#allocation6 + $0x5ec] sm:$0xf]  ;;  %v7478_v29 = vld [vmem:[#allocation6 + $0x2d8] sm:$0xf0] }
 0x2aa   :  { %5070 = vmatpush.bf16.msrb.mxu1 %v7813_v49  ;;  %v7241_v49 = vor.u32 %v8687_v34, %v7238_v36  ;;  %v8017_v44 = vor.u32 %v8882_v55, %v8014_v7  ;;  %5080 = vmatpush.bf16.msrb.mxu2 %v7989_v16  ;;  %v8671_v34 = vld [vmem:[#allocation6 + $0x6c] sm:$0xf]  ;;  %v7174_v36 = vld [vmem:[#allocation6 + $0x78] sm:$0xf0]  ;;  %v7556_v55 = vld [vmem:[#allocation6 + $0x368] sm:$0xf] }
 0x2ab   :  { %v8769_v7 = vld [vmem:[#allocation6 + $0x374] sm:$0xf0] }
 0x2ac   :  { %4995 = vmatpush.bf16.msrb.mxu0 %v8017_v44  ;;  %v7557_v54 = vor.u32 %v8769_v7, %v7556_v55  ;;  %v8857_v44 = vld [vmem:[#allocation6 + $0x634] sm:$0xf0]  ;;  %v7881_v55 = vor.u32 %v8847_v9, %v7878_v32  ;;  %v8731_v9 = vld [vmem:[#allocation6 + $0x24c] sm:$0xf]  ;;  %v7414_v32 = vld [vmem:[#allocation6 + $0x258] sm:$0xf0] }
 0x2ad   :  { %5058 = vmatpush.bf16.msrb.mxu3 %v7669_v28  ;;  %v7972_v28 = vld [vmem:[#allocation6 + $0x6a8] sm:$0xf] }
 0x2ae   :  { %5071 = vmatpush.bf16.msrb.mxu1 %v7797_v3  ;;  %v7353_v3 = vor.u32 %v8715_v62, %v7350_v56  ;;  %v7973_v37 = vor.u32 %v8873_v1, %v7972_v28  ;;  %v7540_v56 = vld [vmem:[#allocation6 + $0x348] sm:$0xf] }
 0x2af   :  { %4996 = vmatmul.bf16.vlgmr.msrb.gmra.mxu0 %v9392_v60 }
 0x2b0   :  { %5040 = vmatpush.bf16.msra.mxu0 %v7621_v18  ;;  %5081 = vmatpush.bf16.msrb.mxu2 %v7973_v37  ;;  %v8765_v18 = vld [vmem:[#allocation6 + $0x354] sm:$0xf0] }
 0x2b1   :  { %5059 = vmatpush.bf16.msrb.mxu3 %v7653_v40  ;;  %v7190_v40 = vld [vmem:[#allocation6 + $0x98] sm:$0xf0]  ;;  %v7541_v37 = vor.u32 %v8765_v18, %v7540_v56 }
 0x2b2   :  { %5072 = vmatpush.bf16.msrb.mxu1 %v7781_v61  ;;  %v7940_v61 = vld [vmem:[#allocation6 + $0x668] sm:$0xf]  ;;  %v7193_v51 = vor.u32 %v8675_v23, %v7190_v40  ;;  %v8659_v23 = vld [vmem:[#allocation6 + $0xc] sm:$0xf] }
 0x2b3   :  { %v7941_v35 = vor.u32 %v8865_v17, %v7940_v61  ;;  %v8691_v40 = vld [vmem:[#allocation6 + $0x10c] sm:$0xf] }
 0x2b4   :  { %5041 = vmatpush.bf16.msra.mxu0 %v7605_v31  ;;  %5082 = vmatpush.bf16.msrb.mxu2 %v7957_v24  ;;  %v7524_v31 = vld [vmem:[#allocation6 + $0x328] sm:$0xf]  ;;  %v7893_v24 = vor.u32 %v8853_v6, %v7892_v19 }
 0x2b5   :  { %5060 = vmatpush.bf16.msrb.mxu3 %v7637_v42  ;;  %v7177_v42 = vor.u32 %v8671_v34, %v7174_v36  ;;  %v8757_v36 = vld [vmem:[#allocation6 + $0x314] sm:$0xf0] }
 0x2b6   :  { %5073 = vmatpush.bf16.msrb.mxu1 %v7765_v47  ;;  %v8667_v47 = vld [vmem:[#allocation6 + $0x4c] sm:$0xf]  ;;  %v4867_v16 = vpop.f32.mrf.mxu1 }
 0x2b8   :  { %5061 = vmatmul.bf16.vlgmr.msrb.gmra.mxu3 %v9355_v46  ;;  %5042 = vmatpush.bf16.msra.mxu0 %v7589_v45  ;;  %v7750_v45 = vld [vmem:[#allocation6 + $0x4f8] sm:$0xf0] }
 0x2b9   :  { %5105 = vmatpush.bf16.msra.mxu3 %v7241_v49  ;;  %5074 = vmatmul.bf16.vlgmr.msrb.gmra.mxu1 %v9358_v0  ;;  %v7158_v49 = vld [vmem:[#allocation6 + $0x58] sm:$0xf0] }
 0x2ba   :  { %5118 = vmatpush.bf16.msra.mxu1 %v7369_v25  ;;  %5083 = vmatpush.bf16.msrb.mxu2 %v7941_v35  ;;  %v7286_v25 = vld [vmem:[#allocation6 + $0x158] sm:$0xf0]  ;;  %v7161_v62 = vor.u32 %v8667_v47, %v7158_v49  ;;  %v8747_v35 = vld [vmem:[#allocation6 + $0x2cc] sm:$0xf] }
 0x2bb   :  { %v4854_v28 = vpop.f32.mrf.mxu3  ;;  %v7289_v1 = vor.u32 %v8699_v52, %v7286_v25  ;;  %v8811_v47 = vld [vmem:[#allocation6 + $0x4cc] sm:$0xf]  ;;  %v7734_v49 = vld [vmem:[#allocation6 + $0x4d8] sm:$0xf0]  ;;  %v8133_v52 = vor.u32 %v8913_v43, %v8132_v39 }
 0x2bc   :  { %5043 = vmatpush.bf16.msra.mxu0 %v7573_v38  ;;  %v4855_v53 = vadd.f32 %v4854_v28, %v9405_v30  ;;  %v7126_v30 = vld [vmem:[#allocation6 + $0x18] sm:$0xf0]  ;;  %v7257_v38 = vor.u32 %v8691_v40, %v7254_v26  ;;  %v8807_v28 = vld [vmem:[#allocation6 + $0x4ac] sm:$0xf] }
 0x2bd   :  { %5106 = vmatpush.bf16.msra.mxu3 %v7225_v2  ;;  %v8663_v2 = vld [vmem:[#allocation6 + $0x2c] sm:$0xf]  ;;  %v7129_v34 = vor.u32 %v8659_v23, %v7126_v30  ;;  %v7862_v25 = vld [vmem:[#allocation6 + $0x5d8] sm:$0xf0]  ;;  %v8084_v30 = vld [vmem:[#allocation6 + $0x788] sm:$0xf] }
 0x2be   :  { %5119 = vmatpush.bf16.msra.mxu1 %v7353_v3  ;;  %5084 = vmatpush.bf16.msrb.mxu2 %v7925_v50  ;;  %v7909_v3 = vor.u32 %v8857_v44, %v7908_v58  ;;  %v9412_v11 = vadd.f32 %v4867_v16, %v4855_v53  ;;  %v7145_v13 = vor.u32 %v8663_v2, %v7142_v59  ;;  %v4869_v61 = vpop.f32.mrf.mxu1  ;;  %v8843_v50 = vld [vmem:[#allocation6 + $0x5cc] sm:$0xf]  ;;  %v8116_v58 = vld [vmem:[#allocation6 + $0x7c8] sm:$0xf]  ;;  %v8909_v44 = vld [vmem:[#allocation6 + $0x7d4] sm:$0xf0] }
 0x2bf   :  { %v8743_v16 = vld [vmem:[#allocation6 + $0x2ac] sm:$0xf]  ;;  %v7865_v56 = vor.u32 %v8843_v50, %v7862_v25  ;;  %v8117_v59 = vor.u32 %v8909_v44, %v8116_v58  ;;  %v7846_v53 = vld [vmem:[#allocation6 + $0x5b8] sm:$0xf0]  ;;  %v8893_v50 = vld [vmem:[#allocation6 + $0x754] sm:$0xf0] }
 0x2c0   :  { %5044 = vmatpush.bf16.msra.mxu0 %v7557_v54  ;;  %v7462_v54 = vld [vmem:[#allocation6 + $0x2b8] sm:$0xf0]  ;;  %v8839_v2 = vld [vmem:[#allocation6 + $0x5ac] sm:$0xf] }
 0x2c1   :  { %5107 = vmatpush.bf16.msra.mxu3 %v7209_v15  ;;  %v8761_v15 = vld [vmem:[#allocation6 + $0x334] sm:$0xf0]  ;;  %v7465_v18 = vor.u32 %v8743_v16, %v7462_v54  ;;  %v7849_v6 = vor.u32 %v8839_v2, %v7846_v53  ;;  %v7430_v23 = vld [vmem:[#allocation6 + $0x278] sm:$0xf0]  ;;  %v8831_v61 = vld [vmem:[#allocation6 + $0x56c] sm:$0xf] }
 0x2c2   :  { %5120 = vmatpush.bf16.msra.mxu1 %v7337_v22  ;;  %v7273_v22 = vor.u32 %v8695_v48, %v7270_v5  ;;  %5085 = vmatpush.bf16.msrb.mxu2 %v7909_v3  ;;  %v7525_v17 = vor.u32 %v8761_v15, %v7524_v31  ;;  %v8739_v3 = vld [vmem:[#allocation6 + $0x28c] sm:$0xf]  ;;  %v7446_v48 = vld [vmem:[#allocation6 + $0x298] sm:$0xf0]  ;;  %v8100_v5 = vld [vmem:[#allocation6 + $0x7a8] sm:$0xf] }
 0x2c3   :  { %v4856_v14 = vpop.f32.mrf.mxu3  ;;  %v7449_v31 = vor.u32 %v8739_v3, %v7446_v48  ;;  %v7702_v15 = vld [vmem:[#allocation6 + $0x498] sm:$0xf0]  ;;  %v8795_v39 = vld [vmem:[#allocation6 + $0x44c] sm:$0xf]  ;;  %v8889_v3 = vld [vmem:[#allocation6 + $0x734] sm:$0xf0] }
 0x2c4   :  { %5045 = vmatpush.bf16.msra.mxu0 %v7541_v37  ;;  %v8905_v37 = vld [vmem:[#allocation6 + $0x7b4] sm:$0xf0]  ;;  %v7670_v43 = vld [vmem:[#allocation6 + $0x458] sm:$0xf0]  ;;  %v8791_v16 = vld [vmem:[#allocation6 + $0x42c] sm:$0xf] }
 0x2c5   :  { %5108 = vmatpush.bf16.msra.mxu3 %v7193_v51  ;;  %v7497_v51 = vor.u32 %v8751_v21, %v7494_v20  ;;  %v8835_v21 = vld [vmem:[#allocation6 + $0x58c] sm:$0xf]  ;;  %v7830_v20 = vld [vmem:[#allocation6 + $0x598] sm:$0xf0]  ;;  %v7673_v25 = vor.u32 %v8795_v39, %v7670_v43 }
 0x2c6   :  { %5121 = vmatpush.bf16.msra.mxu1 %v7321_v33  ;;  %v7508_v33 = vld [vmem:[#allocation6 + $0x308] sm:$0xf]  ;;  %5086 = vmatpush.bf16.msrb.mxu2 %v7893_v24  ;;  %v7833_v24 = vor.u32 %v8835_v21, %v7830_v20  ;;  %v7382_v2 = vld [vmem:[#allocation6 + $0x218] sm:$0xf0]  ;;  %v8879_v48 = vld [vmem:[#allocation6 + $0x6ec] sm:$0xf] }
 0x2c7   :  { %v7509_v7 = vor.u32 %v8757_v36, %v7508_v33  ;;  %v8897_v36 = vld [vmem:[#allocation6 + $0x774] sm:$0xf0]  ;;  %v8819_v20 = vld [vmem:[#allocation6 + $0x50c] sm:$0xf]  ;;  %v7958_v43 = vld [vmem:[#allocation6 + $0x698] sm:$0xf0] }
 0x2c8   :  { %5046 = vmatpush.bf16.msra.mxu0 %v7525_v17  ;;  %v8867_v39 = vld [vmem:[#allocation6 + $0x68c] sm:$0xf] }
 0x2c9   :  { %5109 = vmatpush.bf16.msra.mxu3 %v7177_v42  ;;  %v7753_v42 = vor.u32 %v8815_v27, %v7750_v45  ;;  %5087 = vmatmul.bf16.vlgmr.msrb.gmra.mxu2 %v9383_v63  ;;  %v8799_v27 = vld [vmem:[#allocation6 + $0x46c] sm:$0xf]  ;;  %v7686_v45 = vld [vmem:[#allocation6 + $0x478] sm:$0xf0] }
 0x2ca   :  { %5122 = vmatpush.bf16.msra.mxu1 %v7305_v12  ;;  %5131 = vmatpush.bf16.msra.mxu2 %v7497_v51  ;;  %v7481_v12 = vor.u32 %v8747_v35, %v7478_v29  ;;  %v7814_v51 = vld [vmem:[#allocation6 + $0x578] sm:$0xf0]  ;;  %v7689_v35 = vor.u32 %v8799_v27, %v7686_v45  ;;  %v3506_v29 = vperm.slane %v9398_v57, 1  ;;  %v8783_v27 = vld [vmem:[#allocation6 + $0x3ec] sm:$0xf] }
 0x2cb   :  { %v7817_v14 = vor.u32 %v8831_v61, %v7814_v51  ;;  %v7622_v45 = vld [vmem:[#allocation6 + $0x3f8] sm:$0xf0] }
 0x2cc   :  { %5047 = vmatpush.bf16.msra.mxu0 %v7509_v7  ;;  %v7798_v7 = vld [vmem:[#allocation6 + $0x558] sm:$0xf0] }
 0x2cd   :  { %5110 = vmatpush.bf16.msra.mxu3 %v7161_v62  ;;  %v7737_v62 = vor.u32 %v8811_v47, %v7734_v49  ;;  %v7398_v47 = vld [vmem:[#allocation6 + $0x238] sm:$0xf0]  ;;  %v8052_v49 = vld [vmem:[#allocation6 + $0x748] sm:$0xf] }
 0x2ce   :  { %5123 = vmatpush.bf16.msra.mxu1 %v7289_v1  ;;  %5132 = vmatpush.bf16.msra.mxu2 %v7481_v12  ;;  %v7718_v1 = vld [vmem:[#allocation6 + $0x4b8] sm:$0xf0]  ;;  %v8727_v12 = vld [vmem:[#allocation6 + $0x22c] sm:$0xf] }
 0x2cf   :  { %5048 = vmatmul.bf16.vlgmr.msra.gmra.mxu0 %v9340_v10  ;;  %v7721_v19 = vor.u32 %v8807_v28, %v7718_v1  ;;  %v7401_v44 = vor.u32 %v8727_v12, %v7398_v47  ;;  %v8053_v28 = vor.u32 %v8893_v50, %v8052_v49  ;;  %v8723_v1 = vld [vmem:[#allocation6 + $0x20c] sm:$0xf]  ;;  %v7942_v49 = vld [vmem:[#allocation6 + $0x678] sm:$0xf0] }
 0x2d0   :  { %5092 = vmatpush.bf16.msrb.mxu0 %v8133_v52  ;;  %v8863_v47 = vld [vmem:[#allocation6 + $0x66c] sm:$0xf] }
 0x2d1   :  { %5111 = vmatpush.bf16.msra.mxu3 %v7145_v13  ;;  %v8803_v13 = vld [vmem:[#allocation6 + $0x48c] sm:$0xf] }
 0x2d2   :  { %5124 = vmatpush.bf16.msra.mxu1 %v7273_v22  ;;  %5133 = vmatpush.bf16.msra.mxu2 %v7465_v18  ;;  %v8735_v22 = vld [vmem:[#allocation6 + $0x26c] sm:$0xf]  ;;  %v7705_v40 = vor.u32 %v8803_v13, %v7702_v15  ;;  %v7782_v18 = vld [vmem:[#allocation6 + $0x538] sm:$0xf0] }
 0x2d3   :  { %v7433_v26 = vor.u32 %v8735_v22, %v7430_v23  ;;  %v8787_v13 = vld [vmem:[#allocation6 + $0x40c] sm:$0xf]  ;;  %v7638_v15 = vld [vmem:[#allocation6 + $0x418] sm:$0xf0]  ;;  %v8020_v23 = vld [vmem:[#allocation6 + $0x708] sm:$0xf] }
 0x2d4   :  { %5093 = vmatpush.bf16.msrb.mxu0 %v8117_v59  ;;  %v8036_v59 = vld [vmem:[#allocation6 + $0x728] sm:$0xf]  ;;  %v7766_v22 = vld [vmem:[#allocation6 + $0x518] sm:$0xf0]  ;;  %v8771_v50 = vld [vmem:[#allocation6 + $0x38c] sm:$0xf] }
 0x2d5   :  { %5112 = vmatpush.bf16.msra.mxu3 %v7129_v34  ;;  %v8068_v34 = vld [vmem:[#allocation6 + $0x768] sm:$0xf]  ;;  %v8037_v21 = vor.u32 %v8889_v3, %v8036_v59  ;;  %v7769_v61 = vor.u32 %v8819_v20, %v7766_v22  ;;  %v7910_v59 = vld [vmem:[#allocation6 + $0x638] sm:$0xf0]  ;;  %v8759_v20 = vld [vmem:[#allocation6 + $0x32c] sm:$0xf] }
 0x2d6   :  { %5125 = vmatpush.bf16.msra.mxu1 %v7257_v38  ;;  %5134 = vmatpush.bf16.msra.mxu2 %v7449_v31  ;;  %v4919_v33 = vpop.f32.mrf.mxu1  ;;  %v7417_v38 = vor.u32 %v8731_v9, %v7414_v32  ;;  %v7385_v31 = vor.u32 %v8723_v1, %v7382_v2  ;;  %v7625_v32 = vor.u32 %v8783_v27, %v7622_v45  ;;  %v8855_v2 = vld [vmem:[#allocation6 + $0x62c] sm:$0xf]  ;;  %v7542_v3 = vld [vmem:[#allocation6 + $0x358] sm:$0xf0] }
 0x2d7   :  { %v7526_v22 = vld [vmem:[#allocation6 + $0x338] sm:$0xf0]  ;;  %v8927_v27 = vld [vmem:[#allocation9 + $0x68] sm:$0xff] }
 0x2d8   :  { %5113 = vmatmul.bf16.vlgmr.msra.gmra.mxu3 %v9334_v4  ;;  %v8101_v4 = vor.u32 %v8905_v37, %v8100_v5  ;;  %v8006_v5 = vld [vmem:[#allocation6 + $0x6f8] sm:$0xf0] }
 0x2d9   :  { %5157 = vmatpush.bf16.msrb.mxu3 %v7753_v42  ;;  %5126 = vmatmul.bf16.vlgmr.msra.gmra.mxu1 %v9336_v41  ;;  %v8901_v41 = vld [vmem:[#allocation6 + $0x794] sm:$0xf0]  ;;  %v8827_v42 = vld [vmem:[#allocation6 + $0x54c] sm:$0xf] }
 0x2da   :  { %5170 = vmatpush.bf16.msrb.mxu1 %v7881_v55  ;;  %5094 = vmatpush.bf16.msrb.mxu0 %v8101_v4  ;;  %v8085_v17 = vor.u32 %v8901_v41, %v8084_v30  ;;  %v8069_v55 = vor.u32 %v8897_v36, %v8068_v34  ;;  %v7801_v58 = vor.u32 %v8827_v42, %v7798_v7  ;;  %v8885_v30 = vld [vmem:[#allocation6 + $0x714] sm:$0xf0]  ;;  %v8875_v41 = vld [vmem:[#allocation6 + $0x6cc] sm:$0xf]  ;;  %v7974_v34 = vld [vmem:[#allocation6 + $0x6b8] sm:$0xf0] }
 0x2db   :  { %5135 = vmatpush.bf16.msra.mxu2 %v7433_v26  ;;  %v4906_v52 = vpop.f32.mrf.mxu3  ;;  %v8009_v4 = vor.u32 %v8879_v48, %v8006_v5  ;;  %v7641_v26 = vor.u32 %v8787_v13, %v7638_v15  ;;  %v8021_v51 = vor.u32 %v8885_v30, %v8020_v23  ;;  %v8779_v36 = vld [vmem:[#allocation6 + $0x3cc] sm:$0xf]  ;;  %v7961_v7 = vor.u32 %v8867_v39, %v7958_v43  ;;  %v8929_v48 = vld [vmem:[#allocation9 + $0x78] sm:$0xff]  ;;  %v8928_v23 = vld [vmem:[#allocation9 + $0x70] sm:$0xff] }
 0x2dc   :  { %v4907_v54 = vadd.f32 %v4906_v52, %v3506_v29  ;;  %v8920_v29 = vld [vmem:[#allocation9 + $0x30] sm:$0xff]  ;;  %v8775_v42 = vld [vmem:[#allocation6 + $0x3ac] sm:$0xf]  ;;  %v7574_v52 = vld [vmem:[#allocation6 + $0x398] sm:$0xf0] }
 0x2dd   :  { %5158 = vmatpush.bf16.msrb.mxu3 %v7737_v62  ;;  %v7654_v62 = vld [vmem:[#allocation6 + $0x438] sm:$0xf0]  ;;  %v8851_v15 = vld [vmem:[#allocation6 + $0x60c] sm:$0xf] }
 0x2de   :  { %5171 = vmatpush.bf16.msrb.mxu1 %v7865_v56  ;;  %5095 = vmatpush.bf16.msrb.mxu0 %v8085_v17  ;;  %v8823_v56 = vld [vmem:[#allocation6 + $0x52c] sm:$0xf]  ;;  %v4921_v53 = vpop.f32.mrf.mxu1  ;;  %v9419_v37 = vadd.f32 %v4919_v33, %v4907_v54  ;;  %v8921_v17 = vld [vmem:[#allocation9 + $0x38] sm:$0xff] }
 0x2df   :  { %5136 = vmatpush.bf16.msra.mxu2 %v7417_v38  ;;  %v8871_v33 = vld [vmem:[#allocation6 + $0x6ac] sm:$0xf]  ;;  %v8102_v39 = vld [vmem:[#allocation6 + $0x7b8] sm:$0xf0] }
 0x2e0   :  { %v8859_v54 = vld [vmem:[#allocation6 + $0x64c] sm:$0xf] }
 0x2e1   :  { %5159 = vmatpush.bf16.msrb.mxu3 %v7721_v19  ;;  %v7657_v19 = vor.u32 %v8791_v16, %v7654_v62  ;;  %v7577_v16 = vor.u32 %v8771_v50, %v7574_v52  ;;  %v8767_v62 = vld [vmem:[#allocation6 + $0x36c] sm:$0xf] }
 0x2e2   :  { %5172 = vmatpush.bf16.msrb.mxu1 %v7849_v6  ;;  %5096 = vmatpush.bf16.msrb.mxu0 %v8069_v55  ;;  %v7785_v6 = vor.u32 %v8823_v56, %v7782_v18  ;;  %v7590_v55 = vld [vmem:[#allocation6 + $0x3b8] sm:$0xf0]  ;;  %v8763_v53 = vld [vmem:[#allocation6 + $0x34c] sm:$0xf] }
 0x2e3   :  { %5137 = vmatpush.bf16.msra.mxu2 %v7401_v44  ;;  %v7593_v12 = vor.u32 %v8775_v42, %v7590_v55  ;;  %v7558_v56 = vld [vmem:[#allocation6 + $0x378] sm:$0xf0]  ;;  %v7545_v13 = vor.u32 %v8763_v53, %v7542_v3  ;;  %v8915_v30 = vld [vmem:[#allocation9 + $0x8] sm:$0xff]  ;;  %v8924_v42 = vld [vmem:[#allocation9 + $0x50] sm:$0xff] }
 0x2e4   :  { %v8917_v18 = vld [vmem:[#allocation9 + $0x18] sm:$0xff]  ;;  %v7561_v1 = vor.u32 %v8767_v62, %v7558_v56  ;;  %v8922_v62 = vld [vmem:[#allocation9 + $0x40] sm:$0xff]  ;;  %v8887_v53 = vld [vmem:[#allocation6 + $0x72c] sm:$0xf] }
 0x2e5   :  { %5160 = vmatpush.bf16.msrb.mxu3 %v7705_v40  ;;  %v7990_v40 = vld [vmem:[#allocation6 + $0x6d8] sm:$0xf0] }
 0x2e6   :  { %5173 = vmatpush.bf16.msrb.mxu1 %v7833_v24  ;;  %5097 = vmatpush.bf16.msrb.mxu0 %v8053_v28  ;;  %v4908_v24 = vpop.f32.mrf.mxu3  ;;  %v7993_v9 = vor.u32 %v8875_v41, %v7990_v40  ;;  %v7529_v40 = vor.u32 %v8759_v20, %v7526_v22  ;;  %v8038_v3 = vld [vmem:[#allocation6 + $0x738] sm:$0xf0] }
 0x2e7   :  { %5138 = vmatpush.bf16.msra.mxu2 %v7385_v31  ;;  %v7913_v31 = vor.u32 %v8855_v2, %v7910_v59  ;;  %v8755_v24 = vld [vmem:[#allocation6 + $0x30c] sm:$0xf] }
 0x2e9   :  { %5161 = vmatpush.bf16.msrb.mxu3 %v7689_v35  ;;  %v7606_v35 = vld [vmem:[#allocation6 + $0x3d8] sm:$0xf0] }
 0x2ea   :  { %5174 = vmatpush.bf16.msrb.mxu1 %v7817_v14  ;;  %5098 = vmatpush.bf16.msrb.mxu0 %v8037_v21  ;;  %v7977_v14 = vor.u32 %v8871_v33, %v7974_v34  ;;  %v7609_v38 = vor.u32 %v8779_v36, %v7606_v35  ;;  %v7894_v21 = vld [vmem:[#allocation6 + $0x618] sm:$0xf0]  ;;  %v8926_v34 = vld [vmem:[#allocation9 + $0x60] sm:$0xff]  ;;  %v8907_v36 = vld [vmem:[#allocation6 + $0x7cc] sm:$0xf] }
 0x2eb   :  { %5183 = vmatpush.bf16.msrb.mxu2 %v8009_v4  ;;  %v7897_v41 = vor.u32 %v8851_v15, %v7894_v21  ;;  %v8118_v35 = vld [vmem:[#allocation6 + $0x7d8] sm:$0xf0] }
 0x2ec   :  { %5139 = vmatmul.bf16.vlgmr.msra.gmra.mxu2 %v9338_v8  ;;  %v8919_v8 = vld [vmem:[#allocation9 + $0x28] sm:$0xff] }
 0x2ed   :  { %5162 = vmatpush.bf16.msrb.mxu3 %v7673_v25  ;;  %v9425_v25 = vpop.f32.mrf.mxu2 }
 0x2ee   :  { %5175 = vmatpush.bf16.msrb.mxu1 %v7801_v58  ;;  %5099 = vmatpush.bf16.msrb.mxu0 %v8021_v51  ;;  %v7926_v58 = vld [vmem:[#allocation6 + $0x658] sm:$0xf0]  ;;  %v8914_v51 = vld [vmem:[#allocation9] sm:$0xff] }
 0x2ef   :  { %5184 = vmatpush.bf16.msrb.mxu2 %v7993_v9  ;;  %v7929_v28 = vor.u32 %v8859_v54, %v7926_v58  ;;  %v3507_v54 = vperm.slane %v9398_v57, 2  ;;  %v8041_v57 = vor.u32 %v8887_v53, %v8038_v3  ;;  %v8942_v3 = vld [vmem:[#allocation9 + $0xe0] sm:$0xff] }
 0x2f1   :  { %5163 = vmatpush.bf16.msrb.mxu3 %v7657_v19  ;;  %5100 = vmatmul.bf16.vlgmr.msrb.gmra.mxu0 %v9392_v60  ;;  %v8916_v19 = vld [vmem:[#allocation9 + $0x10] sm:$0xff] }
 0x2f2   :  { %5176 = vmatpush.bf16.msrb.mxu1 %v7785_v6  ;;  %5144 = vmatpush.bf16.msra.mxu0 %v7625_v32 }
 0x2f3   :  { %5185 = vmatpush.bf16.msrb.mxu2 %v7977_v14  ;;  %v8925_v14 = vld [vmem:[#allocation9 + $0x58] sm:$0xff] }
 0x2f5   :  { %5164 = vmatpush.bf16.msrb.mxu3 %v7641_v26  ;;  %v4882_v6 = vpop.f32.mrf.mxu2  ;;  %v7510_v26 = vld [vmem:[#allocation6 + $0x318] sm:$0xf0] }
 0x2f6   :  { %5177 = vmatpush.bf16.msrb.mxu1 %v7769_v61  ;;  %5145 = vmatpush.bf16.msra.mxu0 %v7609_v38  ;;  %v9427_v44 = vpop.f32.mrf.mxu1  ;;  %v8911_v61 = vld [vmem:[#allocation6 + $0x7ec] sm:$0xf]  ;;  %v7513_v32 = vor.u32 %v8755_v24, %v7510_v26 }
 0x2f7   :  { %5186 = vmatpush.bf16.msrb.mxu2 %v7961_v7  ;;  %v8903_v38 = vld [vmem:[#allocation6 + $0x7ac] sm:$0xf]  ;;  %v8086_v7 = vld [vmem:[#allocation6 + $0x798] sm:$0xf0] }
 0x2f8   :  { %5165 = vmatmul.bf16.vlgmr.msrb.gmra.mxu3 %v9355_v46  ;;  %v8918_v46 = vld [vmem:[#allocation9 + $0x20] sm:$0xff]  ;;  %v8105_v55 = vor.u32 %v8903_v38, %v8102_v39  ;;  %v8883_v6 = vld [vmem:[#allocation6 + $0x70c] sm:$0xf] }
 0x2f9   :  { %5477 = vmatpush.bf16.msra.mxu3 %v8921_v17  ;;  %5178 = vmatmul.bf16.vlgmr.msrb.gmra.mxu1 %v9358_v0  ;;  %v7945_v0 = vor.u32 %v8863_v47, %v7942_v49  ;;  %v8134_v17 = vld [vmem:[#allocation6 + $0x7f8] sm:$0xf0]  ;;  %v8923_v49 = vld [vmem:[#allocation9 + $0x48] sm:$0xff]  ;;  %v8930_v38 = vld [vmem:[#allocation9 + $0x80] sm:$0xff] }
 0x2fa   :  { %5146 = vmatpush.bf16.msra.mxu0 %v7593_v12  ;;  %5490 = vmatpush.bf16.msra.mxu1 %v8929_v48  ;;  %v8137_v33 = vor.u32 %v8911_v61, %v8134_v17 }
 0x2fb   :  { %5187 = vmatpush.bf16.msrb.mxu2 %v7945_v0  ;;  %v9429_v5 = vpop.f32.mrf.mxu3  ;;  %v8070_v0 = vld [vmem:[#allocation6 + $0x778] sm:$0xf0] }
 0x2fd   :  { %5478 = vmatpush.bf16.msra.mxu3 %v8920_v29  ;;  %v9431_v9 = vpop.f32.mrf.mxu2  ;;  %v8121_v29 = vor.u32 %v8907_v36, %v8118_v35  ;;  %v8932_v36 = vld [vmem:[#allocation9 + $0x90] sm:$0xff]  ;;  %v8931_v35 = vld [vmem:[#allocation9 + $0x88] sm:$0xff] }
 0x2fe   :  { %5147 = vmatpush.bf16.msra.mxu0 %v7577_v16  ;;  %v4973_v4 = vpop.f32.mrf.mxu1  ;;  %5491 = vmatpush.bf16.msra.mxu1 %v8928_v23 }
 0x2ff   :  { %5188 = vmatpush.bf16.msrb.mxu2 %v7929_v28  ;;  %v8054_v28 = vld [vmem:[#allocation6 + $0x758] sm:$0xf0]  ;;  %v4933_v4 = vadd.f32 %v9431_v9, %v9419_v37  ;;  %v8936_v37 = vld [vmem:[#allocation9 + $0xb0] sm:$0xff] }
 0x301   :  { %5479 = vmatpush.bf16.msra.mxu3 %v8919_v8  ;;  %v8899_v8 = vld [vmem:[#allocation6 + $0x78c] sm:$0xf] }
 0x302   :  { %5148 = vmatpush.bf16.msra.mxu0 %v7561_v1  ;;  %5492 = vmatpush.bf16.msra.mxu1 %v8927_v27  ;;  %v8089_v47 = vor.u32 %v8899_v8, %v8086_v7 }
 0x303   :  { %5189 = vmatpush.bf16.msrb.mxu2 %v7913_v31  ;;  %v4960_v45 = vpop.f32.mrf.mxu3  ;;  %v8022_v31 = vld [vmem:[#allocation6 + $0x718] sm:$0xf0] }
 0x304   :  { %v8025_v21 = vor.u32 %v8883_v6, %v8022_v31  ;;  %v8937_v45 = vld [vmem:[#allocation9 + $0xb8] sm:$0xff]  ;;  %v8939_v6 = vld [vmem:[#allocation9 + $0xc8] sm:$0xff] }
 0x305   :  { %5480 = vmatpush.bf16.msra.mxu3 %v8918_v46  ;;  %v4934_v43 = vpop.f32.mrf.mxu2  ;;  %v4893_v12 = vpop.f32.mrf.mxu0  ;;  %v8895_v46 = vld [vmem:[#allocation6 + $0x76c] sm:$0xf] }
 0x306   :  { %5149 = vmatpush.bf16.msra.mxu0 %v7545_v13  ;;  %5493 = vmatpush.bf16.msra.mxu1 %v8926_v34  ;;  %v8073_v58 = vor.u32 %v8895_v46, %v8070_v0  ;;  %v8933_v34 = vld [vmem:[#allocation9 + $0x98] sm:$0xff] }
 0x307   :  { %5190 = vmatpush.bf16.msrb.mxu2 %v7897_v41  ;;  %v8961_v43 = vld [vmem:[#allocation7] sm:$0xf] }
 0x309   :  { %5481 = vmatpush.bf16.msra.mxu3 %v8917_v18  ;;  %v8891_v18 = vld [vmem:[#allocation6 + $0x74c] sm:$0xf] }
 0x30a   :  { %5150 = vmatpush.bf16.msra.mxu0 %v7529_v40  ;;  %5191 = vmatmul.bf16.vlgmr.msrb.gmra.mxu2 %v9383_v63  ;;  %v4881_v63 = vadd.f32 %v9425_v25, %v9412_v11  ;;  %v8057_v2 = vor.u32 %v8891_v18, %v8054_v28 }
 0x30b   :  { %5494 = vmatpush.bf16.msra.mxu1 %v8925_v14  ;;  %5503 = vmatpush.bf16.msra.mxu2 %v8937_v45 }
 0x30c   :  { %v4894_v50 = vadd.f32 %v4893_v12, %v4881_v63 }
 0x30d   :  { %5482 = vmatpush.bf16.msra.mxu3 %v8916_v19  ;;  %v4984_v16 = vpop.f32.mrf.mxu2  ;;  %v4895_v1 = vpop.f32.mrf.mxu0 }
 0x30e   :  { %5151 = vmatpush.bf16.msra.mxu0 %v7513_v32 }
 0x30f   :  { %5495 = vmatpush.bf16.msra.mxu1 %v8924_v42  ;;  %5504 = vmatpush.bf16.msra.mxu2 %v8936_v37  ;;  %v3508_v42 = vperm.slane %v8961_v43, 3 }
 0x311   :  { %5483 = vmatpush.bf16.msra.mxu3 %v8915_v30  ;;  %5152 = vmatmul.bf16.vlgmr.msra.gmra.mxu0 %v9340_v10  ;;  %v5209_v10 = vmax.f32 %v4894_v50, 0.0 }
 0x312   :  { %5196 = vmatpush.bf16.msrb.mxu0 %v8137_v33 }
 0x313   :  { %5496 = vmatpush.bf16.msra.mxu1 %v8923_v49  ;;  %v5213_v56 = vpack.c.bf16 %v5209_v10, %v5209_v10 }
 0x315   :  { %5484 = vmatpush.bf16.msra.mxu3 %v8914_v51  ;;  %v4986_v19 = vpop.f32.mrf.mxu2  ;;  %v4945_v15 = vpop.f32.mrf.mxu0 }
 0x316   :  { %5197 = vmatpush.bf16.msrb.mxu0 %v8121_v29  ;;  %v5023_v52 = vpop.f32.mrf.mxu1  ;;  %v4946_v20 = vadd.f32 %v4945_v15, %v4933_v4  ;;  %v8941_v19 = vld [vmem:[#allocation9 + $0xd8] sm:$0xff] }
 0x317   :  { %5497 = vmatpush.bf16.msra.mxu1 %v8922_v62 }
 0x318   :  { %5485 = vmatmul.bf16.vlgmr.msra.gmra.mxu3 %v5213_v56  ;;  %v4959_v22 = vadd.f32 %v9429_v5, %v4946_v20  ;;  %v8945_v56 = vld [vmem:[#allocation9 + $0xf8] sm:$0xff] }
 0x31a   :  { %5198 = vmatpush.bf16.msrb.mxu0 %v8105_v55  ;;  %v4972_v30 = vadd.f32 %v9427_v44, %v4959_v22  ;;  %v8934_v44 = vld [vmem:[#allocation9 + $0xa0] sm:$0xff] }
 0x31b   :  { %v5010_v11 = vpop.f32.mrf.mxu3 }
 0x31c   :  { %v5011_v25 = vadd.f32 %v5010_v11, %v3507_v54  ;;  %v4985_v40 = vadd.f32 %v4984_v16, %v4972_v30 }
 0x31d   :  { %v4947_v23 = vpop.f32.mrf.mxu0 }
 0x31e   :  { %5199 = vmatpush.bf16.msrb.mxu0 %v8089_v47  ;;  %v5025_v59 = vpop.f32.mrf.mxu1  ;;  %v5024_v48 = vadd.f32 %v5023_v52, %v5011_v25  ;;  %v8944_v25 = vld [vmem:[#allocation9 + $0xf0] sm:$0xff] }
 0x322   :  { %5200 = vmatpush.bf16.msrb.mxu0 %v8073_v58 }
 0x323   :  { %v5012_v13 = vpop.f32.mrf.mxu3 }
 0x324   :  { %v8938_v13 = vld [vmem:[#allocation9 + $0xc0] sm:$0xff] }
 0x326   :  { %5201 = vmatpush.bf16.msrb.mxu0 %v8057_v2  ;;  %v8943_v2 = vld [vmem:[#allocation9 + $0xe8] sm:$0xff] }
 0x328   :  { %v5036_v26 = vpop.f32.mrf.mxu2 }
 0x329   :  { %v5037_v50 = vadd.f32 %v5036_v26, %v5024_v48 }
 0x32a   :  { %5202 = vmatpush.bf16.msrb.mxu0 %v8041_v57  ;;  %v8940_v57 = vld [vmem:[#allocation9 + $0xd0] sm:$0xff] }
 0x32c   :  { %v4997_v24 = vpop.f32.mrf.mxu0 }
 0x32d   :  { %v4998_v27 = vadd.f32 %v4997_v24, %v4985_v40 }
 0x32e   :  { %5203 = vmatpush.bf16.msrb.mxu0 %v8025_v21 }
 0x32f   :  { %v5210_v61 = vmax.f32 %v4998_v27, 0.0 }
 0x330   :  { %v5038_v32 = vpop.f32.mrf.mxu2 }
 0x331   :  { %5204 = vmatmul.bf16.vlgmr.msrb.gmra.mxu0 %v9392_v60  ;;  %v5214_v51 = vpack.c.bf16 %v5210_v61, %v5210_v61  ;;  %v8935_v60 = vld [vmem:[#allocation9 + $0xa8] sm:$0xff] }
 0x332   :  { %5505 = vmatpush.bf16.msra.mxu2 %v8935_v60  ;;  %5516 = vmatpush.bf16.msra.mxu0 %v8945_v56 }
 0x333   :  { %5498 = vmatmul.bf16.vlgmr.msra.gmra.mxu1 %v5214_v51  ;;  %v8958_v51 = vld [vmem:[#allocation10] ss:$0 sm:$0xff] }
 0x334   :  { %v4999_v5 = vpop.f32.mrf.mxu0 }
 0x336   :  { %v5075_v41 = vpop.f32.mrf.mxu1  ;;  %5506 = vmatpush.bf16.msra.mxu2 %v8934_v44  ;;  %5517 = vmatpush.bf16.msra.mxu0 %v8944_v25 }
 0x33a   :  { %5507 = vmatpush.bf16.msra.mxu2 %v8933_v34  ;;  %5518 = vmatpush.bf16.msra.mxu0 %v8943_v2 }
 0x33b   :  { %v5062_v17 = vpop.f32.mrf.mxu3 }
 0x33e   :  { %v5077_v9 = vpop.f32.mrf.mxu1  ;;  %5508 = vmatpush.bf16.msra.mxu2 %v8932_v36  ;;  %5519 = vmatpush.bf16.msra.mxu0 %v8942_v3 }
 0x342   :  { %5509 = vmatpush.bf16.msra.mxu2 %v8931_v35  ;;  %5520 = vmatpush.bf16.msra.mxu0 %v8941_v19 }
 0x343   :  { %v5064_v33 = vpop.f32.mrf.mxu3 }
 0x346   :  { %5510 = vmatpush.bf16.msra.mxu2 %v8930_v38  ;;  %5521 = vmatpush.bf16.msra.mxu0 %v8940_v57 }
 0x34a   :  { %5522 = vmatpush.bf16.msra.mxu0 %v8939_v6 }
 0x34c   :  { %v5049_v14 = vpop.f32.mrf.mxu0  ;;  %v5088_v39 = vpop.f32.mrf.mxu2 }
 0x34d   :  { %v5050_v52 = vadd.f32 %v5049_v14, %v5037_v50 }
 0x34e   :  { %5523 = vmatpush.bf16.msra.mxu0 %v8938_v13 }
 0x34f   :  { %v5063_v46 = vadd.f32 %v5062_v17, %v5050_v52 }
 0x351   :  { %v5076_v0 = vadd.f32 %v5075_v41, %v5063_v46 }
 0x353   :  { %v5089_v10 = vadd.f32 %v5088_v39, %v5076_v0 }
 0x354   :  { %v5051_v12 = vpop.f32.mrf.mxu0  ;;  %v5090_v47 = vpop.f32.mrf.mxu2 }
 0x356   :  { %v5127_v29 = vpop.f32.mrf.mxu1 }
 0x35b   :  { %v5114_v55 = vpop.f32.mrf.mxu3 }
 0x35c   :  { %v5115_v8 = vadd.f32 %v5114_v55, %v3508_v42 }
 0x35e   :  { %v5129_v7 = vpop.f32.mrf.mxu1  ;;  %v5128_v63 = vadd.f32 %v5127_v29, %v5115_v8 }
 0x363   :  { %v5116_v49 = vpop.f32.mrf.mxu3 }
 0x36e   :  { %v5101_v54 = vpop.f32.mrf.mxu0 }
 0x36f   :  { %v5102_v58 = vadd.f32 %v5101_v54, %v5089_v10  ;;  %v5140_v62 = vpop.f32.mrf.mxu2 }
 0x370   :  { %v5141_v20 = vadd.f32 %v5140_v62, %v5128_v63 }
 0x371   :  { %v5211_v18 = vmax.f32 %v5102_v58, 0.0 }
 0x373   :  { %v5215_v11 = vpack.c.bf16 %v5211_v18, %v5211_v18 }
 0x375   :  { %5511 = vmatmul.bf16.vlgmr.msra.gmra.mxu2 %v5215_v11 }
 0x376   :  { %v5179_v16 = vpop.f32.mrf.mxu1  ;;  %v5103_v59 = vpop.f32.mrf.mxu0 }
 0x377   :  { %v5142_v53 = vpop.f32.mrf.mxu2 }
 0x37b   :  { %v5166_v28 = vpop.f32.mrf.mxu3 }
 0x37e   :  { %v5181_v1 = vpop.f32.mrf.mxu1 }
 0x383   :  { %v5168_v48 = vpop.f32.mrf.mxu3 }
 0x38d   :  { %v5192_v15 = vpop.f32.mrf.mxu2 }
 0x38e   :  { %v5153_v31 = vpop.f32.mrf.mxu0 }
 0x38f   :  { %v5154_v22 = vadd.f32 %v5153_v31, %v5141_v20 }
 0x391   :  { %v5167_v30 = vadd.f32 %v5166_v28, %v5154_v22 }
 0x393   :  { %v5180_v41 = vadd.f32 %v5179_v16, %v5167_v30 }
 0x395   :  { %v5194_v4 = vpop.f32.mrf.mxu2  ;;  %v5193_v24 = vadd.f32 %v5192_v15, %v5180_v41 }
 0x396   :  { %v5155_v21 = vpop.f32.mrf.mxu0 }
 0x39b   :  { %v5486_v23 = vpop.f32.mrf.mxu3 }
 0x39c   :  { %v5487_v37 = vadd.f32 %v8958_v51, %v5486_v23 }
 0x3a3   :  { %v5488_v40 = vpop.f32.mrf.mxu3 }
 0x3ae   :  { %v5205_v26 = vpop.f32.mrf.mxu0 }
 0x3af   :  { %v5206_v27 = vadd.f32 %v5205_v26, %v5193_v24 }
 0x3b0   :  { %v5499_v9 = vpop.f32.mrf.mxu1 }
 0x3b1   :  { %v5212_v45 = vmax.f32 %v5206_v27, 0.0  ;;  %v5500_v5 = vadd.f32 %v5499_v9, %v5487_v37 }
 0x3b3   :  { %v5216_v61 = vpack.c.bf16 %v5212_v45, %v5212_v45 }
 0x3b5   :  { %5524 = vmatmul.bf16.vlgmr.msra.gmra.mxu0 %v5216_v61 }
 0x3b6   :  { %v5207_v17 = vpop.f32.mrf.mxu0 }
 0x3b8   :  { %v5501_v32 = vpop.f32.mrf.mxu1 }
 0x3f8   :  { %v5512_v60 = vpop.f32.mrf.mxu2 }
 0x3f9   :  { %v5513_v44 = vadd.f32 %v5512_v60, %v5500_v5 }
 0x400   :  { %v5514_v33 = vpop.f32.mrf.mxu2 }
 0x432   :  { %v5525_v34 = vpop.f32.mrf.mxu0 }
 0x433   :  { %v5526_v36 = vadd.f32 %v5525_v34, %v5513_v44 }
 0x435   :  { %5529 = vst [vmem:[%s9453_s7] sm:$0xff] %v5526_v36 }
 0x43a   :  { %v5527_v35 = vpop.f32.mrf.mxu0 }
 0x43b   :  { %5534 = vsyncpa [#allocation3], 1 }
 0x43c   :  { %5535 = vsyncpa [#allocation5], 1 }
 0x43d   :  { %5536 = vsyncpa [#allocation8], 1 }
 0x43e   :  { %5537 = vsyncpa [#allocation11], 1 }

</bundles_post_ra>
